<compile_context>
chip_gen: v7x
topology: tpu7x:2x2x1
jax: 0.10.0
libtpu: 0.0.40
codegen_flags: <defaults>
</compile_context>

<pallas_src>
import functools

import jax
import jax.numpy as jnp
from jax.experimental import pallas as pl
from jax.experimental.pallas import tpu as pltpu

IN_DIM = 28 * 28          # 784 (kept unpadded; minor block dim == full dim)
HID = 512
OUT_DIM = 10
OUT_PAD = 128             # lane-dense padded output width
NEG_BIG = -1e30           # pad-lane bias (finite, so no inf-inf NaNs)


def _round_up(x, m):
    return ((x + m - 1) // m) * m


def _pick_tiling(B, tile_b):
    """Choose (eff_tile, B_pad). eff_tile is a multiple of 128; prefer an even
    step count >= 2 (v7x megacore) when the tile can be halved cleanly."""
    tile_b = max(128, (tile_b // 128) * 128)
    B_pad = _round_up(B, 128)                 # full 128-row MXU M passes
    eff_tile = min(tile_b, B_pad)
    B_pad = _round_up(B, eff_tile)
    n_steps = B_pad // eff_tile
    if n_steps % 2 == 1 and eff_tile % 256 == 0:
        # Split so the "parallel" batch axis can be sharded across both
        # TensorCores on v7x; harmless on v5e/v6e.
        eff_tile //= 2
        B_pad = _round_up(B, eff_tile)
    return eff_tile, B_pad


def mlp_kernel(x_ref, w1_ref, b1_ref, w2_ref, b2_ref, w3_ref, b3_ref, o_ref):
    """Fused 3-layer MLP + log-softmax on one batch tile.

    x_ref: (tile_b, 784) f32         w1: (784, 512) bf16   b1: (1, 512) f32
    w2: (512, 512) bf16  b2: (1, 512) f32
    w3: (512, 128) bf16  b3: (1, 128) f32 (lanes >= 10 hold -1e30)
    o_ref: (tile_b, 128) f32
    """
    # Layer 1: Linear(784->512) + ReLU.  f32 activations are cast to bf16 here
    # (inside the kernel, no wrapper HBM round trip); bf16 MXU, f32 accumulate.
    x = x_ref[...].astype(jnp.bfloat16)
    h1 = jnp.dot(x, w1_ref[...],
                 preferred_element_type=jnp.float32) + b1_ref[...]
    h1 = jnp.maximum(h1, 0.0)

    # Layer 2: Linear(512->512) + ReLU.
    h2 = jnp.dot(h1.astype(jnp.bfloat16), w2_ref[...],
                 preferred_element_type=jnp.float32) + b2_ref[...]
    h2 = jnp.maximum(h2, 0.0)

    # Layer 3: Linear(512->128). Pad lanes get logit ~ -1e30 via the bias, so
    # they contribute exp(~-1e30)=0 to the normalizer and never win the max.
    logits = jnp.dot(h2.astype(jnp.bfloat16), w3_ref[...],
                     preferred_element_type=jnp.float32) + b3_ref[...]

    # LogSoftmax(dim=1), numerically stable.
    m = jnp.max(logits, axis=1, keepdims=True)
    shifted = logits - m
    lse = jnp.log(jnp.sum(jnp.exp(shifted), axis=1, keepdims=True))
    o_ref[...] = (shifted - lse).astype(o_ref.dtype)


def prepare_params(params):
    """One-time param prep: pad N (10->128), cast weights to bf16."""
    w1, b1, w2, b2, w3, b3 = params
    w3p = jnp.zeros((HID, OUT_PAD), jnp.float32).at[:, :OUT_DIM].set(w3)
    b3p = jnp.full((1, OUT_PAD), NEG_BIG, jnp.float32).at[:, :OUT_DIM].set(b3)
    return (w1.astype(jnp.bfloat16), b1.astype(jnp.float32),
            w2.astype(jnp.bfloat16), b2.astype(jnp.float32),
            w3p.astype(jnp.bfloat16), b3p)


@functools.partial(jax.jit, static_argnames=("tile_b",))
def neural_network_forward(x, prepped_params, tile_b=512):
    """x: (B, 1, 28, 28) float32 (NCHW). Returns (B, 10) log-probabilities."""
    w1, b1, w2, b2, w3, b3 = prepped_params
    B = x.shape[0]

    eff_tile, B_pad = _pick_tiling(B, tile_b)

    # Flatten (free reshape).  Only the batch axis is ever padded, and only
    # when B isn't already a multiple of the tile — no feature pad, no cast.
    x_flat = x.reshape(B, -1)
    if x_flat.dtype != jnp.float32:
        x_flat = x_flat.astype(jnp.float32)
    if B_pad != B:
        x_flat = jnp.pad(x_flat, ((0, B_pad - B), (0, 0)))

    grid = (B_pad // eff_tile,)

    flops = 2 * B_pad * (IN_DIM * HID + HID * HID + HID * OUT_PAD)
    bytes_accessed = (
        (IN_DIM * HID + HID * HID + HID * OUT_PAD) * 2   # bf16 weights
        + (HID + HID + OUT_PAD) * 4                      # f32 biases
        + B_pad * IN_DIM * 4                             # f32 activations in
        + B_pad * OUT_PAD * 4)                           # f32 log-probs out
    cost = pl.CostEstimate(flops=flops,
                           transcendentals=B_pad * (OUT_PAD + 1),
                           bytes_accessed=bytes_accessed)

    out = pl.pallas_call(
        mlp_kernel,
        out_shape=jax.ShapeDtypeStruct((B_pad, OUT_PAD), jnp.float32),
        grid_spec=pltpu.PrefetchScalarGridSpec(
            num_scalar_prefetch=0,
            grid=grid,
            in_specs=[
                pl.BlockSpec((eff_tile, IN_DIM), lambda i: (i, 0)),  # x tile (f32)
                pl.BlockSpec((IN_DIM, HID),      lambda i: (0, 0)),  # W1 (resident)
                pl.BlockSpec((1, HID),           lambda i: (0, 0)),  # b1
                pl.BlockSpec((HID, HID),         lambda i: (0, 0)),  # W2
                pl.BlockSpec((1, HID),           lambda i: (0, 0)),  # b2
                pl.BlockSpec((HID, OUT_PAD),     lambda i: (0, 0)),  # W3
                pl.BlockSpec((1, OUT_PAD),       lambda i: (0, 0)),  # b3
            ],
            out_specs=pl.BlockSpec((eff_tile, OUT_PAD), lambda i: (i, 0)),
        ),
        compiler_params=pltpu.CompilerParams(
            dimension_semantics=("parallel",),
            vmem_limit_bytes=32 * 1024 * 1024),
        cost_estimate=cost,
    )(x_flat, w1, b1, w2, b2, w3, b3)

    return out[:B, :OUT_DIM]


def init_params(key):
    """Deterministic init mimicking nn.Linear default: U(-1/sqrt(fan_in), +)."""
    ks = jax.random.split(key, 6)

    def linear(kw, kb, fan_in, fan_out):
        bound = 1.0 / jnp.sqrt(jnp.float32(fan_in))
        w = jax.random.uniform(kw, (fan_in, fan_out), jnp.float32, -bound, bound)
        b = jax.random.uniform(kb, (1, fan_out), jnp.float32, -bound, bound)
        return w, b

    w1, b1 = linear(ks[0], ks[1], IN_DIM, HID)
    w2, b2 = linear(ks[2], ks[3], HID, HID)
    w3, b3 = linear(ks[4], ks[5], HID, OUT_DIM)
    return (w1, b1, w2, b2, w3, b3)


def reference_forward_f32(x, params):
    """Pure-JAX f32 reference (matches the PyTorch module exactly)."""
    w1, b1, w2, b2, w3, b3 = params
    h = x.reshape(x.shape[0], -1)
    h = jnp.maximum(h @ w1 + b1, 0.0)
    h = jnp.maximum(h @ w2 + b2, 0.0)
    return jax.nn.log_softmax(h @ w3 + b3, axis=1)


def reference_forward_bf16(x, params):
    """Reference with the same bf16-input / f32-accumulate dots as the kernel."""
    w1, b1, w2, b2, w3, b3 = params
    bf = jnp.bfloat16
    h = x.reshape(x.shape[0], -1)
    h = jnp.maximum(jnp.dot(h.astype(bf), w1.astype(bf),
                            preferred_element_type=jnp.float32) + b1, 0.0)
    h = jnp.maximum(jnp.dot(h.astype(bf), w2.astype(bf),
                            preferred_element_type=jnp.float32) + b2, 0.0)
    logits = jnp.dot(h.astype(bf), w3.astype(bf),
                     preferred_element_type=jnp.float32) + b3
    return jax.nn.log_softmax(logits, axis=1)


if __name__ == "__main__":
    key = jax.random.PRNGKey(0)
    k_params, k_x = jax.random.split(key)

    params = init_params(k_params)
    prepped = prepare_params(params)

    # Small MNIST-shaped batch (single-tile path, batch padded to 128 rows).
    B = 8
    x = jax.random.normal(k_x, (B, 1, 28, 28), jnp.float32)  # NCHW
    out = jax.block_until_ready(neural_network_forward(x, prepped))
    assert out.shape == (B, OUT_DIM)
    assert jnp.all(jnp.isfinite(out))
    assert jnp.allclose(out, reference_forward_bf16(x, params),
                        atol=1e-3, rtol=1e-3), "mismatch vs bf16 reference"
    assert jnp.allclose(out, reference_forward_f32(x, params),
                        atol=1e-1, rtol=1e-1), "mismatch vs f32 reference"

    # Non-tile-multiple batch exercising batch padding + multi-tile grid
    # (eff_tile=256, B_pad=512, grid=(2,) -> even split across v7x cores).
    B2 = 300
    x2 = jax.random.normal(jax.random.PRNGKey(1), (B2, 1, 28, 28), jnp.float32)
    out2 = jax.block_until_ready(neural_network_forward(x2, prepped, tile_b=512))
    assert out2.shape == (B2, OUT_DIM)
    assert jnp.allclose(out2, reference_forward_bf16(x2, params),
                        atol=1e-3, rtol=1e-3), "mismatch vs bf16 reference (B=300)"

    print("KERNEL_OK")
</pallas_src>

<mosaic_0001>
module attributes {stable_mosaic.version = 11 : i64} {
  func.func @mlp_kernel(%arg0: i32, %arg1: memref<128x784xf32, #tpu.memory_space<vmem>>, %arg2: memref<784x512xbf16, #tpu.memory_space<vmem>>, %arg3: memref<1x512xf32, #tpu.memory_space<vmem>>, %arg4: memref<512x512xbf16, #tpu.memory_space<vmem>>, %arg5: memref<1x512xf32, #tpu.memory_space<vmem>>, %arg6: memref<512x128xbf16, #tpu.memory_space<vmem>>, %arg7: memref<1x128xf32, #tpu.memory_space<vmem>>, %arg8: memref<128x128xf32, #tpu.memory_space<vmem>>) attributes {dimension_semantics = [#tpu.dimension_semantics<parallel>], iteration_bounds = array<i64: 1>, scalar_prefetch = 0 : i64, scratch_operands = 0 : i64, tpu.core_type = #tpu.core_type<tc>, window_params = [{transform_indices = @transform_0, window_bounds = array<i64: 128, 784>}, {pipeline_mode = #tpu.pipeline_mode<synchronous>, transform_indices = @transform_1, window_bounds = array<i64: 784, 512>}, {pipeline_mode = #tpu.pipeline_mode<synchronous>, transform_indices = @transform_2, window_bounds = array<i64: 1, 512>}, {pipeline_mode = #tpu.pipeline_mode<synchronous>, transform_indices = @transform_3, window_bounds = array<i64: 512, 512>}, {pipeline_mode = #tpu.pipeline_mode<synchronous>, transform_indices = @transform_4, window_bounds = array<i64: 1, 512>}, {pipeline_mode = #tpu.pipeline_mode<synchronous>, transform_indices = @transform_5, window_bounds = array<i64: 512, 128>}, {pipeline_mode = #tpu.pipeline_mode<synchronous>, transform_indices = @transform_6, window_bounds = array<i64: 1, 128>}, {transform_indices = @transform_7, window_bounds = array<i64: 128, 128>}]} {
    %c0 = arith.constant 0 : index
    %c0_0 = arith.constant 0 : index
    %0 = vector.load %arg1[%c0, %c0_0] : memref<128x784xf32, #tpu.memory_space<vmem>>, vector<128x784xf32>
    %1 = arith.truncf %0 : vector<128x784xf32> to vector<128x784xbf16>
    %c0_1 = arith.constant 0 : index
    %c0_2 = arith.constant 0 : index
    %2 = vector.load %arg2[%c0_1, %c0_2] : memref<784x512xbf16, #tpu.memory_space<vmem>>, vector<784x512xbf16>
    %cst = arith.constant dense<0.000000e+00> : vector<128x512xf32>
    %3 = tpu.matmul %1, %2, %cst {dimension_numbers = #tpu.dot_dimension_numbers<[1], [0], [0], [1], [0, 0, 1, 1], [], []>} : vector<128x784xbf16>, vector<784x512xbf16>, vector<128x512xf32> -> vector<128x512xf32>
    %c0_3 = arith.constant 0 : index
    %c0_4 = arith.constant 0 : index
    %4 = vector.load %arg3[%c0_3, %c0_4] : memref<1x512xf32, #tpu.memory_space<vmem>>, vector<1x512xf32>
    %5 = vector.broadcast %4 : vector<1x512xf32> to vector<128x512xf32>
    %6 = arith.addf %3, %5 : vector<128x512xf32>
    %cst_5 = arith.constant 0.000000e+00 : f32
    %7 = vector.broadcast %cst_5 : f32 to vector<128x512xf32>
    %8 = arith.maximumf %6, %7 : vector<128x512xf32>
    %9 = arith.truncf %8 : vector<128x512xf32> to vector<128x512xbf16>
    %c0_6 = arith.constant 0 : index
    %c0_7 = arith.constant 0 : index
    %10 = vector.load %arg4[%c0_6, %c0_7] : memref<512x512xbf16, #tpu.memory_space<vmem>>, vector<512x512xbf16>
    %cst_8 = arith.constant dense<0.000000e+00> : vector<128x512xf32>
    %11 = tpu.matmul %9, %10, %cst_8 {dimension_numbers = #tpu.dot_dimension_numbers<[1], [0], [0], [1], [0, 0, 1, 1], [], []>} : vector<128x512xbf16>, vector<512x512xbf16>, vector<128x512xf32> -> vector<128x512xf32>
    %c0_9 = arith.constant 0 : index
    %c0_10 = arith.constant 0 : index
    %12 = vector.load %arg5[%c0_9, %c0_10] : memref<1x512xf32, #tpu.memory_space<vmem>>, vector<1x512xf32>
    %13 = vector.broadcast %12 : vector<1x512xf32> to vector<128x512xf32>
    %14 = arith.addf %11, %13 : vector<128x512xf32>
    %cst_11 = arith.constant 0.000000e+00 : f32
    %15 = vector.broadcast %cst_11 : f32 to vector<128x512xf32>
    %16 = arith.maximumf %14, %15 : vector<128x512xf32>
    %17 = arith.truncf %16 : vector<128x512xf32> to vector<128x512xbf16>
    %c0_12 = arith.constant 0 : index
    %c0_13 = arith.constant 0 : index
    %18 = vector.load %arg6[%c0_12, %c0_13] : memref<512x128xbf16, #tpu.memory_space<vmem>>, vector<512x128xbf16>
    %cst_14 = arith.constant dense<0.000000e+00> : vector<128x128xf32>
    %19 = tpu.matmul %17, %18, %cst_14 {dimension_numbers = #tpu.dot_dimension_numbers<[1], [0], [0], [1], [0, 0, 1, 1], [], []>} : vector<128x512xbf16>, vector<512x128xbf16>, vector<128x128xf32> -> vector<128x128xf32>
    %c0_15 = arith.constant 0 : index
    %c0_16 = arith.constant 0 : index
    %20 = vector.load %arg7[%c0_15, %c0_16] : memref<1x128xf32, #tpu.memory_space<vmem>>, vector<1x128xf32>
    %21 = vector.broadcast %20 : vector<1x128xf32> to vector<128x128xf32>
    %22 = arith.addf %19, %21 : vector<128x128xf32>
    %cst_17 = arith.constant dense<0xFF800000> : vector<128xf32>
    %23 = vector.multi_reduction <maximumf>, %22, %cst_17 [1] : vector<128x128xf32> to vector<128xf32>
    %24 = vector.shape_cast %23 : vector<128xf32> to vector<128x1xf32>
    %25 = vector.broadcast %24 : vector<128x1xf32> to vector<128x128xf32>
    %26 = arith.subf %22, %25 : vector<128x128xf32>
    %27 = math.exp %26 : vector<128x128xf32>
    %cst_18 = arith.constant dense<0.000000e+00> : vector<128xf32>
    %28 = vector.multi_reduction <add>, %27, %cst_18 [1] : vector<128x128xf32> to vector<128xf32>
    %29 = vector.shape_cast %28 : vector<128xf32> to vector<128x1xf32>
    %30 = math.log %29 : vector<128x1xf32>
    %31 = vector.broadcast %30 : vector<128x1xf32> to vector<128x128xf32>
    %32 = arith.subf %26, %31 : vector<128x128xf32>
    %c0_19 = arith.constant 0 : index
    %c0_20 = arith.constant 0 : index
    %33 = vector.load %arg8[%c0_19, %c0_20] : memref<128x128xf32, #tpu.memory_space<vmem>>, vector<128x128xf32>
    tpu.vector_store %arg8[%c0_19, %c0_20], %32 {strides = array<i32>} : memref<128x128xf32, #tpu.memory_space<vmem>>, vector<128x128xf32>,
    return
  }
  func.func @transform_0(%arg0: i32) -> (i32, i32) {
    %c0_i32 = arith.constant 0 : i32
    %c0_i32_0 = arith.constant 0 : i32
    return %arg0, %c0_i32 : i32, i32
  }
  func.func @transform_1(%arg0: i32) -> (i32, i32) {
    %c0_i32 = arith.constant 0 : i32
    %c0_i32_0 = arith.constant 0 : i32
    %c0_i32_1 = arith.constant 0 : i32
    return %c0_i32, %c0_i32_0 : i32, i32
  }
  func.func @transform_2(%arg0: i32) -> (i32, i32) {
    %c0_i32 = arith.constant 0 : i32
    %c0_i32_0 = arith.constant 0 : i32
    %c0_i32_1 = arith.constant 0 : i32
    return %c0_i32, %c0_i32_0 : i32, i32
  }
  func.func @transform_3(%arg0: i32) -> (i32, i32) {
    %c0_i32 = arith.constant 0 : i32
    %c0_i32_0 = arith.constant 0 : i32
    %c0_i32_1 = arith.constant 0 : i32
    return %c0_i32, %c0_i32_0 : i32, i32
  }
  func.func @transform_4(%arg0: i32) -> (i32, i32) {
    %c0_i32 = arith.constant 0 : i32
    %c0_i32_0 = arith.constant 0 : i32
    %c0_i32_1 = arith.constant 0 : i32
    return %c0_i32, %c0_i32_0 : i32, i32
  }
  func.func @transform_5(%arg0: i32) -> (i32, i32) {
    %c0_i32 = arith.constant 0 : i32
    %c0_i32_0 = arith.constant 0 : i32
    %c0_i32_1 = arith.constant 0 : i32
    return %c0_i32, %c0_i32_0 : i32, i32
  }
  func.func @transform_6(%arg0: i32) -> (i32, i32) {
    %c0_i32 = arith.constant 0 : i32
    %c0_i32_0 = arith.constant 0 : i32
    %c0_i32_1 = arith.constant 0 : i32
    return %c0_i32, %c0_i32_0 : i32, i32
  }
  func.func @transform_7(%arg0: i32) -> (i32, i32) {
    %c0_i32 = arith.constant 0 : i32
    %c0_i32_0 = arith.constant 0 : i32
    return %arg0, %c0_i32 : i32, i32
  }
}

</mosaic_0001>

<bundles_post_ra>
// kernel: neural_network_forward.1
= control target key start
LH: loop header
LB: loop body
LE: loop exit
PB: predicated region body
PF: predicated region fallthrough
CT: control target
= control target key end

     0   :  { %12 = vsyncpa [#allocation3], 0  ;;  %s7405_s0 = inlined_call_operand.vmem [shape: f32[128,784], index: 0, kind: input, shape index: {}]   ;;  %s7406_s1 = inlined_call_operand.vmem [shape: bf16[784,512], index: 1, kind: input, shape index: {}]   ;;  %s7407_s2 = inlined_call_operand.vmem [shape: f32[1,512], index: 2, kind: input, shape index: {}]   ;;  %s7408_s3 = inlined_call_operand.hbm [shape: bf16[512,512], index: 3, kind: input, shape index: {}]   ;;  %s7409_s4 = inlined_call_operand.vmem [shape: f32[1,512], index: 4, kind: input, shape index: {}]   ;;  %s7410_s5 = inlined_call_operand.hbm [shape: bf16[512,128], index: 5, kind: input, shape index: {}]   ;;  %s7411_s6 = inlined_call_operand.vmem [shape: f32[1,128], index: 6, kind: input, shape index: {}]   ;;  %s7412_s7 = inlined_call_operand.vmem [shape: f32[128,128], index: 7, kind: output, shape index: {}]  }
   0x1   :  { %13 = vsyncpa [#allocation5], 0  ;;  %s5945_s24 = smov [#allocation2]   ;;  %s5897_s28 = scalar_lea.hbm %s7408_s3, 16384 }
   0x2   :  { %s25_s25 = sshll.u32 %s5945_s24, 4  ;;  %p5898_p0 = scmp.ne.s32.totalorder %s7408_s3, %s5897_s28  ;;  %s26_s25 = int_to_ptr.vmem [resolvable:$true] %s25_s25 }
   0x3   :  { %p5901_p1 = scmp.lt.u32.totalorder %s5897_s28, %s7408_s3 }
   0x5   :  { %p5903_p2 = pnand %p5901_p1, %p5898_p0 }
   0x7   :  { %5906 = shalt.err (!%p5903_p2)
}
   0x8   :  { %s5907_s10 = scalar_lea.vmem %s26_s25, 16384  ;;  %p5912_p4 = scmp.lt.s32.totalorder %s26_s25, %s26_s25 }
   0x9   :  { %p5908_p3 = scmp.ne.s32.totalorder %s26_s25, %s5907_s10  ;;  %p5913_p5 = scmp.lt.s32.totalorder %s5907_s10, %s5907_s10 }
   0xb   :  { %p5914_p6 = por %p5913_p5, %p5912_p4 }
   0xd   :  { %p5915_p7 = pnand %p5914_p6, %p5908_p3 }
   0xf   :  { %5918 = shalt.err (!%p5915_p7)
}
  0x10   :  { %s5946_s11 = smov 256   ;;  %s5947_s12 = smov 16  }
  0x11   :  { %31 = dma.hbm_to_vmem [thread:$0]  %s7408_s3, 16384, %s26_s25, [#allocation3], %s5946_s11, %s5946_s11, %s5947_s12  }
  0x12   :  { %s5948_s15 = smov [#allocation4]   ;;  %s5919_s19 = scalar_lea.hbm %s7410_s5, 4096 }
  0x13   :  { %s39_s16 = sshll.u32 %s5948_s15, 4  ;;  %p5920_p8 = scmp.ne.s32.totalorder %s7410_s5, %s5919_s19  ;;  %s40_s16 = int_to_ptr.vmem [resolvable:$true] %s39_s16 }
  0x14   :  { %p5923_p9 = scmp.lt.u32.totalorder %s5919_s19, %s7410_s5 }
  0x16   :  { %p5925_p10 = pnand %p5923_p9, %p5920_p8 }
  0x18   :  { %5928 = shalt.err (!%p5925_p10)
}
  0x19   :  { %s5929_s24 = scalar_lea.vmem %s40_s16, 4096  ;;  %p5934_p12 = scmp.lt.s32.totalorder %s40_s16, %s40_s16 }
  0x1a   :  { %p5930_p11 = scmp.ne.s32.totalorder %s40_s16, %s5929_s24  ;;  %p5935_p13 = scmp.lt.s32.totalorder %s5929_s24, %s5929_s24 }
  0x1c   :  { %p5936_p0 = por %p5935_p13, %p5934_p12 }
  0x1e   :  { %p5937_p1 = pnand %p5936_p0, %p5930_p11 }
  0x20   :  { %5940 = shalt.err (!%p5937_p1)
}
  0x21   :  { %s5949_s3 = smov 64   ;;  %s5950_s25 = smov 4  }
  0x22   :  { %45 = dma.hbm_to_vmem [thread:$0]  %s7410_s5, 4096, %s40_s16, [#allocation5], %s5949_s3, %s5949_s3, %s5950_s25  }
  0x23   :  { %5941 = dma.done.wait [#allocation3], 16384  }
  0x24   :  { %5942 = vsyncadd [#allocation3], 4294950912 }
  0x25   :  { %5943 = dma.done.wait [#allocation5], 4096  }
  0x26   :  { %5944 = vsyncadd [#allocation5], 4294963200  ;;  %v5315_v0 = vld [vmem:[%s7406_s1 + $0x4] ss:$16 sps:$4 sm:$0xff]   ;;  %v5317_v1 = vld [vmem:[%s7406_s1 + $0xc] ss:$16 sps:$4 sm:$0xff]  }
  0x27   :  { %1446 = vmatprep.subr.bf16.mxu0 %v5315_v0  ;;  %v5319_v2 = vld [vmem:[%s7406_s1] ss:$16 sps:$4 sm:$0xff]   ;;  %v5320_v3 = vld [vmem:[%s7406_s1 + $0x8] ss:$16 sps:$4 sm:$0xff]   ;;  %1898 = vmatprep.subr.bf16.mxu1 %v5317_v1  ;;  %v5321_v4 = vld [vmem:[%s7406_s1 + $0x24] ss:$16 sps:$4 sm:$0xff]  }
  0x28   :  { %1447 = vmatpush1.bf16.msra.mxu0 %v5319_v2  ;;  %1899 = vmatpush1.bf16.msra.mxu1 %v5320_v3  ;;  %v5323_v5 = vld [vmem:[%s7406_s1 + $0x2c] ss:$16 sps:$4 sm:$0xff]   ;;  %v5325_v6 = vld [vmem:[%s7406_s1 + $0x20] ss:$16 sps:$4 sm:$0xff]   ;;  %v5326_v7 = vld [vmem:[%s7406_s1 + $0x28] ss:$16 sps:$4 sm:$0xff]  }
  0x29   :  { %1448 = vmatprep.subr.bf16.mxu0 %v5321_v4  ;;  %1900 = vmatprep.subr.bf16.mxu1 %v5323_v5  ;;  %v5327_v8 = vld [vmem:[%s7406_s1 + $0x44] ss:$16 sps:$4 sm:$0xff]   ;;  %v5329_v9 = vld [vmem:[%s7406_s1 + $0x4c] ss:$16 sps:$4 sm:$0xff]   ;;  %v5331_v10 = vld [vmem:[%s7406_s1 + $0x40] ss:$16 sps:$4 sm:$0xff]  }
  0x2a   :  { %v5332_v11 = vld [vmem:[%s7406_s1 + $0x48] ss:$16 sps:$4 sm:$0xff]   ;;  %v5333_v12 = vld [vmem:[%s7406_s1 + $0x64] ss:$16 sps:$4 sm:$0xff]   ;;  %v5335_v13 = vld [vmem:[%s7406_s1 + $0x6c] ss:$16 sps:$4 sm:$0xff]  }
  0x2b   :  { %v5337_v14 = vld [vmem:[%s7406_s1 + $0x60] ss:$16 sps:$4 sm:$0xff]   ;;  %v5338_v15 = vld [vmem:[%s7406_s1 + $0x68] ss:$16 sps:$4 sm:$0xff]   ;;  %v5339_v16 = vld [vmem:[%s7406_s1 + $0x84] ss:$16 sps:$4 sm:$0xff]  }
  0x2c   :  { %1449 = vmatpush1.bf16.msra.mxu0 %v5325_v6  ;;  %1901 = vmatpush1.bf16.msra.mxu1 %v5326_v7  ;;  %v5341_v17 = vld [vmem:[%s7406_s1 + $0x8c] ss:$16 sps:$4 sm:$0xff]   ;;  %v5343_v18 = vld [vmem:[%s7406_s1 + $0x80] ss:$16 sps:$4 sm:$0xff]   ;;  %v5344_v19 = vld [vmem:[%s7406_s1 + $0x88] ss:$16 sps:$4 sm:$0xff]  }
  0x2d   :  { %1450 = vmatprep.subr.bf16.mxu0 %v5327_v8  ;;  %1902 = vmatprep.subr.bf16.mxu1 %v5329_v9  ;;  %v5345_v20 = vld [vmem:[%s7406_s1 + $0xa4] ss:$16 sps:$4 sm:$0xff]   ;;  %v5347_v21 = vld [vmem:[%s7406_s1 + $0xac] ss:$16 sps:$4 sm:$0xff]   ;;  %v5349_v22 = vld [vmem:[%s7406_s1 + $0xa0] ss:$16 sps:$4 sm:$0xff]  }
  0x2e   :  { %v5350_v23 = vld [vmem:[%s7406_s1 + $0xa8] ss:$16 sps:$4 sm:$0xff]   ;;  %v5351_v24 = vld [vmem:[%s7406_s1 + $0xc4] ss:$16 sps:$4 sm:$0xff]   ;;  %v5353_v25 = vld [vmem:[%s7406_s1 + $0xcc] ss:$16 sps:$4 sm:$0xff]  }
  0x2f   :  { %v5355_v26 = vld [vmem:[%s7406_s1 + $0xc0] ss:$16 sps:$4 sm:$0xff]   ;;  %v5356_v27 = vld [vmem:[%s7406_s1 + $0xc8] ss:$16 sps:$4 sm:$0xff]   ;;  %v5357_v28 = vld [vmem:[%s7406_s1 + $0xe4] ss:$16 sps:$4 sm:$0xff]  }
  0x30   :  { %1451 = vmatpush1.bf16.msra.mxu0 %v5331_v10  ;;  %1903 = vmatpush1.bf16.msra.mxu1 %v5332_v11  ;;  %v5359_v29 = vld [vmem:[%s7406_s1 + $0xec] ss:$16 sps:$4 sm:$0xff]   ;;  %v5361_v30 = vld [vmem:[%s7406_s1 + $0xe0] ss:$16 sps:$4 sm:$0xff]   ;;  %v5362_v31 = vld [vmem:[%s7406_s1 + $0xe8] ss:$16 sps:$4 sm:$0xff]  }
  0x31   :  { %1452 = vmatprep.subr.bf16.mxu0 %v5333_v12  ;;  %1904 = vmatprep.subr.bf16.mxu1 %v5335_v13  ;;  %v5363_v32 = vld [vmem:[%s7406_s1 + $0x104] ss:$16 sps:$4 sm:$0xff]   ;;  %v5365_v33 = vld [vmem:[%s7406_s1 + $0x10c] ss:$16 sps:$4 sm:$0xff]   ;;  %v5367_v34 = vld [vmem:[%s7406_s1 + $0x100] ss:$16 sps:$4 sm:$0xff]  }
  0x32   :  { %v5368_v35 = vld [vmem:[%s7406_s1 + $0x108] ss:$16 sps:$4 sm:$0xff]   ;;  %v5369_v36 = vld [vmem:[%s7406_s1 + $0x124] ss:$16 sps:$4 sm:$0xff]   ;;  %v5371_v37 = vld [vmem:[%s7406_s1 + $0x12c] ss:$16 sps:$4 sm:$0xff]  }
  0x33   :  { %v5373_v38 = vld [vmem:[%s7406_s1 + $0x120] ss:$16 sps:$4 sm:$0xff]   ;;  %v5374_v39 = vld [vmem:[%s7406_s1 + $0x128] ss:$16 sps:$4 sm:$0xff]   ;;  %v5375_v40 = vld [vmem:[%s7406_s1 + $0x144] ss:$16 sps:$4 sm:$0xff]  }
  0x34   :  { %1453 = vmatpush1.bf16.msra.mxu0 %v5337_v14  ;;  %1905 = vmatpush1.bf16.msra.mxu1 %v5338_v15  ;;  %v5377_v41 = vld [vmem:[%s7406_s1 + $0x14c] ss:$16 sps:$4 sm:$0xff]   ;;  %v5379_v42 = vld [vmem:[%s7406_s1 + $0x140] ss:$16 sps:$4 sm:$0xff]   ;;  %v5380_v43 = vld [vmem:[%s7406_s1 + $0x148] ss:$16 sps:$4 sm:$0xff]  }
  0x35   :  { %1454 = vmatprep.subr.bf16.mxu0 %v5339_v16  ;;  %1906 = vmatprep.subr.bf16.mxu1 %v5341_v17  ;;  %v5381_v44 = vld [vmem:[%s7406_s1 + $0x164] ss:$16 sps:$4 sm:$0xff]   ;;  %v5383_v45 = vld [vmem:[%s7406_s1 + $0x16c] ss:$16 sps:$4 sm:$0xff]   ;;  %v5385_v47 = vld [vmem:[%s7406_s1 + $0x160] ss:$16 sps:$4 sm:$0xff]  }
  0x36   :  { %v56_v46 = vld [vmem:[%s7405_s0 + $0x8] sm:$0xff]  ;;  %v63_v49 = vld [vmem:[%s7405_s0 + $0x40] sm:$0xff]  ;;  %v62_v4 = vld [vmem:[%s7405_s0 + $0x38] sm:$0xff]  ;;  %vm1421_vm0 = vcmask 130048  }
  0x37   :  { %v5386_v48 = vld [vmem:[%s7406_s1 + $0x168] ss:$16 sps:$4 sm:$0xff]   ;;  %v5387_v50 = vld [vmem:[%s7406_s1 + $0x184] ss:$16 sps:$4 sm:$0xff]   ;;  %v168_v51 = vpack.c.bf16 %v63_v49, %v56_v46  ;;  %v5389_v52 = vld [vmem:[%s7406_s1 + $0x18c] ss:$16 sps:$4 sm:$0xff]  }
  0x38   :  { %1455 = vmatpush1.bf16.msra.mxu0 %v5343_v18  ;;  %1907 = vmatpush1.bf16.msra.mxu1 %v5344_v19  ;;  %v5391_v53 = vld [vmem:[%s7406_s1 + $0x180] ss:$16 sps:$4 sm:$0xff]   ;;  %v5392_v54 = vld [vmem:[%s7406_s1 + $0x188] ss:$16 sps:$4 sm:$0xff]   ;;  %v5393_v55 = vld [vmem:[%s7406_s1 + $0x1a4] ss:$16 sps:$4 sm:$0xff]  }
  0x39   :  { %1456 = vmatprep.subr.bf16.mxu0 %v5345_v20  ;;  %1908 = vmatprep.subr.bf16.mxu1 %v5347_v21  ;;  %v5395_v56 = vld [vmem:[%s7406_s1 + $0x1ac] ss:$16 sps:$4 sm:$0xff]   ;;  %v5397_v57 = vld [vmem:[%s7406_s1 + $0x1a0] ss:$16 sps:$4 sm:$0xff]   ;;  %v5398_v58 = vld [vmem:[%s7406_s1 + $0x1a8] ss:$16 sps:$4 sm:$0xff]  }
  0x3a   :  { %1478 = vmatprep.mubr.bf16.mxu0 %v168_v51  ;;  %1930 = vmatprep.mubr.bf16.mxu1 %v168_v51  ;;  %v5399_v59 = vld [vmem:[%s7406_s1 + $0x1c4] ss:$16 sps:$4 sm:$0xff]   ;;  %v5401_v60 = vld [vmem:[%s7406_s1 + $0x1cc] ss:$16 sps:$4 sm:$0xff]   ;;  %v5403_v61 = vld [vmem:[%s7406_s1 + $0x1c0] ss:$16 sps:$4 sm:$0xff]  }
  0x3b   :  { %v5404_v62 = vld [vmem:[%s7406_s1 + $0x1c8] ss:$16 sps:$4 sm:$0xff]   ;;  %v5405_v63 = vld [vmem:[%s7406_s1 + $0x1e4] ss:$16 sps:$4 sm:$0xff]   ;;  %v5407_v0 = vld [vmem:[%s7406_s1 + $0x1ec] ss:$16 sps:$4 sm:$0xff]  }
  0x3c   :  { %1457 = vmatpush1.bf16.msra.mxu0 %v5349_v22  ;;  %1909 = vmatpush1.bf16.msra.mxu1 %v5350_v23  ;;  %v5409_v1 = vld [vmem:[%s7406_s1 + $0x1e0] ss:$16 sps:$4 sm:$0xff]   ;;  %v5410_v2 = vld [vmem:[%s7406_s1 + $0x1e8] ss:$16 sps:$4 sm:$0xff]   ;;  %v5413_v5 = vld [vmem:[%s7406_s1 + $0x204] ss:$16 sps:$4 sm:$0xff]  }
  0x3d   :  { %1458 = vmatprep.subr.bf16.mxu0 %v5351_v24  ;;  %1910 = vmatprep.subr.bf16.mxu1 %v5353_v25  ;;  %v55_v3 = vld [vmem:[%s7405_s0] sm:$0xff]  ;;  %v5416_v6 = vld [vmem:[%s7406_s1 + $0x20c] ss:$16 sps:$4 sm:$0xff]   ;;  %v5414_v9 = vld [vmem:[%s7406_s1 + $0x208] ss:$16 sps:$4 sm:$0xff]  }
  0x3e   :  { %v5411_v7 = vld [vmem:[%s7406_s1 + $0x200] ss:$16 sps:$4 sm:$0xff]   ;;  %v167_v8 = vpack.c.bf16 %v62_v4, %v55_v3  ;;  %v70_v10 = vld [vmem:[%s7405_s0 + $0x78] sm:$0xff]  ;;  %v5419_v12 = vld [vmem:[%s7406_s1 + $0x224] ss:$16 sps:$4 sm:$0xff]  }
  0x3f   :  { %v77_v11 = vld [vmem:[%s7405_s0 + $0xb0] sm:$0xff]  ;;  %v5422_v13 = vld [vmem:[%s7406_s1 + $0x22c] ss:$16 sps:$4 sm:$0xff]   ;;  %v5420_v16 = vld [vmem:[%s7406_s1 + $0x228] ss:$16 sps:$4 sm:$0xff]  }
  0x40   :  { %1459 = vmatpush1.bf16.msra.mxu0 %v5355_v26  ;;  %1911 = vmatpush1.bf16.msra.mxu1 %v5356_v27  ;;  %v5417_v14 = vld [vmem:[%s7406_s1 + $0x220] ss:$16 sps:$4 sm:$0xff]   ;;  %v175_v15 = vpack.c.bf16 %v77_v11, %v70_v10  ;;  %v76_v18 = vld [vmem:[%s7405_s0 + $0xa8] sm:$0xff]  ;;  %v5425_v19 = vld [vmem:[%s7406_s1 + $0x244] ss:$16 sps:$4 sm:$0xff]  }
  0x41   :  { %1460 = vmatprep.subr.bf16.mxu0 %v5357_v28  ;;  %1912 = vmatprep.subr.bf16.mxu1 %v5359_v29  ;;  %v69_v17 = vld [vmem:[%s7405_s0 + $0x70] sm:$0xff]  ;;  %v5428_v20 = vld [vmem:[%s7406_s1 + $0x24c] ss:$16 sps:$4 sm:$0xff]   ;;  %v5426_v22 = vld [vmem:[%s7406_s1 + $0x248] ss:$16 sps:$4 sm:$0xff]  }
  0x42   :  { %v5423_v21 = vld [vmem:[%s7406_s1 + $0x240] ss:$16 sps:$4 sm:$0xff]   ;;  %v174_v23 = vpack.c.bf16 %v76_v18, %v69_v17  ;;  %v84_v24 = vld [vmem:[%s7405_s0 + $0xe8] sm:$0xff]  ;;  %v5431_v26 = vld [vmem:[%s7406_s1 + $0x264] ss:$16 sps:$4 sm:$0xff]  }
  0x43   :  { %v91_v25 = vld [vmem:[%s7405_s0 + $0x120] sm:$0xff]  ;;  %v5434_v27 = vld [vmem:[%s7406_s1 + $0x26c] ss:$16 sps:$4 sm:$0xff]   ;;  %v5462_v3 = vld [vmem:[%s7406_s1 + $0x308] ss:$16 sps:$4 sm:$0xff]  }
  0x44   :  { %1461 = vmatpush1.bf16.msra.mxu0 %v5361_v30  ;;  %1913 = vmatpush1.bf16.msra.mxu1 %v5362_v31  ;;  %v182_v28 = vpack.c.bf16 %v91_v25, %v84_v24  ;;  %v5429_v29 = vld [vmem:[%s7406_s1 + $0x260] ss:$16 sps:$4 sm:$0xff]   ;;  %v5432_v30 = vld [vmem:[%s7406_s1 + $0x268] ss:$16 sps:$4 sm:$0xff]   ;;  %v5467_v4 = vld [vmem:[%s7406_s1 + $0x324] ss:$16 sps:$4 sm:$0xff]  }
  0x45   :  { %1462 = vmatprep.subr.bf16.mxu0 %v5363_v32  ;;  %1914 = vmatprep.subr.bf16.mxu1 %v5365_v33  ;;  %v83_v31 = vld [vmem:[%s7405_s0 + $0xe0] sm:$0xff]  ;;  %v90_v32 = vld [vmem:[%s7405_s0 + $0x118] sm:$0xff]  ;;  %v104_v46 = vld [vmem:[%s7405_s0 + $0x188] sm:$0xff] }
  0x46   :  { %v5437_v33 = vld [vmem:[%s7406_s1 + $0x284] ss:$16 sps:$4 sm:$0xff]   ;;  %v5447_v49 = vld [vmem:[%s7406_s1 + $0x2c0] ss:$16 sps:$4 sm:$0xff]   ;;  %v112_v51 = vld [vmem:[%s7405_s0 + $0x1c8] sm:$0xff] }
  0x47   :  { %v132_v10 = vld [vmem:[%s7405_s0 + $0x268] sm:$0xff]  ;;  %v5473_v11 = vld [vmem:[%s7406_s1 + $0x344] ss:$16 sps:$4 sm:$0xff]   ;;  %v146_v24 = vld [vmem:[%s7405_s0 + $0x2d8] sm:$0xff] }
  0x48   :  { %1463 = vmatpush1.bf16.msra.mxu0 %v5367_v34  ;;  %1915 = vmatpush1.bf16.msra.mxu1 %v5368_v35  ;;  %v5440_v34 = vld [vmem:[%s7406_s1 + $0x28c] ss:$16 sps:$4 sm:$0xff]   ;;  %v5435_v35 = vld [vmem:[%s7406_s1 + $0x280] ss:$16 sps:$4 sm:$0xff]   ;;  %v5479_v18 = vld [vmem:[%s7406_s1 + $0x364] ss:$16 sps:$4 sm:$0xff]  }
  0x49   :  { %1464 = vmatprep.subr.bf16.mxu0 %v5369_v36  ;;  %1916 = vmatprep.subr.bf16.mxu1 %v5371_v37  ;;  %v5438_v36 = vld [vmem:[%s7406_s1 + $0x288] ss:$16 sps:$4 sm:$0xff]   ;;  %v181_v37 = vpack.c.bf16 %v90_v32, %v83_v31  ;;  %v147_v17 = vld [vmem:[%s7405_s0 + $0x2e0] sm:$0xff]  ;;  %v161_v31 = vld [vmem:[%s7405_s0 + $0x350] sm:$0xff] }
  0x4a   :  { %v5485_v25 = vld [vmem:[%s7406_s1 + $0x384] ss:$16 sps:$4 sm:$0xff]  }
  0x4b   :  { %v5491_v32 = vld [vmem:[%s7406_s1 + $0x3a4] ss:$16 sps:$4 sm:$0xff]  }
  0x4c   :  { %1465 = vmatpush1.bf16.msra.mxu0 %v5373_v38  ;;  %1917 = vmatpush1.bf16.msra.mxu1 %v5374_v39  ;;  %v98_v38 = vld [vmem:[%s7405_s0 + $0x158] sm:$0xff]  ;;  %v105_v39 = vld [vmem:[%s7405_s0 + $0x190] sm:$0xff] }
  0x4d   :  { %1466 = vmatprep.subr.bf16.mxu0 %v5375_v40  ;;  %1918 = vmatprep.subr.bf16.mxu1 %v5377_v41  ;;  %v5443_v40 = vld [vmem:[%s7406_s1 + $0x2a4] ss:$16 sps:$4 sm:$0xff]   ;;  %v5446_v41 = vld [vmem:[%s7406_s1 + $0x2ac] ss:$16 sps:$4 sm:$0xff]  }
  0x50   :  { %1467 = vmatpush1.bf16.msra.mxu0 %v5379_v42  ;;  %1919 = vmatpush1.bf16.msra.mxu1 %v5380_v43  ;;  %v5441_v42 = vld [vmem:[%s7406_s1 + $0x2a0] ss:$16 sps:$4 sm:$0xff]   ;;  %v189_v43 = vpack.c.bf16 %v105_v39, %v98_v38  ;;  %v160_v38 = vld [vmem:[%s7405_s0 + $0x348] sm:$0xff]  ;;  %v5497_v39 = vld [vmem:[%s7406_s1 + $0x3c4] ss:$16 sps:$4 sm:$0xff]  }
  0x51   :  { %1468 = vmatprep.subr.bf16.mxu0 %v5381_v44  ;;  %1920 = vmatprep.subr.bf16.mxu1 %v5383_v45  ;;  %v5444_v44 = vld [vmem:[%s7406_s1 + $0x2a8] ss:$16 sps:$4 sm:$0xff]   ;;  %v97_v45 = vld [vmem:[%s7405_s0 + $0x150] sm:$0xff] }
  0x54   :  { %1469 = vmatpush1.bf16.msra.mxu0 %v5385_v47  ;;  %1921 = vmatpush1.bf16.msra.mxu1 %v5386_v48  ;;  %v5449_v47 = vld [vmem:[%s7406_s1 + $0x2c4] ss:$16 sps:$4 sm:$0xff]   ;;  %v5452_v48 = vld [vmem:[%s7406_s1 + $0x2cc] ss:$16 sps:$4 sm:$0xff]  }
  0x55   :  { %1470 = vmatprep.subr.bf16.mxu0 %v5387_v50  ;;  %1922 = vmatprep.subr.bf16.mxu1 %v5389_v52  ;;  %v188_v50 = vpack.c.bf16 %v104_v46, %v97_v45  ;;  %v119_v52 = vld [vmem:[%s7405_s0 + $0x200] sm:$0xff]  ;;  %v65_v45 = vld [vmem:[%s7405_s0 + $0x50] sm:$0xff] }
  0x56   :  { %v5503_v46 = vld [vmem:[%s7406_s1 + $0x3e4] ss:$16 sps:$4 sm:$0xff]  }
  0x58   :  { %1471 = vmatpush1.bf16.msra.mxu0 %v5391_v53  ;;  %1923 = vmatpush1.bf16.msra.mxu1 %v5392_v54  ;;  %v5450_v53 = vld [vmem:[%s7406_s1 + $0x2c8] ss:$16 sps:$4 sm:$0xff]   ;;  %v5455_v54 = vld [vmem:[%s7406_s1 + $0x2e4] ss:$16 sps:$4 sm:$0xff]  }
  0x59   :  { %1472 = vmatprep.subr.bf16.mxu0 %v5393_v55  ;;  %1924 = vmatprep.subr.bf16.mxu1 %v5395_v56  ;;  %v5458_v55 = vld [vmem:[%s7406_s1 + $0x2ec] ss:$16 sps:$4 sm:$0xff]   ;;  %v5453_v56 = vld [vmem:[%s7406_s1 + $0x2e0] ss:$16 sps:$4 sm:$0xff]  }
  0x5c   :  { %1473 = vmatpush1.bf16.msra.mxu0 %v5397_v57  ;;  %1925 = vmatpush1.bf16.msra.mxu1 %v5398_v58  ;;  %v5456_v57 = vld [vmem:[%s7406_s1 + $0x2e8] ss:$16 sps:$4 sm:$0xff]   ;;  %v196_v58 = vpack.c.bf16 %v119_v52, %v112_v51  ;;  %v57_v51 = vld [vmem:[%s7405_s0 + $0x10] sm:$0xff] }
  0x5d   :  { %1474 = vmatprep.subr.bf16.mxu0 %v5399_v59  ;;  %1926 = vmatprep.subr.bf16.mxu1 %v5401_v60  ;;  %v111_v59 = vld [vmem:[%s7405_s0 + $0x1c0] sm:$0xff]  ;;  %v118_v60 = vld [vmem:[%s7405_s0 + $0x1f8] sm:$0xff]  ;;  %v64_v52 = vld [vmem:[%s7405_s0 + $0x48] sm:$0xff] }
  0x60   :  { %1475 = vmatpush1.bf16.msra.mxu0 %v5403_v61  ;;  %1927 = vmatpush1.bf16.msra.mxu1 %v5404_v62  ;;  %v5461_v61 = vld [vmem:[%s7406_s1 + $0x304] ss:$16 sps:$4 sm:$0xff]   ;;  %v5464_v62 = vld [vmem:[%s7406_s1 + $0x30c] ss:$16 sps:$4 sm:$0xff]  }
  0x61   :  { %1476 = vmatprep.subr.bf16.mxu0 %v5405_v63  ;;  %1928 = vmatprep.subr.bf16.mxu1 %v5407_v0  ;;  %v195_v63 = vpack.c.bf16 %v118_v60, %v111_v59  ;;  %v126_v0 = vld [vmem:[%s7405_s0 + $0x238] sm:$0xff]  ;;  %v5515_v60 = vld [vmem:[%s7406_s1 + $0x424] ss:$16 sps:$4 sm:$0xff]  }
  0x62   :  { %v5510_v59 = vld [vmem:[%s7406_s1 + $0x408] ss:$16 sps:$4 sm:$0xff]  }
  0x64   :  { %1477 = vmatpush1.bf16.msra.mxu0 %v5409_v1  ;;  %1929 = vmatpush1.bf16.msra.mxu1 %v5410_v2  ;;  %v133_v1 = vld [vmem:[%s7405_s0 + $0x270] sm:$0xff] }
  0x65   :  { %1559 = vmatprep.subr.bf16.mxu0 %v5413_v5  ;;  %2011 = vmatprep.subr.bf16.mxu1 %v5416_v6  ;;  %v5459_v2 = vld [vmem:[%s7406_s1 + $0x300] ss:$16 sps:$4 sm:$0xff]   ;;  %v5470_v5 = vld [vmem:[%s7406_s1 + $0x32c] ss:$16 sps:$4 sm:$0xff]  }
  0x66   :  { %v5465_v6 = vld [vmem:[%s7406_s1 + $0x320] ss:$16 sps:$4 sm:$0xff]  }
  0x67   :  { %1479 = vmatmul.mubr.bf16.vlgmr.msra.gmra.mrb[0].mxu0 %v167_v8  ;;  %1931 = vmatmul.mubr.bf16.vlgmr.msra.gmra.mrb[0].mxu1 %v167_v8  ;;  %v203_v8 = vpack.c.bf16 %v133_v1, %v126_v0  ;;  %v71_v1 = vld [vmem:[%s7405_s0 + $0x80] sm:$0xff] }
  0x68   :  { %1560 = vmatpush1.bf16.msra.mxu0 %v5411_v7  ;;  %2012 = vmatpush1.bf16.msra.mxu1 %v5414_v9  ;;  %v5468_v7 = vld [vmem:[%s7406_s1 + $0x328] ss:$16 sps:$4 sm:$0xff]   ;;  %v125_v9 = vld [vmem:[%s7405_s0 + $0x230] sm:$0xff] }
  0x69   :  { %1561 = vmatprep.subr.bf16.mxu0 %v5419_v12  ;;  %2013 = vmatprep.subr.bf16.mxu1 %v5422_v13  ;;  %v5476_v12 = vld [vmem:[%s7406_s1 + $0x34c] ss:$16 sps:$4 sm:$0xff]   ;;  %v5471_v13 = vld [vmem:[%s7406_s1 + $0x340] ss:$16 sps:$4 sm:$0xff]  }
  0x6a   :  { %1488 = vmatprep.mubr.bf16.mxu0 %v175_v15  ;;  %1940 = vmatprep.mubr.bf16.mxu1 %v175_v15  ;;  %v5474_v15 = vld [vmem:[%s7406_s1 + $0x348] ss:$16 sps:$4 sm:$0xff]  }
  0x6c   :  { %1562 = vmatpush1.bf16.msra.mxu0 %v5417_v14  ;;  %2014 = vmatpush1.bf16.msra.mxu1 %v5420_v16  ;;  %v202_v14 = vpack.c.bf16 %v132_v10, %v125_v9  ;;  %v140_v16 = vld [vmem:[%s7405_s0 + $0x2a8] sm:$0xff]  ;;  %v5527_v10 = vld [vmem:[%s7406_s1 + $0x464] ss:$16 sps:$4 sm:$0xff]  }
  0x6d   :  { %1563 = vmatprep.subr.bf16.mxu0 %v5425_v19  ;;  %2015 = vmatprep.subr.bf16.mxu1 %v5428_v20  ;;  %v5482_v19 = vld [vmem:[%s7406_s1 + $0x36c] ss:$16 sps:$4 sm:$0xff]   ;;  %v5477_v20 = vld [vmem:[%s7406_s1 + $0x360] ss:$16 sps:$4 sm:$0xff]   ;;  %v5522_v9 = vld [vmem:[%s7406_s1 + $0x448] ss:$16 sps:$4 sm:$0xff]  }
  0x6f   :  { %1489 = vmatmul.mubr.bf16.gmra.mrb[4].mxu0 %v174_v23  ;;  %1941 = vmatmul.mubr.bf16.gmra.mrb[4].mxu1 %v174_v23  ;;  %v139_v23 = vld [vmem:[%s7405_s0 + $0x2a0] sm:$0xff] }
  0x70   :  { %1564 = vmatpush1.bf16.msra.mxu0 %v5423_v21  ;;  %2016 = vmatpush1.bf16.msra.mxu1 %v5426_v22  ;;  %v210_v21 = vpack.c.bf16 %v147_v17, %v140_v16  ;;  %v5480_v22 = vld [vmem:[%s7406_s1 + $0x368] ss:$16 sps:$4 sm:$0xff]   ;;  %v5533_v17 = vld [vmem:[%s7406_s1 + $0x484] ss:$16 sps:$4 sm:$0xff]  }
  0x71   :  { %1565 = vmatprep.subr.bf16.mxu0 %v5431_v26  ;;  %2017 = vmatprep.subr.bf16.mxu1 %v5434_v27  ;;  %v5488_v26 = vld [vmem:[%s7406_s1 + $0x38c] ss:$16 sps:$4 sm:$0xff]   ;;  %v5483_v27 = vld [vmem:[%s7406_s1 + $0x380] ss:$16 sps:$4 sm:$0xff]  }
  0x72   :  { %1498 = vmatprep.mubr.bf16.mxu0 %v182_v28  ;;  %1950 = vmatprep.mubr.bf16.mxu1 %v182_v28  ;;  %v5486_v28 = vld [vmem:[%s7406_s1 + $0x388] ss:$16 sps:$4 sm:$0xff]  }
  0x73   :  { %v92_v16 = vld [vmem:[%s7405_s0 + $0x128] sm:$0xff] }
  0x74   :  { %1566 = vmatpush1.bf16.msra.mxu0 %v5429_v29  ;;  %2018 = vmatpush1.bf16.msra.mxu1 %v5432_v30  ;;  %v209_v29 = vpack.c.bf16 %v146_v24, %v139_v23  ;;  %v154_v30 = vld [vmem:[%s7405_s0 + $0x318] sm:$0xff]  ;;  %v107_v23 = vld [vmem:[%s7405_s0 + $0x1a0] sm:$0xff] }
  0x75   :  { %1567 = vmatprep.subr.bf16.mxu0 %v5437_v33  ;;  %2019 = vmatprep.subr.bf16.mxu1 %v5440_v34  ;;  %v5494_v33 = vld [vmem:[%s7406_s1 + $0x3ac] ss:$16 sps:$4 sm:$0xff]   ;;  %v217_v34 = vpack.c.bf16 %v161_v31, %v154_v30  ;;  %v5539_v24 = vld [vmem:[%s7406_s1 + $0x4a4] ss:$16 sps:$4 sm:$0xff]  }
  0x76   :  { %v106_v30 = vld [vmem:[%s7405_s0 + $0x198] sm:$0xff]  ;;  %v5545_v31 = vld [vmem:[%s7406_s1 + $0x4c4] ss:$16 sps:$4 sm:$0xff]  }
  0x77   :  { %1499 = vmatmul.mubr.bf16.gmra.mrb[8].mxu0 %v181_v37  ;;  %1951 = vmatmul.mubr.bf16.gmra.mrb[8].mxu1 %v181_v37  ;;  %v153_v37 = vld [vmem:[%s7405_s0 + $0x310] sm:$0xff] }
  0x78   :  { %1568 = vmatpush1.bf16.msra.mxu0 %v5435_v35  ;;  %2020 = vmatpush1.bf16.msra.mxu1 %v5438_v36  ;;  %v5489_v35 = vld [vmem:[%s7406_s1 + $0x3a0] ss:$16 sps:$4 sm:$0xff]   ;;  %v5492_v36 = vld [vmem:[%s7406_s1 + $0x3a8] ss:$16 sps:$4 sm:$0xff]  }
  0x79   :  { %1569 = vmatprep.subr.bf16.mxu0 %v5443_v40  ;;  %2021 = vmatprep.subr.bf16.mxu1 %v5446_v41  ;;  %v5500_v40 = vld [vmem:[%s7406_s1 + $0x3cc] ss:$16 sps:$4 sm:$0xff]   ;;  %v5495_v41 = vld [vmem:[%s7406_s1 + $0x3c0] ss:$16 sps:$4 sm:$0xff]  }
  0x7a   :  { %1508 = vmatprep.mubr.bf16.mxu0 %v189_v43  ;;  %1960 = vmatprep.mubr.bf16.mxu1 %v189_v43  ;;  %v216_v43 = vpack.c.bf16 %v160_v38, %v153_v37  ;;  %v5546_v37 = vld [vmem:[%s7406_s1 + $0x4c8] ss:$16 sps:$4 sm:$0xff]   ;;  %v5551_v38 = vld [vmem:[%s7406_s1 + $0x4e4] ss:$16 sps:$4 sm:$0xff]  }
  0x7c   :  { %1570 = vmatpush1.bf16.msra.mxu0 %v5441_v42  ;;  %2022 = vmatpush1.bf16.msra.mxu1 %v5444_v44  ;;  %v5498_v42 = vld [vmem:[%s7406_s1 + $0x3c8] ss:$16 sps:$4 sm:$0xff]  }
  0x7d   :  { %1571 = vmatprep.subr.bf16.mxu0 %v5449_v47  ;;  %2023 = vmatprep.subr.bf16.mxu1 %v5452_v48  ;;  %v58_v44 = vld [vmem:[%s7405_s0 + $0x18] sm:$0xff]  ;;  %v5501_v48 = vld [vmem:[%s7406_s1 + $0x3e0] ss:$16 sps:$4 sm:$0xff]  }
  0x7e   :  { %v5506_v47 = vld [vmem:[%s7406_s1 + $0x3ec] ss:$16 sps:$4 sm:$0xff]  }
  0x7f   :  { %1509 = vmatmul.mubr.bf16.gmra.mrb[12].mxu0 %v188_v50  ;;  %1961 = vmatmul.mubr.bf16.gmra.mrb[12].mxu1 %v188_v50  ;;  %v5504_v50 = vld [vmem:[%s7406_s1 + $0x3e8] ss:$16 sps:$4 sm:$0xff]  }
  0x80   :  { %1572 = vmatpush1.bf16.msra.mxu0 %v5447_v49  ;;  %2024 = vmatpush1.bf16.msra.mxu1 %v5450_v53  ;;  %v170_v49 = vpack.c.bf16 %v65_v45, %v58_v44  ;;  %v5509_v53 = vld [vmem:[%s7406_s1 + $0x404] ss:$16 sps:$4 sm:$0xff]   ;;  %v120_v44 = vld [vmem:[%s7405_s0 + $0x208] sm:$0xff] }
  0x81   :  { %1573 = vmatprep.subr.bf16.mxu0 %v5455_v54  ;;  %2025 = vmatprep.subr.bf16.mxu1 %v5458_v55  ;;  %v5512_v54 = vld [vmem:[%s7406_s1 + $0x40c] ss:$16 sps:$4 sm:$0xff]   ;;  %v5507_v55 = vld [vmem:[%s7406_s1 + $0x400] ss:$16 sps:$4 sm:$0xff]   ;;  %v5557_v45 = vld [vmem:[%s7406_s1 + $0x504] ss:$16 sps:$4 sm:$0xff]  }
  0x82   :  { %1518 = vmatprep.mubr.bf16.mxu0 %v196_v58  ;;  %1970 = vmatprep.mubr.bf16.mxu1 %v196_v58  ;;  %v79_v58 = vld [vmem:[%s7405_s0 + $0xc0] sm:$0xff] }
  0x84   :  { %1574 = vmatpush1.bf16.msra.mxu0 %v5453_v56  ;;  %2026 = vmatpush1.bf16.msra.mxu1 %v5456_v57  ;;  %v169_v56 = vpack.c.bf16 %v64_v52, %v57_v51  ;;  %v72_v57 = vld [vmem:[%s7405_s0 + $0x88] sm:$0xff]  ;;  %v5563_v52 = vld [vmem:[%s7406_s1 + $0x524] ss:$16 sps:$4 sm:$0xff]  }
  0x85   :  { %1575 = vmatprep.subr.bf16.mxu0 %v5461_v61  ;;  %2027 = vmatprep.subr.bf16.mxu1 %v5464_v62  ;;  %v5518_v61 = vld [vmem:[%s7406_s1 + $0x42c] ss:$16 sps:$4 sm:$0xff]   ;;  %v5513_v62 = vld [vmem:[%s7406_s1 + $0x420] ss:$16 sps:$4 sm:$0xff]   ;;  %v177_v0 = vpack.c.bf16 %v79_v58, %v72_v57  ;;  %v5558_v51 = vld [vmem:[%s7406_s1 + $0x508] ss:$16 sps:$4 sm:$0xff]  }
  0x86   :  { %v127_v57 = vld [vmem:[%s7405_s0 + $0x240] sm:$0xff]  ;;  %v134_v58 = vld [vmem:[%s7405_s0 + $0x278] sm:$0xff] }
  0x87   :  { %1519 = vmatmul.mubr.bf16.gmra.mrb[16].mxu0 %v195_v63  ;;  %1971 = vmatmul.mubr.bf16.gmra.mrb[16].mxu1 %v195_v63  ;;  %v5516_v63 = vld [vmem:[%s7406_s1 + $0x428] ss:$16 sps:$4 sm:$0xff]  }
  0x88   :  { %1576 = vmatpush1.bf16.msra.mxu0 %v5459_v2  ;;  %2028 = vmatpush1.bf16.msra.mxu1 %v5462_v3  ;;  %v78_v2 = vld [vmem:[%s7405_s0 + $0xb8] sm:$0xff]  ;;  %v5521_v3 = vld [vmem:[%s7406_s1 + $0x444] ss:$16 sps:$4 sm:$0xff]  }
  0x89   :  { %1577 = vmatprep.subr.bf16.mxu0 %v5467_v4  ;;  %2029 = vmatprep.subr.bf16.mxu1 %v5470_v5  ;;  %v5524_v4 = vld [vmem:[%s7406_s1 + $0x44c] ss:$16 sps:$4 sm:$0xff]   ;;  %v176_v5 = vpack.c.bf16 %v78_v2, %v71_v1  ;;  %v204_v1 = vpack.c.bf16 %v134_v58, %v127_v57  ;;  %v5575_v2 = vld [vmem:[%s7406_s1 + $0x564] ss:$16 sps:$4 sm:$0xff]  }
  0x8a   :  { %1528 = vmatprep.mubr.bf16.mxu0 %v203_v8  ;;  %1980 = vmatprep.mubr.bf16.mxu1 %v203_v8  ;;  %v5519_v8 = vld [vmem:[%s7406_s1 + $0x440] ss:$16 sps:$4 sm:$0xff]  }
  0x8c   :  { %1578 = vmatpush1.bf16.msra.mxu0 %v5465_v6  ;;  %2030 = vmatpush1.bf16.msra.mxu1 %v5468_v7  ;;  %v86_v6 = vld [vmem:[%s7405_s0 + $0xf8] sm:$0xff]  ;;  %v93_v7 = vld [vmem:[%s7405_s0 + $0x130] sm:$0xff] }
  0x8d   :  { %1579 = vmatprep.subr.bf16.mxu0 %v5473_v11  ;;  %2031 = vmatprep.subr.bf16.mxu1 %v5476_v12  ;;  %v5530_v11 = vld [vmem:[%s7406_s1 + $0x46c] ss:$16 sps:$4 sm:$0xff]   ;;  %v5525_v12 = vld [vmem:[%s7406_s1 + $0x460] ss:$16 sps:$4 sm:$0xff]  }
  0x8f   :  { %1529 = vmatmul.mubr.bf16.gmra.mrb[20].mxu0 %v202_v14  ;;  %1981 = vmatmul.mubr.bf16.gmra.mrb[20].mxu1 %v202_v14  ;;  %v184_v14 = vpack.c.bf16 %v93_v7, %v86_v6  ;;  %v141_v7 = vld [vmem:[%s7405_s0 + $0x2b0] sm:$0xff] }
  0x90   :  { %1580 = vmatpush1.bf16.msra.mxu0 %v5471_v13  ;;  %2032 = vmatpush1.bf16.msra.mxu1 %v5474_v15  ;;  %v5528_v13 = vld [vmem:[%s7406_s1 + $0x468] ss:$16 sps:$4 sm:$0xff]   ;;  %v85_v15 = vld [vmem:[%s7405_s0 + $0xf0] sm:$0xff] }
  0x91   :  { %1581 = vmatprep.subr.bf16.mxu0 %v5479_v18  ;;  %2033 = vmatprep.subr.bf16.mxu1 %v5482_v19  ;;  %v5536_v18 = vld [vmem:[%s7406_s1 + $0x48c] ss:$16 sps:$4 sm:$0xff]   ;;  %v5531_v19 = vld [vmem:[%s7406_s1 + $0x480] ss:$16 sps:$4 sm:$0xff]  }
  0x92   :  { %1538 = vmatprep.mubr.bf16.mxu0 %v210_v21  ;;  %1990 = vmatprep.mubr.bf16.mxu1 %v210_v21  ;;  %v5534_v21 = vld [vmem:[%s7406_s1 + $0x488] ss:$16 sps:$4 sm:$0xff]  }
  0x94   :  { %1582 = vmatpush1.bf16.msra.mxu0 %v5477_v20  ;;  %2034 = vmatpush1.bf16.msra.mxu1 %v5480_v22  ;;  %v183_v20 = vpack.c.bf16 %v92_v16, %v85_v15  ;;  %v100_v22 = vld [vmem:[%s7405_s0 + $0x168] sm:$0xff]  ;;  %v5587_v16 = vld [vmem:[%s7406_s1 + $0x5a4] ss:$16 sps:$4 sm:$0xff]  }
  0x95   :  { %1583 = vmatprep.subr.bf16.mxu0 %v5485_v25  ;;  %2035 = vmatprep.subr.bf16.mxu1 %v5488_v26  ;;  %v5542_v25 = vld [vmem:[%s7406_s1 + $0x4ac] ss:$16 sps:$4 sm:$0xff]   ;;  %v5537_v26 = vld [vmem:[%s7406_s1 + $0x4a0] ss:$16 sps:$4 sm:$0xff]  }
  0x97   :  { %1539 = vmatmul.mubr.bf16.gmra.mrb[24].mxu0 %v209_v29  ;;  %1991 = vmatmul.mubr.bf16.gmra.mrb[24].mxu1 %v209_v29  ;;  %v99_v29 = vld [vmem:[%s7405_s0 + $0x160] sm:$0xff] }
  0x98   :  { %1584 = vmatpush1.bf16.msra.mxu0 %v5483_v27  ;;  %2036 = vmatpush1.bf16.msra.mxu1 %v5486_v28  ;;  %v191_v27 = vpack.c.bf16 %v107_v23, %v100_v22  ;;  %v5540_v28 = vld [vmem:[%s7406_s1 + $0x4a8] ss:$16 sps:$4 sm:$0xff]   ;;  %v5593_v23 = vld [vmem:[%s7406_s1 + $0x5c4] ss:$16 sps:$4 sm:$0xff]  }
  0x99   :  { %1585 = vmatprep.subr.bf16.mxu0 %v5491_v32  ;;  %2037 = vmatprep.subr.bf16.mxu1 %v5494_v33  ;;  %v5548_v32 = vld [vmem:[%s7406_s1 + $0x4cc] ss:$16 sps:$4 sm:$0xff]   ;;  %v190_v33 = vpack.c.bf16 %v106_v30, %v99_v29  ;;  %v5599_v30 = vld [vmem:[%s7406_s1 + $0x5e4] ss:$16 sps:$4 sm:$0xff]  }
  0x9a   :  { %1548 = vmatprep.mubr.bf16.mxu0 %v217_v34  ;;  %2000 = vmatprep.mubr.bf16.mxu1 %v217_v34  ;;  %v114_v34 = vld [vmem:[%s7405_s0 + $0x1d8] sm:$0xff] }
  0x9b   :  { %v162_v22 = vld [vmem:[%s7405_s0 + $0x358] sm:$0xff] }
  0x9c   :  { %1586 = vmatpush1.bf16.msra.mxu0 %v5489_v35  ;;  %2038 = vmatpush1.bf16.msra.mxu1 %v5492_v36  ;;  %v121_v35 = vld [vmem:[%s7405_s0 + $0x210] sm:$0xff] }
  0x9d   :  { %1587 = vmatprep.subr.bf16.mxu0 %v5497_v39  ;;  %2039 = vmatprep.subr.bf16.mxu1 %v5500_v40  ;;  %v5543_v36 = vld [vmem:[%s7406_s1 + $0x4c0] ss:$16 sps:$4 sm:$0xff]   ;;  %v5554_v39 = vld [vmem:[%s7406_s1 + $0x4ec] ss:$16 sps:$4 sm:$0xff]   ;;  %v198_v40 = vpack.c.bf16 %v121_v35, %v114_v34  ;;  %v5600_v34 = vld [vmem:[%s7406_s1 + $0x5e8] ss:$16 sps:$4 sm:$0xff]  }
  0x9e   :  { %v59_v35 = vld [vmem:[%s7405_s0 + $0x20] sm:$0xff] }
  0x9f   :  { %1549 = vmatmul.mubr.bf16.gmra.mrb[28].mxu0 %v216_v43  ;;  %2001 = vmatmul.mubr.bf16.gmra.mrb[28].mxu1 %v216_v43  ;;  %v113_v43 = vld [vmem:[%s7405_s0 + $0x1d0] sm:$0xff] }
  0xa0   :  { %1588 = vmatpush1.bf16.msra.mxu0 %v5495_v41  ;;  %2040 = vmatpush1.bf16.msra.mxu1 %v5498_v42  ;;  %v5549_v41 = vld [vmem:[%s7406_s1 + $0x4e0] ss:$16 sps:$4 sm:$0xff]   ;;  %v5552_v42 = vld [vmem:[%s7406_s1 + $0x4e8] ss:$16 sps:$4 sm:$0xff]  }
  0xa1   :  { %1589 = vmatprep.subr.bf16.mxu0 %v5503_v46  ;;  %2041 = vmatprep.subr.bf16.mxu1 %v5506_v47  ;;  %v5560_v46 = vld [vmem:[%s7406_s1 + $0x50c] ss:$16 sps:$4 sm:$0xff]   ;;  %v197_v47 = vpack.c.bf16 %v120_v44, %v113_v43  ;;  %v5606_v44 = vld [vmem:[%s7406_s1 + $0x608] ss:$16 sps:$4 sm:$0xff]  }
  0xa2   :  { %1591 = vmatprep.mubr.bf16.mxu0 %v170_v49  ;;  %2043 = vmatprep.mubr.bf16.mxu1 %v170_v49  ;;  %v135_v49 = vld [vmem:[%s7405_s0 + $0x280] sm:$0xff] }
  0xa4   :  { %1590 = vmatpush1.bf16.msra.mxu0 %v5501_v48  ;;  %2042 = vmatpush1.bf16.msra.mxu1 %v5504_v50  ;;  %v128_v48 = vld [vmem:[%s7405_s0 + $0x248] sm:$0xff]  ;;  %v5555_v50 = vld [vmem:[%s7406_s1 + $0x500] ss:$16 sps:$4 sm:$0xff]  }
  0xa5   :  { %1672 = vmatprep.subr.bf16.mxu0 %v5509_v53  ;;  %2124 = vmatprep.subr.bf16.mxu1 %v5512_v54  ;;  %v5566_v53 = vld [vmem:[%s7406_s1 + $0x52c] ss:$16 sps:$4 sm:$0xff]   ;;  %v205_v54 = vpack.c.bf16 %v135_v49, %v128_v48 }
  0xa6   :  { %v80_v48 = vld [vmem:[%s7405_s0 + $0xc8] sm:$0xff] }
  0xa7   :  { %1592 = vmatmul.mubr.bf16.vlgmr.msra.gmra.mrb[0].mxu0 %v169_v56  ;;  %2044 = vmatmul.mubr.bf16.vlgmr.msra.gmra.mrb[0].mxu1 %v169_v56  ;;  %v5564_v56 = vld [vmem:[%s7406_s1 + $0x528] ss:$16 sps:$4 sm:$0xff]  }
  0xa8   :  { %1673 = vmatpush1.bf16.msra.mxu0 %v5507_v55  ;;  %2125 = vmatpush1.bf16.msra.mxu1 %v5510_v59  ;;  %v5561_v55 = vld [vmem:[%s7406_s1 + $0x520] ss:$16 sps:$4 sm:$0xff]   ;;  %v5569_v59 = vld [vmem:[%s7406_s1 + $0x544] ss:$16 sps:$4 sm:$0xff]   ;;  %v88_v49 = vld [vmem:[%s7405_s0 + $0x108] sm:$0xff] }
  0xa9   :  { %1674 = vmatprep.subr.bf16.mxu0 %v5515_v60  ;;  %2126 = vmatprep.subr.bf16.mxu1 %v5518_v61  ;;  %v5572_v60 = vld [vmem:[%s7406_s1 + $0x54c] ss:$16 sps:$4 sm:$0xff]   ;;  %v5567_v61 = vld [vmem:[%s7406_s1 + $0x540] ss:$16 sps:$4 sm:$0xff]  }
  0xaa   :  { %1601 = vmatprep.mubr.bf16.mxu0 %v177_v0  ;;  %2053 = vmatprep.mubr.bf16.mxu1 %v177_v0  ;;  %v149_v0 = vld [vmem:[%s7405_s0 + $0x2f0] sm:$0xff] }
  0xac   :  { %1675 = vmatpush1.bf16.msra.mxu0 %v5513_v62  ;;  %2127 = vmatpush1.bf16.msra.mxu1 %v5516_v63  ;;  %v5570_v62 = vld [vmem:[%s7406_s1 + $0x548] ss:$16 sps:$4 sm:$0xff]  }
  0xad   :  { %1676 = vmatprep.subr.bf16.mxu0 %v5521_v3  ;;  %2128 = vmatprep.subr.bf16.mxu1 %v5524_v4  ;;  %v142_v63 = vld [vmem:[%s7405_s0 + $0x2b8] sm:$0xff]  ;;  %v5573_v4 = vld [vmem:[%s7406_s1 + $0x560] ss:$16 sps:$4 sm:$0xff]  }
  0xae   :  { %v5578_v3 = vld [vmem:[%s7406_s1 + $0x56c] ss:$16 sps:$4 sm:$0xff]   ;;  %v212_v6 = vpack.c.bf16 %v149_v0, %v142_v63 }
  0xaf   :  { %1602 = vmatmul.mubr.bf16.gmra.mrb[4].mxu0 %v176_v5  ;;  %2054 = vmatmul.mubr.bf16.gmra.mrb[4].mxu1 %v176_v5  ;;  %v5576_v5 = vld [vmem:[%s7406_s1 + $0x568] ss:$16 sps:$4 sm:$0xff]  }
  0xb0   :  { %1677 = vmatpush1.bf16.msra.mxu0 %v5519_v8  ;;  %2129 = vmatpush1.bf16.msra.mxu1 %v5522_v9  ;;  %v148_v8 = vld [vmem:[%s7405_s0 + $0x2e8] sm:$0xff]  ;;  %v5581_v9 = vld [vmem:[%s7406_s1 + $0x584] ss:$16 sps:$4 sm:$0xff]  }
  0xb1   :  { %1678 = vmatprep.subr.bf16.mxu0 %v5527_v10  ;;  %2130 = vmatprep.subr.bf16.mxu1 %v5530_v11  ;;  %v5584_v10 = vld [vmem:[%s7406_s1 + $0x58c] ss:$16 sps:$4 sm:$0xff]   ;;  %v211_v15 = vpack.c.bf16 %v148_v8, %v141_v7  ;;  %v129_v7 = vld [vmem:[%s7405_s0 + $0x250] sm:$0xff] }
  0xb2   :  { %1611 = vmatprep.mubr.bf16.mxu0 %v184_v14  ;;  %2063 = vmatprep.mubr.bf16.mxu1 %v184_v14  ;;  %v156_v11 = vld [vmem:[%s7405_s0 + $0x328] sm:$0xff] }
  0xb3   :  { %v5582_v14 = vld [vmem:[%s7406_s1 + $0x588] ss:$16 sps:$4 sm:$0xff]  }
  0xb4   :  { %1679 = vmatpush1.bf16.msra.mxu0 %v5525_v12  ;;  %2131 = vmatpush1.bf16.msra.mxu1 %v5528_v13  ;;  %v163_v12 = vld [vmem:[%s7405_s0 + $0x360] sm:$0xff]  ;;  %v136_v8 = vld [vmem:[%s7405_s0 + $0x288] sm:$0xff] }
  0xb5   :  { %1680 = vmatprep.subr.bf16.mxu0 %v5533_v17  ;;  %2132 = vmatprep.subr.bf16.mxu1 %v5536_v18  ;;  %v5579_v13 = vld [vmem:[%s7406_s1 + $0x580] ss:$16 sps:$4 sm:$0xff]   ;;  %v5590_v17 = vld [vmem:[%s7406_s1 + $0x5ac] ss:$16 sps:$4 sm:$0xff]  }
  0xb6   :  { %v5585_v18 = vld [vmem:[%s7406_s1 + $0x5a0] ss:$16 sps:$4 sm:$0xff]  }
  0xb7   :  { %1612 = vmatmul.mubr.bf16.gmra.mrb[8].mxu0 %v183_v20  ;;  %2064 = vmatmul.mubr.bf16.gmra.mrb[8].mxu1 %v183_v20  ;;  %v219_v20 = vpack.c.bf16 %v163_v12, %v156_v11  ;;  %v206_v11 = vpack.c.bf16 %v136_v8, %v129_v7  ;;  %v5660_v7 = vld [vmem:[#allocation2 + $0x108] ss:$16 sps:$4 sm:$0xff]   ;;  %v5665_v8 = vld [vmem:[#allocation2 + $0x124] ss:$16 sps:$4 sm:$0xff]  }
  0xb8   :  { %1681 = vmatpush1.bf16.msra.mxu0 %v5531_v19  ;;  %2133 = vmatpush1.bf16.msra.mxu1 %v5534_v21  ;;  %v5588_v19 = vld [vmem:[%s7406_s1 + $0x5a8] ss:$16 sps:$4 sm:$0xff]   ;;  %v155_v21 = vld [vmem:[%s7405_s0 + $0x320] sm:$0xff] }
  0xb9   :  { %1682 = vmatprep.subr.bf16.mxu0 %v5539_v24  ;;  %2134 = vmatprep.subr.bf16.mxu1 %v5542_v25  ;;  %v5596_v24 = vld [vmem:[%s7406_s1 + $0x5cc] ss:$16 sps:$4 sm:$0xff]   ;;  %v218_v29 = vpack.c.bf16 %v162_v22, %v155_v21  ;;  %v5951_v22 = vmov 0  }
  0xba   :  { %1621 = vmatprep.mubr.bf16.mxu0 %v191_v27  ;;  %2073 = vmatprep.mubr.bf16.mxu1 %v191_v27  ;;  %v60_v25 = vld [vmem:[%s7405_s0 + $0x28] sm:$0xff]  ;;  %v5591_v27 = vld [vmem:[%s7406_s1 + $0x5c0] ss:$16 sps:$4 sm:$0xff]  }
  0xbc   :  { %1683 = vmatpush1.bf16.msra.mxu0 %v5537_v26  ;;  %2135 = vmatpush1.bf16.msra.mxu1 %v5540_v28  ;;  %v67_v26 = vld [vmem:[%s7405_s0 + $0x60] sm:$0xff]  ;;  %v5594_v28 = vld [vmem:[%s7406_s1 + $0x5c8] ss:$16 sps:$4 sm:$0xff]  }
  0xbd   :  { %1684 = vmatprep.subr.bf16.mxu0 %v5545_v31  ;;  %2136 = vmatprep.subr.bf16.mxu1 %v5548_v32  ;;  %v5602_v31 = vld [vmem:[%s7406_s1 + $0x5ec] ss:$16 sps:$4 sm:$0xff]   ;;  %v172_v32 = vpack.c.bf16 %v67_v26, %v60_v25  ;;  %v5609_v26 = vld [vmem:[#allocation2] ss:$16 sps:$4 sm:$0xff]  }
  0xbf   :  { %1622 = vmatmul.mubr.bf16.gmra.mrb[12].mxu0 %v190_v33  ;;  %2074 = vmatmul.mubr.bf16.gmra.mrb[12].mxu1 %v190_v33  ;;  %v5597_v33 = vld [vmem:[%s7406_s1 + $0x5e0] ss:$16 sps:$4 sm:$0xff]  }
  0xc0   :  { %1685 = vmatpush1.bf16.msra.mxu0 %v5543_v36  ;;  %2137 = vmatpush1.bf16.msra.mxu1 %v5546_v37  ;;  %v66_v36 = vld [vmem:[%s7405_s0 + $0x58] sm:$0xff]  ;;  %v5605_v37 = vld [vmem:[%s7406_s1 + $0x604] ss:$16 sps:$4 sm:$0xff]  }
  0xc1   :  { %1686 = vmatprep.subr.bf16.mxu0 %v5551_v38  ;;  %2138 = vmatprep.subr.bf16.mxu1 %v5554_v39  ;;  %v74_v38 = vld [vmem:[%s7405_s0 + $0x98] sm:$0xff]  ;;  %v81_v39 = vld [vmem:[%s7405_s0 + $0xd0] sm:$0xff] }
  0xc2   :  { %1631 = vmatprep.mubr.bf16.mxu0 %v198_v40  ;;  %2083 = vmatprep.mubr.bf16.mxu1 %v198_v40  ;;  %v5608_v40 = vld [vmem:[%s7406_s1 + $0x60c] ss:$16 sps:$4 sm:$0xff]   ;;  %v179_v43 = vpack.c.bf16 %v81_v39, %v74_v38  ;;  %v5624_v38 = vld [vmem:[#allocation2 + $0x48] ss:$16 sps:$4 sm:$0xff]   ;;  %v5629_v39 = vld [vmem:[#allocation2 + $0x64] ss:$16 sps:$4 sm:$0xff]  }
  0xc4   :  { %1687 = vmatpush1.bf16.msra.mxu0 %v5549_v41  ;;  %2139 = vmatpush1.bf16.msra.mxu1 %v5552_v42  ;;  %v171_v41 = vpack.c.bf16 %v66_v36, %v59_v35  ;;  %v5603_v42 = vld [vmem:[%s7406_s1 + $0x600] ss:$16 sps:$4 sm:$0xff]   ;;  %v5626_v35 = vld [vmem:[#allocation2 + $0x4c] ss:$16 sps:$4 sm:$0xff]  }
  0xc5   :  { %1688 = vmatprep.subr.bf16.mxu0 %v5557_v45  ;;  %2140 = vmatprep.subr.bf16.mxu1 %v5560_v46  ;;  %v5611_v45 = vld [vmem:[#allocation2 + $0x4] ss:$16 sps:$4 sm:$0xff]   ;;  %v5614_v46 = vld [vmem:[#allocation2 + $0xc] ss:$16 sps:$4 sm:$0xff]  }
  0xc7   :  { %1632 = vmatmul.mubr.bf16.gmra.mrb[16].mxu0 %v197_v47  ;;  %2084 = vmatmul.mubr.bf16.gmra.mrb[16].mxu1 %v197_v47  ;;  %v73_v47 = vld [vmem:[%s7405_s0 + $0x90] sm:$0xff] }
  0xc8   :  { %1689 = vmatpush1.bf16.msra.mxu0 %v5555_v50  ;;  %2141 = vmatpush1.bf16.msra.mxu1 %v5558_v51  ;;  %v95_v50 = vld [vmem:[%s7405_s0 + $0x140] sm:$0xff]  ;;  %v178_v51 = vpack.c.bf16 %v80_v48, %v73_v47 }
  0xc9   :  { %1690 = vmatprep.subr.bf16.mxu0 %v5563_v52  ;;  %2142 = vmatprep.subr.bf16.mxu1 %v5566_v53  ;;  %v186_v52 = vpack.c.bf16 %v95_v50, %v88_v49  ;;  %v87_v53 = vld [vmem:[%s7405_s0 + $0x100] sm:$0xff]  ;;  %v5636_v49 = vld [vmem:[#allocation2 + $0x88] ss:$16 sps:$4 sm:$0xff]  }
  0xca   :  { %1641 = vmatprep.mubr.bf16.mxu0 %v205_v54  ;;  %2093 = vmatprep.mubr.bf16.mxu1 %v205_v54  ;;  %v94_v54 = vld [vmem:[%s7405_s0 + $0x138] sm:$0xff]  ;;  %v5633_v48 = vld [vmem:[#allocation2 + $0x80] ss:$16 sps:$4 sm:$0xff]   ;;  %v5641_v50 = vld [vmem:[#allocation2 + $0xa4] ss:$16 sps:$4 sm:$0xff]  }
  0xcb   :  { %v185_v57 = vpack.c.bf16 %v94_v54, %v87_v53  ;;  %v110_v53 = vld [vmem:[%s7405_s0 + $0x1b8] sm:$0xff]  ;;  %v5639_v54 = vld [vmem:[#allocation2 + $0xa0] ss:$16 sps:$4 sm:$0xff]  }
  0xcc   :  { %1691 = vmatpush1.bf16.msra.mxu0 %v5561_v55  ;;  %2143 = vmatpush1.bf16.msra.mxu1 %v5564_v56  ;;  %v102_v55 = vld [vmem:[%s7405_s0 + $0x178] sm:$0xff]  ;;  %v109_v56 = vld [vmem:[%s7405_s0 + $0x1b0] sm:$0xff] }
  0xcd   :  { %1692 = vmatprep.subr.bf16.mxu0 %v5569_v59  ;;  %2144 = vmatprep.subr.bf16.mxu1 %v5572_v60  ;;  %v193_v58 = vpack.c.bf16 %v109_v56, %v102_v55  ;;  %v101_v59 = vld [vmem:[%s7405_s0 + $0x170] sm:$0xff]  ;;  %v108_v60 = vld [vmem:[%s7405_s0 + $0x1a8] sm:$0xff] }
  0xce   :  { %v192_v63 = vpack.c.bf16 %v108_v60, %v101_v59  ;;  %v5642_v55 = vld [vmem:[#allocation2 + $0xa8] ss:$16 sps:$4 sm:$0xff]   ;;  %v5647_v56 = vld [vmem:[#allocation2 + $0xc4] ss:$16 sps:$4 sm:$0xff]   ;;  %v5645_v59 = vld [vmem:[#allocation2 + $0xc0] ss:$16 sps:$4 sm:$0xff]  }
  0xcf   :  { %1642 = vmatmul.mubr.bf16.gmra.mrb[20].mxu0 %v204_v1  ;;  %2094 = vmatmul.mubr.bf16.gmra.mrb[20].mxu1 %v204_v1  ;;  %v115_v1 = vld [vmem:[%s7405_s0 + $0x1e0] sm:$0xff]  ;;  %v5648_v60 = vld [vmem:[#allocation2 + $0xc8] ss:$16 sps:$4 sm:$0xff]  }
  0xd0   :  { %1693 = vmatpush1.bf16.msra.mxu0 %v5567_v61  ;;  %2145 = vmatpush1.bf16.msra.mxu1 %v5570_v62  ;;  %v116_v61 = vld [vmem:[%s7405_s0 + $0x1e8] sm:$0xff]  ;;  %v123_v62 = vld [vmem:[%s7405_s0 + $0x220] sm:$0xff] }
  0xd1   :  { %1694 = vmatprep.subr.bf16.mxu0 %v5575_v2  ;;  %2146 = vmatprep.subr.bf16.mxu1 %v5578_v3  ;;  %v200_v0 = vpack.c.bf16 %v123_v62, %v116_v61  ;;  %v122_v2 = vld [vmem:[%s7405_s0 + $0x218] sm:$0xff]  ;;  %v5653_v61 = vld [vmem:[#allocation2 + $0xe4] ss:$16 sps:$4 sm:$0xff]  }
  0xd2   :  { %1651 = vmatprep.mubr.bf16.mxu0 %v212_v6  ;;  %2103 = vmatprep.mubr.bf16.mxu1 %v212_v6  ;;  %v130_v3 = vld [vmem:[%s7405_s0 + $0x258] sm:$0xff] }
  0xd3   :  { %v5656_v62 = vld [vmem:[#allocation2 + $0xec] ss:$16 sps:$4 sm:$0xff]  }
  0xd4   :  { %1695 = vmatpush1.bf16.msra.mxu0 %v5573_v4  ;;  %2147 = vmatpush1.bf16.msra.mxu1 %v5576_v5  ;;  %v137_v4 = vld [vmem:[%s7405_s0 + $0x290] sm:$0xff]  ;;  %v199_v5 = vpack.c.bf16 %v122_v2, %v115_v1  ;;  %v5654_v2 = vld [vmem:[#allocation2 + $0xe8] ss:$16 sps:$4 sm:$0xff]  }
  0xd5   :  { %1696 = vmatprep.subr.bf16.mxu0 %v5581_v9  ;;  %2148 = vmatprep.subr.bf16.mxu1 %v5584_v10  ;;  %v207_v6 = vpack.c.bf16 %v137_v4, %v130_v3  ;;  %v144_v9 = vld [vmem:[%s7405_s0 + $0x2c8] sm:$0xff]  ;;  %v151_v10 = vld [vmem:[%s7405_s0 + $0x300] sm:$0xff] }
  0xd6   :  { %v214_v12 = vpack.c.bf16 %v151_v10, %v144_v9  ;;  %v5651_v1 = vld [vmem:[#allocation2 + $0xe0] ss:$16 sps:$4 sm:$0xff]   ;;  %v5659_v3 = vld [vmem:[#allocation2 + $0x104] ss:$16 sps:$4 sm:$0xff]   ;;  %v5662_v4 = vld [vmem:[#allocation2 + $0x10c] ss:$16 sps:$4 sm:$0xff]  }
  0xd7   :  { %1652 = vmatmul.mubr.bf16.gmra.mrb[24].mxu0 %v211_v15  ;;  %2104 = vmatmul.mubr.bf16.gmra.mrb[24].mxu1 %v211_v15  ;;  %v158_v15 = vld [vmem:[%s7405_s0 + $0x338] sm:$0xff]  ;;  %v131_v10 = vld [vmem:[%s7405_s0 + $0x260] sm:$0xff] }
  0xd8   :  { %1697 = vmatpush1.bf16.msra.mxu0 %v5579_v13  ;;  %2149 = vmatpush1.bf16.msra.mxu1 %v5582_v14  ;;  %v143_v13 = vld [vmem:[%s7405_s0 + $0x2c0] sm:$0xff]  ;;  %v150_v14 = vld [vmem:[%s7405_s0 + $0x2f8] sm:$0xff] }
  0xd9   :  { %1698 = vmatprep.subr.bf16.mxu0 %v5587_v16  ;;  %2150 = vmatprep.subr.bf16.mxu1 %v5590_v17  ;;  %v165_v16 = vld [vmem:[%s7405_s0 + $0x370] sm:$0xff]  ;;  %v213_v17 = vpack.c.bf16 %v150_v14, %v143_v13  ;;  %v5668_v9 = vld [vmem:[#allocation2 + $0x12c] ss:$16 sps:$4 sm:$0xff]   ;;  %v5666_v13 = vld [vmem:[#allocation2 + $0x128] ss:$16 sps:$4 sm:$0xff]  }
  0xda   :  { %1661 = vmatprep.mubr.bf16.mxu0 %v219_v20  ;;  %2113 = vmatprep.mubr.bf16.mxu1 %v219_v20  ;;  %v164_v20 = vld [vmem:[%s7405_s0 + $0x368] sm:$0xff]  ;;  %v5671_v14 = vld [vmem:[#allocation2 + $0x144] ss:$16 sps:$4 sm:$0xff]  }
  0xdc   :  { %1699 = vmatpush1.bf16.msra.mxu0 %v5585_v18  ;;  %2151 = vmatpush1.bf16.msra.mxu1 %v5588_v19  ;;  %v221_v18 = vpack.c.bf16 %v165_v16, %v158_v15  ;;  %v157_v19 = vld [vmem:[%s7405_s0 + $0x330] sm:$0xff]  ;;  %v5674_v15 = vld [vmem:[#allocation2 + $0x14c] ss:$16 sps:$4 sm:$0xff]  }
  0xdd   :  { %1700 = vmatprep.subr.bf16.mxu0 %v5593_v23  ;;  %2152 = vmatprep.subr.bf16.mxu1 %v5596_v24  ;;  %v220_v21 = vpack.c.bf16 %v164_v20, %v157_v19  ;;  %v61_v23 = vld [vmem:[%s7405_s0 + $0x30] sm:$0xff]  ;;  %v68_v24 = vld [vmem:[%s7405_s0 + $0x68] sm:$0xff] }
  0xde   :  { %v173_v25 = vpack.c.bf16 %v68_v24, %v61_v23  ;;  %v5677_v19 = vld [vmem:[#allocation2 + $0x164] ss:$16 sps:$4 sm:$0xff]   ;;  %v5680_v20 = vld [vmem:[#allocation2 + $0x16c] ss:$16 sps:$4 sm:$0xff]   ;;  %v5675_v24 = vld [vmem:[#allocation2 + $0x160] ss:$16 sps:$4 sm:$0xff]  }
  0xdf   :  { %1662 = vmatmul.mubr.bf16.gmra.mrb[28].mxu0 %v218_v29  ;;  %2114 = vmatmul.mubr.bf16.gmra.mrb[28].mxu1 %v218_v29  ;;  %v5620_v29 = vld [vmem:[#allocation2 + $0x2c] ss:$16 sps:$4 sm:$0xff]  }
  0xe0   :  { %1701 = vmatpush1.bf16.msra.mxu0 %v5591_v27  ;;  %2153 = vmatpush1.bf16.msra.mxu1 %v5594_v28  ;;  %v5612_v27 = vld [vmem:[#allocation2 + $0x8] ss:$16 sps:$4 sm:$0xff]   ;;  %v5617_v28 = vld [vmem:[#allocation2 + $0x24] ss:$16 sps:$4 sm:$0xff]  }
  0xe1   :  { %1702 = vmatprep.subr.bf16.mxu0 %v5599_v30  ;;  %2154 = vmatprep.subr.bf16.mxu1 %v5602_v31  ;;  %v75_v30 = vld [vmem:[%s7405_s0 + $0xa0] sm:$0xff]  ;;  %v82_v31 = vld [vmem:[%s7405_s0 + $0xd8] sm:$0xff]  ;;  %v152_v23 = vld [vmem:[%s7405_s0 + $0x308] sm:$0xff] }
  0xe2   :  { %1704 = vmatprep.mubr.bf16.mxu0 %v172_v32  ;;  %2156 = vmatprep.mubr.bf16.mxu1 %v172_v32  ;;  %v5615_v32 = vld [vmem:[#allocation2 + $0x20] ss:$16 sps:$4 sm:$0xff]   ;;  %v180_v36 = vpack.c.bf16 %v82_v31, %v75_v30  ;;  %v5684_v30 = vld [vmem:[#allocation2 + $0x188] ss:$16 sps:$4 sm:$0xff]   ;;  %v5689_v31 = vld [vmem:[#allocation2 + $0x1a4] ss:$16 sps:$4 sm:$0xff]  }
  0xe4   :  { %1703 = vmatpush1.bf16.msra.mxu0 %v5597_v33  ;;  %2155 = vmatpush1.bf16.msra.mxu1 %v5600_v34  ;;  %v5618_v33 = vld [vmem:[#allocation2 + $0x28] ss:$16 sps:$4 sm:$0xff]   ;;  %v5623_v34 = vld [vmem:[#allocation2 + $0x44] ss:$16 sps:$4 sm:$0xff]  }
  0xe5   :  { %1785 = vmatprep.subr.bf16.mxu0 %v5605_v37  ;;  %2237 = vmatprep.subr.bf16.mxu1 %v5608_v40  ;;  %v5621_v37 = vld [vmem:[#allocation2 + $0x40] ss:$16 sps:$4 sm:$0xff]   ;;  %v5632_v40 = vld [vmem:[#allocation2 + $0x6c] ss:$16 sps:$4 sm:$0xff]  }
  0xe7   :  { %1705 = vmatmul.mubr.bf16.vlgmr.msra.gmra.mrb[0].mxu0 %v171_v41  ;;  %2157 = vmatmul.mubr.bf16.vlgmr.msra.gmra.mrb[0].mxu1 %v171_v41  ;;  %v89_v41 = vld [vmem:[%s7405_s0 + $0x110] sm:$0xff] }
  0xe8   :  { %1786 = vmatpush1.bf16.msra.mxu0 %v5603_v42  ;;  %1714 = vmatprep.mubr.bf16.mxu0 %v179_v43  ;;  %v96_v42 = vld [vmem:[%s7405_s0 + $0x148] sm:$0xff] }
  0xe9   :  { %2166 = vmatprep.mubr.bf16.mxu1 %v179_v43  ;;  %2238 = vmatpush1.bf16.msra.mxu1 %v5606_v44  ;;  %v5627_v43 = vld [vmem:[#allocation2 + $0x60] ss:$16 sps:$4 sm:$0xff]   ;;  %v5630_v44 = vld [vmem:[#allocation2 + $0x68] ss:$16 sps:$4 sm:$0xff]   ;;  %v187_v47 = vpack.c.bf16 %v96_v42, %v89_v41  ;;  %v5701_v41 = vld [vmem:[#allocation2 + $0x1e4] ss:$16 sps:$4 sm:$0xff]  }
  0xea   :  { %3236 = vmatprep.subr.bf16.mxu0 %v5611_v45  ;;  %3462 = vmatprep.subr.bf16.mxu1 %v5614_v46  ;;  %v5635_v45 = vld [vmem:[#allocation2 + $0x84] ss:$16 sps:$4 sm:$0xff]   ;;  %v5638_v46 = vld [vmem:[#allocation2 + $0x8c] ss:$16 sps:$4 sm:$0xff]  }
  0xeb   :  { %v5704_v42 = vld [vmem:[#allocation2 + $0x1ec] ss:$16 sps:$4 sm:$0xff]  }
  0xef   :  { %1715 = vmatmul.mubr.bf16.gmra.mrb[4].mxu0 %v178_v51  ;;  %2167 = vmatmul.mubr.bf16.gmra.mrb[4].mxu1 %v178_v51  ;;  %v5644_v51 = vld [vmem:[#allocation2 + $0xac] ss:$16 sps:$4 sm:$0xff]  }
  0xf0   :  { %1724 = vmatprep.mubr.bf16.mxu0 %v186_v52  ;;  %2176 = vmatprep.mubr.bf16.mxu1 %v186_v52  ;;  %v103_v52 = vld [vmem:[%s7405_s0 + $0x180] sm:$0xff] }
  0xf7   :  { %1725 = vmatmul.mubr.bf16.gmra.mrb[8].mxu0 %v185_v57  ;;  %2177 = vmatmul.mubr.bf16.gmra.mrb[8].mxu1 %v185_v57  ;;  %v5650_v57 = vld [vmem:[#allocation2 + $0xcc] ss:$16 sps:$4 sm:$0xff]  }
  0xf8   :  { %1734 = vmatprep.mubr.bf16.mxu0 %v193_v58  ;;  %2186 = vmatprep.mubr.bf16.mxu1 %v193_v58  ;;  %v194_v58 = vpack.c.bf16 %v110_v53, %v103_v52 }
  0xff   :  { %1735 = vmatmul.mubr.bf16.gmra.mrb[12].mxu0 %v192_v63  ;;  %2187 = vmatmul.mubr.bf16.gmra.mrb[12].mxu1 %v192_v63  ;;  %v117_v63 = vld [vmem:[%s7405_s0 + $0x1f0] sm:$0xff] }
 0x100   :  { %1744 = vmatprep.mubr.bf16.mxu0 %v200_v0  ;;  %2196 = vmatprep.mubr.bf16.mxu1 %v200_v0  ;;  %v124_v0 = vld [vmem:[%s7405_s0 + $0x228] sm:$0xff] }
 0x107   :  { %1745 = vmatmul.mubr.bf16.gmra.mrb[16].mxu0 %v199_v5  ;;  %2197 = vmatmul.mubr.bf16.gmra.mrb[16].mxu1 %v199_v5  ;;  %v201_v5 = vpack.c.bf16 %v124_v0, %v117_v63 }
 0x108   :  { %1754 = vmatprep.mubr.bf16.mxu0 %v207_v6  ;;  %2206 = vmatprep.mubr.bf16.mxu1 %v207_v6  ;;  %v5657_v6 = vld [vmem:[#allocation2 + $0x100] ss:$16 sps:$4 sm:$0xff]  }
 0x10f   :  { %1755 = vmatmul.mubr.bf16.gmra.mrb[20].mxu0 %v206_v11  ;;  %2207 = vmatmul.mubr.bf16.gmra.mrb[20].mxu1 %v206_v11  ;;  %v138_v11 = vld [vmem:[%s7405_s0 + $0x298] sm:$0xff] }
 0x110   :  { %1764 = vmatprep.mubr.bf16.mxu0 %v214_v12  ;;  %2216 = vmatprep.mubr.bf16.mxu1 %v214_v12  ;;  %v5663_v12 = vld [vmem:[#allocation2 + $0x120] ss:$16 sps:$4 sm:$0xff]   ;;  %v208_v16 = vpack.c.bf16 %v138_v11, %v131_v10 }
 0x117   :  { %1765 = vmatmul.mubr.bf16.gmra.mrb[24].mxu0 %v213_v17  ;;  %2217 = vmatmul.mubr.bf16.gmra.mrb[24].mxu1 %v213_v17  ;;  %v5669_v17 = vld [vmem:[#allocation2 + $0x140] ss:$16 sps:$4 sm:$0xff]  }
 0x118   :  { %1774 = vmatprep.mubr.bf16.mxu0 %v221_v18  ;;  %2226 = vmatprep.mubr.bf16.mxu1 %v221_v18  ;;  %v5672_v18 = vld [vmem:[#allocation2 + $0x148] ss:$16 sps:$4 sm:$0xff]  }
 0x11f   :  { %1775 = vmatmul.mubr.bf16.gmra.mrb[28].mxu0 %v220_v21  ;;  %2227 = vmatmul.mubr.bf16.gmra.mrb[28].mxu1 %v220_v21  ;;  %v145_v21 = vld [vmem:[%s7405_s0 + $0x2d0] sm:$0xff] }
 0x120   :  { %1817 = vmatprep.mubr.bf16.mxu0 %v5951_v22  ;;  %2269 = vmatprep.mubr.bf16.mxu1 %v5951_v22 }
 0x127   :  { %4619 = vmatmul.mubr.msk.bf16.vlgmr.msra.gmra.mrb[0].mxu0 %vm1421_vm0, %v173_v25  ;;  %4627 = vmatmul.mubr.msk.bf16.vlgmr.msra.gmra.mrb[0].mxu1 %vm1421_vm0, %v173_v25  ;;  %v5678_v25 = vld [vmem:[#allocation2 + $0x168] ss:$16 sps:$4 sm:$0xff]  }
 0x128   :  { %1827 = vmatprep.mubr.bf16.mxu0 %v5951_v22  ;;  %2279 = vmatprep.mubr.bf16.mxu1 %v5951_v22 }
 0x129   :  { %3237 = vmatpush1.bf16.msra.mxu0 %v5609_v26  ;;  %3463 = vmatpush1.bf16.msra.mxu1 %v5612_v27  ;;  %v5683_v26 = vld [vmem:[#allocation2 + $0x184] ss:$16 sps:$4 sm:$0xff]   ;;  %v5686_v27 = vld [vmem:[#allocation2 + $0x18c] ss:$16 sps:$4 sm:$0xff]  }
 0x12a   :  { %3238 = vmatprep.subr.bf16.mxu0 %v5617_v28  ;;  %3464 = vmatprep.subr.bf16.mxu1 %v5620_v29  ;;  %v215_v28 = vpack.c.bf16 %v152_v23, %v145_v21  ;;  %v5681_v29 = vld [vmem:[#allocation2 + $0x180] ss:$16 sps:$4 sm:$0xff]  }
 0x12d   :  { %3239 = vmatpush1.bf16.msra.mxu0 %v5615_v32  ;;  %3465 = vmatpush1.bf16.msra.mxu1 %v5618_v33  ;;  %v5692_v32 = vld [vmem:[#allocation2 + $0x1ac] ss:$16 sps:$4 sm:$0xff]   ;;  %v159_v33 = vld [vmem:[%s7405_s0 + $0x340] sm:$0xff] }
 0x12e   :  { %3240 = vmatprep.subr.bf16.mxu0 %v5623_v34  ;;  %3466 = vmatprep.subr.bf16.mxu1 %v5626_v35  ;;  %v166_v34 = vld [vmem:[%s7405_s0 + $0x378] sm:$0xff]  ;;  %v5687_v35 = vld [vmem:[#allocation2 + $0x1a0] ss:$16 sps:$4 sm:$0xff]  }
 0x12f   :  { %4620 = vmatmul.mubr.msk.bf16.gmra.mrb[4].mxu0 %vm1421_vm0, %v180_v36  ;;  %4628 = vmatmul.mubr.msk.bf16.gmra.mrb[4].mxu1 %vm1421_vm0, %v180_v36  ;;  %v5690_v36 = vld [vmem:[#allocation2 + $0x1a8] ss:$16 sps:$4 sm:$0xff]  }
 0x130   :  { %1837 = vmatprep.mubr.bf16.mxu0 %v5951_v22  ;;  %2289 = vmatprep.mubr.bf16.mxu1 %v5951_v22 }
 0x131   :  { %3241 = vmatpush1.bf16.msra.mxu0 %v5621_v37  ;;  %3467 = vmatpush1.bf16.msra.mxu1 %v5624_v38  ;;  %v222_v37 = vpack.c.bf16 %v166_v34, %v159_v33  ;;  %v5698_v38 = vld [vmem:[#allocation2 + $0x1cc] ss:$16 sps:$4 sm:$0xff]  }
 0x132   :  { %3242 = vmatprep.subr.bf16.mxu0 %v5629_v39  ;;  %3468 = vmatprep.subr.bf16.mxu1 %v5632_v40  ;;  %v5693_v39 = vld [vmem:[#allocation2 + $0x1c0] ss:$16 sps:$4 sm:$0xff]   ;;  %v5696_v40 = vld [vmem:[#allocation2 + $0x1c8] ss:$16 sps:$4 sm:$0xff]  }
 0x135   :  { %3243 = vmatpush1.bf16.msra.mxu0 %v5627_v43  ;;  %3469 = vmatpush1.bf16.msra.mxu1 %v5630_v44  ;;  %v5699_v43 = vld [vmem:[#allocation2 + $0x1e0] ss:$16 sps:$4 sm:$0xff]   ;;  %v5702_v44 = vld [vmem:[#allocation2 + $0x1e8] ss:$16 sps:$4 sm:$0xff]  }
 0x136   :  { %3244 = vmatprep.subr.bf16.mxu0 %v5635_v45  ;;  %3470 = vmatprep.subr.bf16.mxu1 %v5638_v46  ;;  %v5707_v45 = vld [vmem:[#allocation2 + $0x204] ss:$16 sps:$4 sm:$0xff]   ;;  %v5710_v46 = vld [vmem:[#allocation2 + $0x20c] ss:$16 sps:$4 sm:$0xff]  }
 0x137   :  { %4621 = vmatmul.mubr.msk.bf16.gmra.mrb[8].mxu0 %vm1421_vm0, %v187_v47  ;;  %4629 = vmatmul.mubr.msk.bf16.gmra.mrb[8].mxu1 %vm1421_vm0, %v187_v47  ;;  %v421_v47 = vlaneseq }
 0x138   :  { %1847 = vmatprep.mubr.bf16.mxu0 %v5951_v22  ;;  %2299 = vmatprep.mubr.bf16.mxu1 %v5951_v22 }
 0x139   :  { %3245 = vmatpush1.bf16.msra.mxu0 %v5633_v48  ;;  %3471 = vmatpush1.bf16.msra.mxu1 %v5636_v49  ;;  %v6972_v48 = vshrl.u32 %v421_v47, 7 }
 0x13a   :  { %3246 = vmatprep.subr.bf16.mxu0 %v5641_v50  ;;  %3472 = vmatprep.subr.bf16.mxu1 %v5644_v51  ;;  %v419_v51 = vld [vmem:[%s7407_s2] sm:$0xf] }
 0x13b   :  { %v423_v49 = vsub.s32 0, %v6972_v48  ;;  %v431_v50 = vsub.s32 2, %v6972_v48  ;;  %v427_v52 = vsub.s32 1, %v6972_v48  ;;  %v435_v53 = vsub.s32 3, %v6972_v48 }
 0x13d   :  { %3247 = vmatpush1.bf16.msra.mxu0 %v5639_v54  ;;  %3473 = vmatpush1.bf16.msra.mxu1 %v5642_v55  ;;  %v6983_v54 = vrot.slane %v419_v51, %v423_v49  ;;  %v6987_v55 = vrot.slane %v419_v51, %v431_v50 }
 0x13e   :  { %3248 = vmatprep.subr.bf16.mxu0 %v5647_v56  ;;  %3474 = vmatprep.subr.bf16.mxu1 %v5650_v57  ;;  %v6991_v56 = vrot.slane %v419_v51, %v427_v52  ;;  %v6995_v57 = vrot.slane %v419_v51, %v435_v53 }
 0x13f   :  { %4622 = vmatmul.mubr.msk.bf16.gmra.mrb[12].mxu0 %vm1421_vm0, %v194_v58  ;;  %4630 = vmatmul.mubr.msk.bf16.gmra.mrb[12].mxu1 %vm1421_vm0, %v194_v58 }
 0x140   :  { %1857 = vmatprep.mubr.bf16.mxu0 %v5951_v22  ;;  %2309 = vmatprep.mubr.bf16.mxu1 %v5951_v22 }
 0x141   :  { %3249 = vmatpush1.bf16.msra.mxu0 %v5645_v59  ;;  %3475 = vmatpush1.bf16.msra.mxu1 %v5648_v60 }
 0x142   :  { %3250 = vmatprep.subr.bf16.mxu0 %v5653_v61  ;;  %3476 = vmatprep.subr.bf16.mxu1 %v5656_v62 }
 0x145   :  { %3251 = vmatpush1.bf16.msra.mxu0 %v5651_v1  ;;  %3477 = vmatpush1.bf16.msra.mxu1 %v5654_v2 }
 0x146   :  { %3252 = vmatprep.subr.bf16.mxu0 %v5659_v3  ;;  %3478 = vmatprep.subr.bf16.mxu1 %v5662_v4 }
 0x147   :  { %4623 = vmatmul.mubr.msk.bf16.gmra.mrb[16].mxu0 %vm1421_vm0, %v201_v5  ;;  %4631 = vmatmul.mubr.msk.bf16.gmra.mrb[16].mxu1 %vm1421_vm0, %v201_v5 }
 0x148   :  { %1867 = vmatprep.mubr.bf16.mxu0 %v5951_v22  ;;  %2319 = vmatprep.mubr.bf16.mxu1 %v5951_v22 }
 0x149   :  { %3253 = vmatpush1.bf16.msra.mxu0 %v5657_v6  ;;  %3479 = vmatpush1.bf16.msra.mxu1 %v5660_v7 }
 0x14a   :  { %3254 = vmatprep.subr.bf16.mxu0 %v5665_v8  ;;  %3480 = vmatprep.subr.bf16.mxu1 %v5668_v9 }
 0x14d   :  { %3255 = vmatpush1.bf16.msra.mxu0 %v5663_v12  ;;  %3481 = vmatpush1.bf16.msra.mxu1 %v5666_v13 }
 0x14e   :  { %3256 = vmatprep.subr.bf16.mxu0 %v5671_v14  ;;  %3482 = vmatprep.subr.bf16.mxu1 %v5674_v15 }
 0x14f   :  { %4624 = vmatmul.mubr.msk.bf16.gmra.mrb[20].mxu0 %vm1421_vm0, %v208_v16  ;;  %4632 = vmatmul.mubr.msk.bf16.gmra.mrb[20].mxu1 %vm1421_vm0, %v208_v16 }
 0x150   :  { %1877 = vmatprep.mubr.bf16.mxu0 %v5951_v22  ;;  %2329 = vmatprep.mubr.bf16.mxu1 %v5951_v22 }
 0x151   :  { %3257 = vmatpush1.bf16.msra.mxu0 %v5669_v17  ;;  %3483 = vmatpush1.bf16.msra.mxu1 %v5672_v18 }
 0x152   :  { %3258 = vmatprep.subr.bf16.mxu0 %v5677_v19  ;;  %3484 = vmatprep.subr.bf16.mxu1 %v5680_v20 }
 0x155   :  { %3259 = vmatpush1.bf16.msra.mxu0 %v5675_v24  ;;  %3485 = vmatpush1.bf16.msra.mxu1 %v5678_v25  ;;  %v5705_v25 = vld [vmem:[#allocation2 + $0x200] ss:$16 sps:$4 sm:$0xff]  }
 0x156   :  { %3260 = vmatprep.subr.bf16.mxu0 %v5683_v26  ;;  %3486 = vmatprep.subr.bf16.mxu1 %v5686_v27  ;;  %v5708_v26 = vld [vmem:[#allocation2 + $0x208] ss:$16 sps:$4 sm:$0xff]  }
 0x157   :  { %4625 = vmatmul.mubr.msk.bf16.gmra.mrb[24].mxu0 %vm1421_vm0, %v215_v28  ;;  %4633 = vmatmul.mubr.msk.bf16.gmra.mrb[24].mxu1 %vm1421_vm0, %v215_v28 }
 0x158   :  { %1887 = vmatprep.mubr.bf16.mxu0 %v5951_v22  ;;  %2339 = vmatprep.mubr.bf16.mxu1 %v5951_v22  ;;  %v5695_v22 = vld [vmem:[#allocation2 + $0x1c4] ss:$16 sps:$4 sm:$0xff]  }
 0x159   :  { %3261 = vmatpush1.bf16.msra.mxu0 %v5681_v29  ;;  %3487 = vmatpush1.bf16.msra.mxu1 %v5684_v30 }
 0x15a   :  { %3262 = vmatprep.subr.bf16.mxu0 %v5689_v31  ;;  %3488 = vmatprep.subr.bf16.mxu1 %v5692_v32  ;;  %v5713_v31 = vld [vmem:[#allocation2 + $0x224] ss:$16 sps:$4 sm:$0xff]   ;;  %v5716_v32 = vld [vmem:[#allocation2 + $0x22c] ss:$16 sps:$4 sm:$0xff]  }
 0x15d   :  { %3263 = vmatpush1.bf16.msra.mxu0 %v5687_v35  ;;  %3489 = vmatpush1.bf16.msra.mxu1 %v5690_v36 }
 0x15e   :  { %3264 = vmatprep.subr.bf16.mxu0 %v5695_v22  ;;  %3490 = vmatprep.subr.bf16.mxu1 %v5698_v38 }
 0x15f   :  { %4626 = vmatmul.mubr.msk.bf16.gmra.mrb[28].mxu0 %vm1421_vm0, %v222_v37  ;;  %4634 = vmatmul.mubr.msk.bf16.gmra.mrb[28].mxu1 %vm1421_vm0, %v222_v37 }
 0x161   :  { %3265 = vmatpush1.bf16.msra.mxu0 %v5693_v39  ;;  %3491 = vmatpush1.bf16.msra.mxu1 %v5696_v40 }
 0x162   :  { %3266 = vmatprep.subr.bf16.mxu0 %v5701_v41  ;;  %3492 = vmatprep.subr.bf16.mxu1 %v5704_v42  ;;  %v5711_v42 = vld [vmem:[#allocation2 + $0x220] ss:$16 sps:$4 sm:$0xff]  }
 0x165   :  { %3267 = vmatpush1.bf16.msra.mxu0 %v5699_v43  ;;  %3493 = vmatpush1.bf16.msra.mxu1 %v5702_v44  ;;  %v5714_v43 = vld [vmem:[#allocation2 + $0x228] ss:$16 sps:$4 sm:$0xff]   ;;  %v5719_v44 = vld [vmem:[#allocation2 + $0x244] ss:$16 sps:$4 sm:$0xff]  }
 0x166   :  { %3349 = vmatprep.subr.bf16.mxu0 %v5707_v45  ;;  %3575 = vmatprep.subr.bf16.mxu1 %v5710_v46 }
 0x1fa   :  { %v1819_v58 = vpop.f32.mrb[0].mxu0  ;;  %v2271_v59 = vpop.f32.mrb[0].mxu1 }
 0x1fb   :  { %v4924_v60 = vadd.f32 %v1819_v58, %v6983_v54  ;;  %v4956_v61 = vadd.f32 %v2271_v59, %v6987_v55  ;;  %v1821_v62 = vpop.f32.mrb[1].mxu0  ;;  %v2273_v63 = vpop.f32.mrb[1].mxu1  ;;  %v5722_v58 = vld [vmem:[#allocation2 + $0x24c] ss:$16 sps:$4 sm:$0xff]  }
 0x1fc   :  { %v4925_v0 = vadd.f32 %v1821_v62, %v6991_v56  ;;  %v4957_v1 = vadd.f32 %v2273_v63, %v6995_v57  ;;  %v1823_v2 = vpop.f32.mrb[2].mxu0  ;;  %v2275_v3 = vpop.f32.mrb[2].mxu1 }
 0x1fd   :  { %v4926_v4 = vadd.f32 %v1823_v2, %v6983_v54  ;;  %v4958_v5 = vadd.f32 %v2275_v3, %v6987_v55  ;;  %v1825_v6 = vpop.f32.mrb[3].mxu0  ;;  %v2277_v7 = vpop.f32.mrb[3].mxu1  ;;  %v2350_v10 = vmax.f32 %v4924_v60, 0.0  ;;  %v2352_v11 = vmax.f32 %v4956_v61, 0.0 }
 0x1fe   :  { %v4927_v8 = vadd.f32 %v1825_v6, %v6991_v56  ;;  %v4959_v9 = vadd.f32 %v2277_v7, %v6995_v57  ;;  %v2351_v14 = vmax.f32 %v4925_v0, 0.0  ;;  %v2353_v15 = vmax.f32 %v4957_v1, 0.0  ;;  %v5720_v6 = vld [vmem:[#allocation2 + $0x248] ss:$16 sps:$4 sm:$0xff]  }
 0x1ff   :  { %v2354_v12 = vmax.f32 %v4926_v4, 0.0  ;;  %v2356_v13 = vmax.f32 %v4958_v5, 0.0  ;;  %v5717_v5 = vld [vmem:[#allocation2 + $0x240] ss:$16 sps:$4 sm:$0xff]  }
 0x200   :  { %v2355_v16 = vmax.f32 %v4927_v8, 0.0  ;;  %v2357_v17 = vmax.f32 %v4959_v9, 0.0 }
 0x201   :  { %v2414_v18 = vpack.c.bf16 %v2354_v12, %v2350_v10  ;;  %v7005_v19 = vpack.c.bf16 %v2356_v13, %v2352_v11  ;;  %v5725_v11 = vld [vmem:[#allocation2 + $0x264] ss:$16 sps:$4 sm:$0xff]   ;;  %v5728_v12 = vld [vmem:[#allocation2 + $0x26c] ss:$16 sps:$4 sm:$0xff]  }
 0x202   :  { %v2415_v20 = vpack.c.bf16 %v2355_v16, %v2351_v14  ;;  %v7007_v21 = vpack.c.bf16 %v2357_v17, %v2353_v15  ;;  %v1829_v23 = vpop.f32.mrb[4].mxu0  ;;  %v2281_v24 = vpop.f32.mrb[4].mxu1 }
 0x203   :  { %v4928_v27 = vadd.f32 %v1829_v23, %v6983_v54  ;;  %v4960_v28 = vadd.f32 %v2281_v24, %v6987_v55  ;;  %v1831_v29 = vpop.f32.mrb[5].mxu0  ;;  %v2283_v30 = vpop.f32.mrb[5].mxu1 }
 0x204   :  { %v4929_v33 = vadd.f32 %v1831_v29, %v6991_v56  ;;  %v4961_v34 = vadd.f32 %v2283_v30, %v6995_v57  ;;  %v1833_v35 = vpop.f32.mrb[6].mxu0  ;;  %v2285_v36 = vpop.f32.mrb[6].mxu1  ;;  %3268 = vmatprep.mubr.bf16.mxu0 %v2415_v20  ;;  %3494 = vmatprep.mubr.bf16.mxu1 %v2415_v20 }
 0x205   :  { %v4930_v37 = vadd.f32 %v1833_v35, %v6983_v54  ;;  %v4962_v22 = vadd.f32 %v2285_v36, %v6987_v55  ;;  %v1835_v38 = vpop.f32.mrb[7].mxu0  ;;  %v2287_v39 = vpop.f32.mrb[7].mxu1  ;;  %3269 = vmatmul.mubr.bf16.vlgmr.msra.gmra.mrb[32].mxu0 %v2414_v18  ;;  %3495 = vmatmul.mubr.bf16.vlgmr.msra.gmra.mrb[32].mxu1 %v2414_v18  ;;  %v2358_v45 = vmax.f32 %v4928_v27, 0.0  ;;  %v2360_v46 = vmax.f32 %v4960_v28, 0.0  ;;  %v5726_v27 = vld [vmem:[#allocation2 + $0x268] ss:$16 sps:$4 sm:$0xff]  }
 0x206   :  { %v4931_v40 = vadd.f32 %v1835_v38, %v6991_v56  ;;  %v4963_v41 = vadd.f32 %v2287_v39, %v6995_v57  ;;  %3350 = vmatpush1.bf16.msra.mxu0 %v5705_v25  ;;  %3576 = vmatpush1.bf16.msra.mxu1 %v5708_v26  ;;  %v2359_v59 = vmax.f32 %v4929_v33, 0.0  ;;  %v2361_v60 = vmax.f32 %v4961_v34, 0.0  ;;  %v5723_v26 = vld [vmem:[#allocation2 + $0x260] ss:$16 sps:$4 sm:$0xff]   ;;  %v5731_v28 = vld [vmem:[#allocation2 + $0x284] ss:$16 sps:$4 sm:$0xff]  }
 0x207   :  { %v2362_v47 = vmax.f32 %v4930_v37, 0.0  ;;  %v2364_v51 = vmax.f32 %v4962_v22, 0.0  ;;  %3351 = vmatprep.subr.bf16.mxu0 %v5713_v31  ;;  %3577 = vmatprep.subr.bf16.mxu1 %v5716_v32  ;;  %v5734_v33 = vld [vmem:[#allocation2 + $0x28c] ss:$16 sps:$4 sm:$0xff]  }
 0x208   :  { %v2363_v61 = vmax.f32 %v4931_v40, 0.0  ;;  %v2365_v62 = vmax.f32 %v4963_v41, 0.0 }
 0x209   :  { %v2418_v63 = vpack.c.bf16 %v2362_v47, %v2358_v45  ;;  %v7017_v0 = vpack.c.bf16 %v2364_v51, %v2360_v46 }
 0x20a   :  { %v2419_v1 = vpack.c.bf16 %v2363_v61, %v2359_v59  ;;  %v7019_v2 = vpack.c.bf16 %v2365_v62, %v2361_v60  ;;  %v1839_v3 = vpop.f32.mrb[8].mxu0  ;;  %v2291_v4 = vpop.f32.mrb[8].mxu1  ;;  %3352 = vmatpush1.bf16.msra.mxu0 %v5711_v42  ;;  %3578 = vmatpush1.bf16.msra.mxu1 %v5714_v43  ;;  %v5729_v43 = vld [vmem:[#allocation2 + $0x280] ss:$16 sps:$4 sm:$0xff]   ;;  %v5740_v59 = vld [vmem:[#allocation2 + $0x2ac] ss:$16 sps:$4 sm:$0xff]  }
 0x20b   :  { %v4932_v7 = vadd.f32 %v1839_v3, %v6983_v54  ;;  %v4964_v8 = vadd.f32 %v2291_v4, %v6987_v55  ;;  %v1841_v9 = vpop.f32.mrb[9].mxu0  ;;  %v2293_v10 = vpop.f32.mrb[9].mxu1  ;;  %3353 = vmatprep.subr.bf16.mxu0 %v5719_v44  ;;  %3579 = vmatprep.subr.bf16.mxu1 %v5722_v58  ;;  %v5732_v44 = vld [vmem:[#allocation2 + $0x288] ss:$16 sps:$4 sm:$0xff]   ;;  %v5737_v58 = vld [vmem:[#allocation2 + $0x2a4] ss:$16 sps:$4 sm:$0xff]  }
 0x20c   :  { %v4933_v13 = vadd.f32 %v1841_v9, %v6991_v56  ;;  %v4965_v14 = vadd.f32 %v2293_v10, %v6995_v57  ;;  %v1843_v15 = vpop.f32.mrb[10].mxu0  ;;  %v2295_v16 = vpop.f32.mrb[10].mxu1  ;;  %3278 = vmatprep.mubr.bf16.mxu0 %v2419_v1  ;;  %3504 = vmatprep.mubr.bf16.mxu1 %v2419_v1  ;;  %v5738_v9 = vld [vmem:[#allocation2 + $0x2a8] ss:$16 sps:$4 sm:$0xff]   ;;  %v5743_v10 = vld [vmem:[#allocation2 + $0x2c4] ss:$16 sps:$4 sm:$0xff]  }
 0x20d   :  { %v4934_v17 = vadd.f32 %v1843_v15, %v6983_v54  ;;  %v4966_v18 = vadd.f32 %v2295_v16, %v6987_v55  ;;  %v1845_v20 = vpop.f32.mrb[11].mxu0  ;;  %v2297_v23 = vpop.f32.mrb[11].mxu1  ;;  %3279 = vmatmul.mubr.bf16.gmra.mrb[36].mxu0 %v2418_v63  ;;  %3505 = vmatmul.mubr.bf16.gmra.mrb[36].mxu1 %v2418_v63  ;;  %v2366_v29 = vmax.f32 %v4932_v7, 0.0  ;;  %v2368_v30 = vmax.f32 %v4964_v8, 0.0  ;;  %v5735_v8 = vld [vmem:[#allocation2 + $0x2a0] ss:$16 sps:$4 sm:$0xff]  }
 0x20e   :  { %v4935_v24 = vadd.f32 %v1845_v20, %v6991_v56  ;;  %v4967_v25 = vadd.f32 %v2297_v23, %v6995_v57  ;;  %3354 = vmatpush1.bf16.msra.mxu0 %v5717_v5  ;;  %3580 = vmatpush1.bf16.msra.mxu1 %v5720_v6  ;;  %v2367_v34 = vmax.f32 %v4933_v13, 0.0  ;;  %v2369_v35 = vmax.f32 %v4965_v14, 0.0  ;;  %v5746_v15 = vld [vmem:[#allocation2 + $0x2cc] ss:$16 sps:$4 sm:$0xff]  }
 0x20f   :  { %v2370_v31 = vmax.f32 %v4934_v17, 0.0  ;;  %v2372_v32 = vmax.f32 %v4966_v18, 0.0  ;;  %3355 = vmatprep.subr.bf16.mxu0 %v5725_v11  ;;  %3581 = vmatprep.subr.bf16.mxu1 %v5728_v12 }
 0x210   :  { %v2371_v36 = vmax.f32 %v4935_v24, 0.0  ;;  %v2373_v37 = vmax.f32 %v4967_v25, 0.0 }
 0x211   :  { %v2422_v22 = vpack.c.bf16 %v2370_v31, %v2366_v29  ;;  %v7029_v38 = vpack.c.bf16 %v2372_v32, %v2368_v30  ;;  %v5741_v29 = vld [vmem:[#allocation2 + $0x2c0] ss:$16 sps:$4 sm:$0xff]   ;;  %v5744_v30 = vld [vmem:[#allocation2 + $0x2c8] ss:$16 sps:$4 sm:$0xff]  }
 0x212   :  { %v2423_v39 = vpack.c.bf16 %v2371_v36, %v2367_v34  ;;  %v7031_v40 = vpack.c.bf16 %v2373_v37, %v2369_v35  ;;  %v1849_v41 = vpop.f32.mrb[12].mxu0  ;;  %v2301_v42 = vpop.f32.mrb[12].mxu1  ;;  %3356 = vmatpush1.bf16.msra.mxu0 %v5723_v26  ;;  %3582 = vmatpush1.bf16.msra.mxu1 %v5726_v27  ;;  %v5749_v35 = vld [vmem:[#allocation2 + $0x2e4] ss:$16 sps:$4 sm:$0xff]   ;;  %v5752_v36 = vld [vmem:[#allocation2 + $0x2ec] ss:$16 sps:$4 sm:$0xff]  }
 0x213   :  { %v4936_v45 = vadd.f32 %v1849_v41, %v6983_v54  ;;  %v4968_v46 = vadd.f32 %v2301_v42, %v6987_v55  ;;  %v1851_v47 = vpop.f32.mrb[13].mxu0  ;;  %v2303_v51 = vpop.f32.mrb[13].mxu1  ;;  %3357 = vmatprep.subr.bf16.mxu0 %v5731_v28  ;;  %3583 = vmatprep.subr.bf16.mxu1 %v5734_v33 }
 0x214   :  { %v4937_v60 = vadd.f32 %v1851_v47, %v6991_v56  ;;  %v4969_v61 = vadd.f32 %v2303_v51, %v6995_v57  ;;  %v1853_v62 = vpop.f32.mrb[14].mxu0  ;;  %v2305_v63 = vpop.f32.mrb[14].mxu1  ;;  %3288 = vmatprep.mubr.bf16.mxu0 %v2423_v39  ;;  %3514 = vmatprep.mubr.bf16.mxu1 %v2423_v39  ;;  %v5747_v51 = vld [vmem:[#allocation2 + $0x2e0] ss:$16 sps:$4 sm:$0xff]  }
 0x215   :  { %v4938_v1 = vadd.f32 %v1853_v62, %v6983_v54  ;;  %v4970_v3 = vadd.f32 %v2305_v63, %v6987_v55  ;;  %v1855_v4 = vpop.f32.mrb[15].mxu0  ;;  %v2307_v5 = vpop.f32.mrb[15].mxu1  ;;  %3289 = vmatmul.mubr.bf16.gmra.mrb[40].mxu0 %v2422_v22  ;;  %3515 = vmatmul.mubr.bf16.gmra.mrb[40].mxu1 %v2422_v22  ;;  %v2374_v11 = vmax.f32 %v4936_v45, 0.0  ;;  %v2376_v12 = vmax.f32 %v4968_v46, 0.0 }
 0x216   :  { %v4939_v6 = vadd.f32 %v1855_v4, %v6991_v56  ;;  %v4971_v7 = vadd.f32 %v2307_v5, %v6995_v57  ;;  %3358 = vmatpush1.bf16.msra.mxu0 %v5729_v43  ;;  %3584 = vmatpush1.bf16.msra.mxu1 %v5732_v44  ;;  %v2375_v16 = vmax.f32 %v4937_v60, 0.0  ;;  %v2377_v17 = vmax.f32 %v4969_v61, 0.0 }
 0x217   :  { %v2378_v13 = vmax.f32 %v4938_v1, 0.0  ;;  %v2380_v14 = vmax.f32 %v4970_v3, 0.0  ;;  %3359 = vmatprep.subr.bf16.mxu0 %v5737_v58  ;;  %3585 = vmatprep.subr.bf16.mxu1 %v5740_v59  ;;  %v5750_v58 = vld [vmem:[#allocation2 + $0x2e8] ss:$16 sps:$4 sm:$0xff]   ;;  %v5755_v59 = vld [vmem:[#allocation2 + $0x304] ss:$16 sps:$4 sm:$0xff]  }
 0x218   :  { %v2379_v18 = vmax.f32 %v4939_v6, 0.0  ;;  %v2381_v20 = vmax.f32 %v4971_v7, 0.0  ;;  %v5758_v1 = vld [vmem:[#allocation2 + $0x30c] ss:$16 sps:$4 sm:$0xff]  }
 0x219   :  { %v2426_v23 = vpack.c.bf16 %v2378_v13, %v2374_v11  ;;  %v7041_v24 = vpack.c.bf16 %v2380_v14, %v2376_v12  ;;  %v5753_v13 = vld [vmem:[#allocation2 + $0x300] ss:$16 sps:$4 sm:$0xff]   ;;  %v5756_v14 = vld [vmem:[#allocation2 + $0x308] ss:$16 sps:$4 sm:$0xff]  }
 0x21a   :  { %v2427_v25 = vpack.c.bf16 %v2379_v18, %v2375_v16  ;;  %v7043_v26 = vpack.c.bf16 %v2381_v20, %v2377_v17  ;;  %v1859_v27 = vpop.f32.mrb[16].mxu0  ;;  %v2311_v28 = vpop.f32.mrb[16].mxu1  ;;  %3360 = vmatpush1.bf16.msra.mxu0 %v5735_v8  ;;  %3586 = vmatpush1.bf16.msra.mxu1 %v5738_v9  ;;  %v5761_v20 = vld [vmem:[#allocation2 + $0x324] ss:$16 sps:$4 sm:$0xff]  }
 0x21b   :  { %v4940_v31 = vadd.f32 %v1859_v27, %v6983_v54  ;;  %v4972_v32 = vadd.f32 %v2311_v28, %v6987_v55  ;;  %v1861_v33 = vpop.f32.mrb[17].mxu0  ;;  %v2313_v34 = vpop.f32.mrb[17].mxu1  ;;  %3361 = vmatprep.subr.bf16.mxu0 %v5743_v10  ;;  %3587 = vmatprep.subr.bf16.mxu1 %v5746_v15 }
 0x21c   :  { %v4941_v37 = vadd.f32 %v1861_v33, %v6991_v56  ;;  %v4973_v22 = vadd.f32 %v2313_v34, %v6995_v57  ;;  %v1863_v39 = vpop.f32.mrb[18].mxu0  ;;  %v2315_v41 = vpop.f32.mrb[18].mxu1  ;;  %3298 = vmatprep.mubr.bf16.mxu0 %v2427_v25  ;;  %3524 = vmatprep.mubr.bf16.mxu1 %v2427_v25 }
 0x21d   :  { %v4942_v42 = vadd.f32 %v1863_v39, %v6983_v54  ;;  %v4974_v43 = vadd.f32 %v2315_v41, %v6987_v55  ;;  %v1865_v44 = vpop.f32.mrb[19].mxu0  ;;  %v2317_v45 = vpop.f32.mrb[19].mxu1  ;;  %3299 = vmatmul.mubr.bf16.gmra.mrb[44].mxu0 %v2426_v23  ;;  %3525 = vmatmul.mubr.bf16.gmra.mrb[44].mxu1 %v2426_v23  ;;  %v2382_v60 = vmax.f32 %v4940_v31, 0.0  ;;  %v2384_v61 = vmax.f32 %v4972_v32, 0.0  ;;  %v5764_v23 = vld [vmem:[#allocation2 + $0x32c] ss:$16 sps:$4 sm:$0xff]  }
 0x21e   :  { %v4943_v46 = vadd.f32 %v1865_v44, %v6991_v56  ;;  %v4975_v47 = vadd.f32 %v2317_v45, %v6995_v57  ;;  %3362 = vmatpush1.bf16.msra.mxu0 %v5741_v29  ;;  %3588 = vmatpush1.bf16.msra.mxu1 %v5744_v30  ;;  %v2383_v3 = vmax.f32 %v4941_v37, 0.0  ;;  %v2385_v4 = vmax.f32 %v4973_v22, 0.0  ;;  %v5762_v37 = vld [vmem:[#allocation2 + $0x328] ss:$16 sps:$4 sm:$0xff]   ;;  %v5767_v22 = vld [vmem:[#allocation2 + $0x344] ss:$16 sps:$4 sm:$0xff]  }
 0x21f   :  { %v2386_v62 = vmax.f32 %v4942_v42, 0.0  ;;  %v2388_v63 = vmax.f32 %v4974_v43, 0.0  ;;  %3363 = vmatprep.subr.bf16.mxu0 %v5749_v35  ;;  %3589 = vmatprep.subr.bf16.mxu1 %v5752_v36  ;;  %v5759_v36 = vld [vmem:[#allocation2 + $0x320] ss:$16 sps:$4 sm:$0xff]   ;;  %v5770_v44 = vld [vmem:[#allocation2 + $0x34c] ss:$16 sps:$4 sm:$0xff]  }
 0x220   :  { %v2387_v5 = vmax.f32 %v4943_v46, 0.0  ;;  %v2389_v6 = vmax.f32 %v4975_v47, 0.0 }
 0x221   :  { %v2430_v7 = vpack.c.bf16 %v2386_v62, %v2382_v60  ;;  %v7053_v8 = vpack.c.bf16 %v2388_v63, %v2384_v61 }
 0x222   :  { %v2431_v9 = vpack.c.bf16 %v2387_v5, %v2383_v3  ;;  %v7055_v10 = vpack.c.bf16 %v2389_v6, %v2385_v4  ;;  %v1869_v11 = vpop.f32.mrb[20].mxu0  ;;  %v2321_v12 = vpop.f32.mrb[20].mxu1  ;;  %3364 = vmatpush1.bf16.msra.mxu0 %v5747_v51  ;;  %3590 = vmatpush1.bf16.msra.mxu1 %v5750_v58  ;;  %v5768_v3 = vld [vmem:[#allocation2 + $0x348] ss:$16 sps:$4 sm:$0xff]  }
 0x223   :  { %v4944_v15 = vadd.f32 %v1869_v11, %v6983_v54  ;;  %v4976_v16 = vadd.f32 %v2321_v12, %v6987_v55  ;;  %v1871_v17 = vpop.f32.mrb[21].mxu0  ;;  %v2323_v18 = vpop.f32.mrb[21].mxu1  ;;  %3365 = vmatprep.subr.bf16.mxu0 %v5755_v59  ;;  %3591 = vmatprep.subr.bf16.mxu1 %v5758_v1  ;;  %v5765_v1 = vld [vmem:[#allocation2 + $0x340] ss:$16 sps:$4 sm:$0xff]   ;;  %v5776_v11 = vld [vmem:[#allocation2 + $0x36c] ss:$16 sps:$4 sm:$0xff]  }
 0x224   :  { %v4945_v25 = vadd.f32 %v1871_v17, %v6991_v56  ;;  %v4977_v27 = vadd.f32 %v2323_v18, %v6995_v57  ;;  %v1873_v28 = vpop.f32.mrb[22].mxu0  ;;  %v2325_v29 = vpop.f32.mrb[22].mxu1  ;;  %3308 = vmatprep.mubr.bf16.mxu0 %v2431_v9  ;;  %3534 = vmatprep.mubr.bf16.mxu1 %v2431_v9  ;;  %v5773_v9 = vld [vmem:[#allocation2 + $0x364] ss:$16 sps:$4 sm:$0xff]  }
 0x225   :  { %v4946_v30 = vadd.f32 %v1873_v28, %v6983_v54  ;;  %v4978_v31 = vadd.f32 %v2325_v29, %v6987_v55  ;;  %v1875_v32 = vpop.f32.mrb[23].mxu0  ;;  %v2327_v33 = vpop.f32.mrb[23].mxu1  ;;  %3309 = vmatmul.mubr.bf16.gmra.mrb[48].mxu0 %v2430_v7  ;;  %3535 = vmatmul.mubr.bf16.gmra.mrb[48].mxu1 %v2430_v7  ;;  %v2390_v39 = vmax.f32 %v4944_v15, 0.0  ;;  %v2392_v41 = vmax.f32 %v4976_v16, 0.0  ;;  %v5774_v28 = vld [vmem:[#allocation2 + $0x368] ss:$16 sps:$4 sm:$0xff]  }
 0x226   :  { %v4947_v34 = vadd.f32 %v1875_v32, %v6991_v56  ;;  %v4979_v35 = vadd.f32 %v2327_v33, %v6995_v57  ;;  %3366 = vmatpush1.bf16.msra.mxu0 %v5753_v13  ;;  %3592 = vmatpush1.bf16.msra.mxu1 %v5756_v14  ;;  %v2391_v45 = vmax.f32 %v4945_v25, 0.0  ;;  %v2393_v46 = vmax.f32 %v4977_v27, 0.0  ;;  %v5771_v27 = vld [vmem:[#allocation2 + $0x360] ss:$16 sps:$4 sm:$0xff]   ;;  %v5779_v29 = vld [vmem:[#allocation2 + $0x384] ss:$16 sps:$4 sm:$0xff]  }
 0x227   :  { %v2394_v42 = vmax.f32 %v4946_v30, 0.0  ;;  %v2396_v43 = vmax.f32 %v4978_v31, 0.0  ;;  %3367 = vmatprep.subr.bf16.mxu0 %v5761_v20  ;;  %3593 = vmatprep.subr.bf16.mxu1 %v5764_v23 }
 0x228   :  { %v2395_v47 = vmax.f32 %v4947_v34, 0.0  ;;  %v2397_v51 = vmax.f32 %v4979_v35, 0.0  ;;  %v5782_v34 = vld [vmem:[#allocation2 + $0x38c] ss:$16 sps:$4 sm:$0xff]  }
 0x229   :  { %v2434_v58 = vpack.c.bf16 %v2394_v42, %v2390_v39  ;;  %v7065_v59 = vpack.c.bf16 %v2396_v43, %v2392_v41 }
 0x22a   :  { %v2435_v60 = vpack.c.bf16 %v2395_v47, %v2391_v45  ;;  %v7067_v61 = vpack.c.bf16 %v2397_v51, %v2393_v46  ;;  %v1879_v62 = vpop.f32.mrb[24].mxu0  ;;  %v2331_v63 = vpop.f32.mrb[24].mxu1  ;;  %3368 = vmatpush1.bf16.msra.mxu0 %v5759_v36  ;;  %3594 = vmatpush1.bf16.msra.mxu1 %v5762_v37  ;;  %v5777_v46 = vld [vmem:[#allocation2 + $0x380] ss:$16 sps:$4 sm:$0xff]   ;;  %v5780_v47 = vld [vmem:[#allocation2 + $0x388] ss:$16 sps:$4 sm:$0xff]  }
 0x22b   :  { %v4948_v4 = vadd.f32 %v1879_v62, %v6983_v54  ;;  %v4980_v5 = vadd.f32 %v2331_v63, %v6987_v55  ;;  %v1881_v6 = vpop.f32.mrb[25].mxu0  ;;  %v2333_v7 = vpop.f32.mrb[25].mxu1  ;;  %3369 = vmatprep.subr.bf16.mxu0 %v5767_v22  ;;  %3595 = vmatprep.subr.bf16.mxu1 %v5770_v44  ;;  %v5785_v63 = vld [vmem:[#allocation2 + $0x3a4] ss:$16 sps:$4 sm:$0xff]  }
 0x22c   :  { %v4949_v12 = vadd.f32 %v1881_v6, %v6991_v56  ;;  %v4981_v13 = vadd.f32 %v2333_v7, %v6995_v57  ;;  %v1883_v14 = vpop.f32.mrb[26].mxu0  ;;  %v2335_v15 = vpop.f32.mrb[26].mxu1  ;;  %3318 = vmatprep.mubr.bf16.mxu0 %v2435_v60  ;;  %3544 = vmatprep.mubr.bf16.mxu1 %v2435_v60 }
 0x22d   :  { %v4950_v16 = vadd.f32 %v1883_v14, %v6983_v54  ;;  %v4982_v17 = vadd.f32 %v2335_v15, %v6987_v55  ;;  %v1885_v18 = vpop.f32.mrb[27].mxu0  ;;  %v2337_v20 = vpop.f32.mrb[27].mxu1  ;;  %3319 = vmatmul.mubr.bf16.gmra.mrb[52].mxu0 %v2434_v58  ;;  %3545 = vmatmul.mubr.bf16.gmra.mrb[52].mxu1 %v2434_v58  ;;  %v2398_v30 = vmax.f32 %v4948_v4, 0.0  ;;  %v2400_v31 = vmax.f32 %v4980_v5, 0.0  ;;  %v5783_v15 = vld [vmem:[#allocation2 + $0x3a0] ss:$16 sps:$4 sm:$0xff]  }
 0x22e   :  { %v4951_v23 = vadd.f32 %v1885_v18, %v6991_v56  ;;  %v4983_v25 = vadd.f32 %v2337_v20, %v6995_v57  ;;  %3370 = vmatpush1.bf16.msra.mxu0 %v5765_v1  ;;  %3596 = vmatpush1.bf16.msra.mxu1 %v5768_v3  ;;  %v2399_v35 = vmax.f32 %v4949_v12, 0.0  ;;  %v2401_v36 = vmax.f32 %v4981_v13, 0.0  ;;  %v5788_v1 = vld [vmem:[#allocation2 + $0x3ac] ss:$16 sps:$4 sm:$0xff]  }
 0x22f   :  { %v2402_v32 = vmax.f32 %v4950_v16, 0.0  ;;  %v2404_v33 = vmax.f32 %v4982_v17, 0.0  ;;  %3371 = vmatprep.subr.bf16.mxu0 %v5773_v9  ;;  %3597 = vmatprep.subr.bf16.mxu1 %v5776_v11  ;;  %v5786_v16 = vld [vmem:[#allocation2 + $0x3a8] ss:$16 sps:$4 sm:$0xff]   ;;  %v5791_v17 = vld [vmem:[#allocation2 + $0x3c4] ss:$16 sps:$4 sm:$0xff]  }
 0x230   :  { %v2403_v37 = vmax.f32 %v4951_v23, 0.0  ;;  %v2405_v22 = vmax.f32 %v4983_v25, 0.0 }
 0x231   :  { %v2438_v39 = vpack.c.bf16 %v2402_v32, %v2398_v30  ;;  %v7077_v41 = vpack.c.bf16 %v2404_v33, %v2400_v31  ;;  %v5789_v32 = vld [vmem:[#allocation2 + $0x3c0] ss:$16 sps:$4 sm:$0xff]   ;;  %v5792_v33 = vld [vmem:[#allocation2 + $0x3c8] ss:$16 sps:$4 sm:$0xff]  }
 0x232   :  { %v2439_v42 = vpack.c.bf16 %v2403_v37, %v2399_v35  ;;  %v7079_v43 = vpack.c.bf16 %v2405_v22, %v2401_v36  ;;  %v1889_v44 = vpop.f32.mrb[28].mxu0  ;;  %v2341_v45 = vpop.f32.mrb[28].mxu1  ;;  %3372 = vmatpush1.bf16.msra.mxu0 %v5771_v27  ;;  %3598 = vmatpush1.bf16.msra.mxu1 %v5774_v28  ;;  %v5800_v35 = vld [vmem:[#allocation2 + $0x3ec] ss:$16 sps:$4 sm:$0xff]   ;;  %v5795_v36 = vld [vmem:[#allocation2 + $0x3e0] ss:$16 sps:$4 sm:$0xff]  }
 0x233   :  { %v4952_v51 = vadd.f32 %v1889_v44, %v6983_v54  ;;  %v4984_v58 = vadd.f32 %v2341_v45, %v6987_v55  ;;  %v1891_v60 = vpop.f32.mrb[29].mxu0  ;;  %v2343_v62 = vpop.f32.mrb[29].mxu1  ;;  %3373 = vmatprep.subr.bf16.mxu0 %v5779_v29  ;;  %3599 = vmatprep.subr.bf16.mxu1 %v5782_v34  ;;  %v5797_v34 = vld [vmem:[#allocation2 + $0x3e4] ss:$16 sps:$4 sm:$0xff]   ;;  %v5798_v37 = vld [vmem:[#allocation2 + $0x3e8] ss:$16 sps:$4 sm:$0xff]  }
 0x234   :  { %v4953_v3 = vadd.f32 %v1891_v60, %v6991_v56  ;;  %v4985_v4 = vadd.f32 %v2343_v62, %v6995_v57  ;;  %v1893_v5 = vpop.f32.mrb[30].mxu0  ;;  %v2345_v6 = vpop.f32.mrb[30].mxu1  ;;  %3328 = vmatprep.mubr.bf16.mxu0 %v2439_v42  ;;  %3554 = vmatprep.mubr.bf16.mxu1 %v2439_v42  ;;  %v5801_v22 = vld [vmem:[#allocation4 + $0x40] sm:$0xff]   ;;  %v5805_v45 = vld [vmem:[#allocation4 + $0x48] sm:$0xff]   ;;  %v5810_v60 = vld [vmem:[#allocation4 + $0x10] sm:$0xff]  }
 0x235   :  { %v4954_v7 = vadd.f32 %v1893_v5, %v6983_v54  ;;  %v4986_v9 = vadd.f32 %v2345_v6, %v6987_v55  ;;  %v1895_v11 = vpop.f32.mrb[31].mxu0  ;;  %v2347_v12 = vpop.f32.mrb[31].mxu1  ;;  %3329 = vmatmul.mubr.bf16.gmra.mrb[56].mxu0 %v2438_v39  ;;  %3555 = vmatmul.mubr.bf16.gmra.mrb[56].mxu1 %v2438_v39  ;;  %v2406_v18 = vmax.f32 %v4952_v51, 0.0  ;;  %v2408_v20 = vmax.f32 %v4984_v58, 0.0  ;;  %v5794_v54 = vld [vmem:[#allocation2 + $0x3cc] ss:$16 sps:$4 sm:$0xff]  }
 0x236   :  { %v4955_v13 = vadd.f32 %v1895_v11, %v6991_v56  ;;  %v4987_v14 = vadd.f32 %v2347_v12, %v6995_v57  ;;  %3374 = vmatpush1.bf16.msra.mxu0 %v5777_v46  ;;  %3600 = vmatpush1.bf16.msra.mxu1 %v5780_v47  ;;  %v2407_v55 = vmax.f32 %v4953_v3, 0.0  ;;  %v2409_v27 = vmax.f32 %v4985_v4, 0.0  ;;  %v5803_v39 = vld [vmem:[#allocation4 + $0xc0] sm:$0xff]   ;;  %v5807_v46 = vld [vmem:[#allocation4 + $0xc8] sm:$0xff]   ;;  %v5809_v51 = vld [vmem:[#allocation4 + $0x50] sm:$0xff]  }
 0x237   :  { %v2410_v23 = vmax.f32 %v4954_v7, 0.0  ;;  %v2412_v25 = vmax.f32 %v4986_v9, 0.0  ;;  %3375 = vmatprep.subr.bf16.mxu0 %v5785_v63  ;;  %3601 = vmatprep.subr.bf16.mxu1 %v5788_v1  ;;  %v5802_v42 = vld [vmem:[#allocation4] sm:$0xff]   ;;  %v5808_v47 = vld [vmem:[#allocation4 + $0x88] sm:$0xff]   ;;  %v5811_v58 = vld [vmem:[#allocation4 + $0xd0] sm:$0xff]  }
 0x238   :  { %v2411_v28 = vmax.f32 %v4955_v13, 0.0  ;;  %v2413_v29 = vmax.f32 %v4987_v14, 0.0  ;;  %v5804_v44 = vld [vmem:[#allocation4 + $0x80] sm:$0xff]   ;;  %v5812_v62 = vld [vmem:[#allocation4 + $0x90] sm:$0xff]   ;;  %v5813_v63 = vld [vmem:[#allocation4 + $0x58] sm:$0xff]  }
 0x239   :  { %v2442_v30 = vpack.c.bf16 %v2410_v23, %v2406_v18  ;;  %v7089_v56 = vpack.c.bf16 %v2412_v25, %v2408_v20  ;;  %v5816_v1 = vld [vmem:[#allocation4 + $0x98] sm:$0xff]   ;;  %v5817_v3 = vld [vmem:[#allocation4 + $0x60] sm:$0xff]   ;;  %v5821_v7 = vld [vmem:[#allocation4 + $0x68] sm:$0xff]  }
 0x23a   :  { %v2443_v57 = vpack.c.bf16 %v2411_v28, %v2407_v55  ;;  %v7091_v31 = vpack.c.bf16 %v2413_v29, %v2409_v27  ;;  %3376 = vmatpush1.bf16.msra.mxu0 %v5783_v15  ;;  %3602 = vmatpush1.bf16.msra.mxu1 %v5786_v16  ;;  %v5819_v4 = vld [vmem:[#allocation4 + $0xe0] sm:$0xff]   ;;  %v5824_v9 = vld [vmem:[#allocation4 + $0xa8] sm:$0xff]   ;;  %v5825_v11 = vld [vmem:[#allocation4 + $0x70] sm:$0xff]  }
 0x23b   :  { %3377 = vmatprep.subr.bf16.mxu0 %v5791_v17  ;;  %3603 = vmatprep.subr.bf16.mxu1 %v5794_v54  ;;  %v5818_v5 = vld [vmem:[#allocation4 + $0x20] sm:$0xff]   ;;  %v5827_v12 = vld [vmem:[#allocation4 + $0xf0] sm:$0xff]  }
 0x23c   :  { %3338 = vmatprep.mubr.bf16.mxu0 %v2443_v57  ;;  %3564 = vmatprep.mubr.bf16.mxu1 %v2443_v57  ;;  %v5820_v6 = vld [vmem:[#allocation4 + $0xa0] sm:$0xff]   ;;  %v5826_v13 = vld [vmem:[#allocation4 + $0x30] sm:$0xff]  }
 0x23d   :  { %3339 = vmatmul.mubr.bf16.gmra.mrb[60].mxu0 %v2442_v30  ;;  %3565 = vmatmul.mubr.bf16.gmra.mrb[60].mxu1 %v2442_v30  ;;  %v5828_v14 = vld [vmem:[#allocation4 + $0xb0] sm:$0xff]  }
 0x23e   :  { %3378 = vmatpush1.bf16.msra.mxu0 %v5789_v32  ;;  %3381 = vmatprep.mubr.bf16.mxu0 %v7007_v21 }
 0x23f   :  { %3604 = vmatpush1.bf16.msra.mxu1 %v5792_v33  ;;  %3607 = vmatprep.mubr.bf16.mxu1 %v7007_v21  ;;  %v5806_v21 = vld [vmem:[#allocation4 + $0x8] sm:$0xff]  }
 0x240   :  { %3379 = vmatprep.subr.bf16.mxu0 %v5797_v34  ;;  %3605 = vmatprep.subr.bf16.mxu1 %v5800_v35 }
 0x242   :  { %3380 = vmatpush1.bf16.msra.mxu0 %v5795_v36 }
 0x243   :  { %3606 = vmatpush1.bf16.msra.mxu1 %v5798_v37  ;;  %4796 = vmatprep.subr.bf16.mxu0 %v5801_v22 }
 0x244   :  { %4860 = vmatprep.subr.bf16.mxu1 %v5803_v39 }
 0x245   :  { %3382 = vmatmul.mubr.bf16.vlgmr.msra.gmra.mrb[32].mxu0 %v7005_v19 }
 0x246   :  { %3608 = vmatmul.mubr.bf16.vlgmr.msra.gmra.mrb[32].mxu1 %v7005_v19  ;;  %3391 = vmatprep.mubr.bf16.mxu0 %v7019_v2  ;;  %v5815_v19 = vld [vmem:[#allocation4 + $0xd8] sm:$0xff]  }
 0x247   :  { %3617 = vmatprep.mubr.bf16.mxu1 %v7019_v2  ;;  %4797 = vmatpush3.bf16.msra.mxu0 %v5802_v42  ;;  %v5814_v2 = vld [vmem:[#allocation4 + $0x18] sm:$0xff]  }
 0x248   :  { %4861 = vmatpush3.bf16.msra.mxu1 %v5804_v44  ;;  %4798 = vmatprep.subr.bf16.mxu0 %v5805_v45 }
 0x249   :  { %4862 = vmatprep.subr.bf16.mxu1 %v5807_v46 }
 0x24b   :  { %4799 = vmatpush3.bf16.msra.mxu0 %v5806_v21 }
 0x24c   :  { %4863 = vmatpush3.bf16.msra.mxu1 %v5808_v47  ;;  %4800 = vmatprep.subr.bf16.mxu0 %v5809_v51 }
 0x24d   :  { %3392 = vmatmul.mubr.bf16.gmra.mrb[36].mxu0 %v7017_v0  ;;  %4864 = vmatprep.subr.bf16.mxu1 %v5811_v58 }
 0x24e   :  { %3618 = vmatmul.mubr.bf16.gmra.mrb[36].mxu1 %v7017_v0  ;;  %3401 = vmatprep.mubr.bf16.mxu0 %v7031_v40  ;;  %v5823_v0 = vld [vmem:[#allocation4 + $0xe8] sm:$0xff]  }
 0x24f   :  { %3627 = vmatprep.mubr.bf16.mxu1 %v7031_v40  ;;  %4801 = vmatpush3.bf16.msra.mxu0 %v5810_v60  ;;  %v5822_v40 = vld [vmem:[#allocation4 + $0x28] sm:$0xff]  }
 0x250   :  { %4865 = vmatpush3.bf16.msra.mxu1 %v5812_v62  ;;  %4802 = vmatprep.subr.bf16.mxu0 %v5813_v63 }
 0x251   :  { %4866 = vmatprep.subr.bf16.mxu1 %v5815_v19 }
 0x253   :  { %4803 = vmatpush3.bf16.msra.mxu0 %v5814_v2 }
 0x254   :  { %4867 = vmatpush3.bf16.msra.mxu1 %v5816_v1  ;;  %4804 = vmatprep.subr.bf16.mxu0 %v5817_v3 }
 0x255   :  { %3402 = vmatmul.mubr.bf16.gmra.mrb[40].mxu0 %v7029_v38  ;;  %4868 = vmatprep.subr.bf16.mxu1 %v5819_v4 }
 0x256   :  { %3628 = vmatmul.mubr.bf16.gmra.mrb[40].mxu1 %v7029_v38  ;;  %3411 = vmatprep.mubr.bf16.mxu0 %v7043_v26  ;;  %v5829_v38 = vld [vmem:[#allocation4 + $0x78] sm:$0xff]  }
 0x257   :  { %3637 = vmatprep.mubr.bf16.mxu1 %v7043_v26  ;;  %4805 = vmatpush3.bf16.msra.mxu0 %v5818_v5  ;;  %v5830_v26 = vld [vmem:[#allocation4 + $0x38] sm:$0xff]  }
 0x258   :  { %4869 = vmatpush3.bf16.msra.mxu1 %v5820_v6  ;;  %4806 = vmatprep.subr.bf16.mxu0 %v5821_v7 }
 0x259   :  { %4870 = vmatprep.subr.bf16.mxu1 %v5823_v0 }
 0x25b   :  { %4807 = vmatpush3.bf16.msra.mxu0 %v5822_v40 }
 0x25c   :  { %4871 = vmatpush3.bf16.msra.mxu1 %v5824_v9  ;;  %4808 = vmatprep.subr.bf16.mxu0 %v5825_v11 }
 0x25d   :  { %3412 = vmatmul.mubr.bf16.gmra.mrb[44].mxu0 %v7041_v24  ;;  %4872 = vmatprep.subr.bf16.mxu1 %v5827_v12 }
 0x25e   :  { %3638 = vmatmul.mubr.bf16.gmra.mrb[44].mxu1 %v7041_v24  ;;  %3421 = vmatprep.mubr.bf16.mxu0 %v7055_v10  ;;  %v5831_v24 = vld [vmem:[#allocation4 + $0xf8] sm:$0xff]  }
 0x25f   :  { %3647 = vmatprep.mubr.bf16.mxu1 %v7055_v10  ;;  %4809 = vmatpush3.bf16.msra.mxu0 %v5826_v13  ;;  %v2574_v10 = vld [vmem:[%s7409_s4] sm:$0xf] }
 0x260   :  { %4873 = vmatpush3.bf16.msra.mxu1 %v5828_v14  ;;  %4810 = vmatprep.subr.bf16.mxu0 %v5829_v38 }
 0x261   :  { %4874 = vmatprep.subr.bf16.mxu1 %v5831_v24 }
 0x263   :  { %4811 = vmatpush3.bf16.msra.mxu0 %v5830_v26 }
 0x265   :  { %3422 = vmatmul.mubr.bf16.gmra.mrb[48].mxu0 %v7053_v8 }
 0x266   :  { %3648 = vmatmul.mubr.bf16.gmra.mrb[48].mxu1 %v7053_v8  ;;  %3431 = vmatprep.mubr.bf16.mxu0 %v7067_v61  ;;  %v5832_v8 = vld [vmem:[#allocation4 + $0xb8] sm:$0xff]  }
 0x267   :  { %3657 = vmatprep.mubr.bf16.mxu1 %v7067_v61  ;;  %4875 = vmatpush3.bf16.msra.mxu1 %v5832_v8  ;;  %v7134_v61 = vrot.slane %v2574_v10, %v431_v50 }
 0x26d   :  { %3432 = vmatmul.mubr.bf16.gmra.mrb[52].mxu0 %v7065_v59 }
 0x26e   :  { %3658 = vmatmul.mubr.bf16.gmra.mrb[52].mxu1 %v7065_v59  ;;  %3441 = vmatprep.mubr.bf16.mxu0 %v7079_v43  ;;  %v7130_v59 = vrot.slane %v2574_v10, %v423_v49 }
 0x26f   :  { %3667 = vmatprep.mubr.bf16.mxu1 %v7079_v43  ;;  %v7142_v43 = vrot.slane %v2574_v10, %v435_v53 }
 0x275   :  { %3442 = vmatmul.mubr.bf16.gmra.mrb[56].mxu0 %v7077_v41 }
 0x276   :  { %3668 = vmatmul.mubr.bf16.gmra.mrb[56].mxu1 %v7077_v41  ;;  %3451 = vmatprep.mubr.bf16.mxu0 %v7091_v31  ;;  %v7138_v41 = vrot.slane %v2574_v10, %v427_v52 }
 0x277   :  { %3677 = vmatprep.mubr.bf16.mxu1 %v7091_v31 }
 0x27d   :  { %3452 = vmatmul.mubr.bf16.gmra.mrb[60].mxu0 %v7089_v56 }
 0x27e   :  { %3678 = vmatmul.mubr.bf16.gmra.mrb[60].mxu1 %v7089_v56 }
 0x318   :  { %v3383_v15 = vpop.f32.mrb[32].mxu0 }
 0x319   :  { %v4988_v16 = vadd.f32 %v3383_v15, %v7130_v59  ;;  %v3609_v17 = vpop.f32.mrb[32].mxu1  ;;  %v3385_v18 = vpop.f32.mrb[33].mxu0 }
 0x31a   :  { %v5020_v49 = vadd.f32 %v3609_v17, %v7134_v61  ;;  %v4989_v20 = vadd.f32 %v3385_v18, %v7138_v41  ;;  %v3611_v23 = vpop.f32.mrb[33].mxu1  ;;  %v3387_v50 = vpop.f32.mrb[34].mxu0 }
 0x31b   :  { %v5021_v25 = vadd.f32 %v3611_v23, %v7142_v43  ;;  %v4990_v52 = vadd.f32 %v3387_v50, %v7130_v59  ;;  %v3613_v54 = vpop.f32.mrb[34].mxu1  ;;  %v3389_v55 = vpop.f32.mrb[35].mxu0  ;;  %v3688_v28 = vmax.f32 %v4988_v16, 0.0 }
 0x31c   :  { %v5022_v48 = vadd.f32 %v3613_v54, %v7134_v61  ;;  %v4991_v53 = vadd.f32 %v3389_v55, %v7138_v41  ;;  %v3615_v27 = vpop.f32.mrb[35].mxu1  ;;  %v3690_v56 = vmax.f32 %v5020_v49, 0.0  ;;  %v3689_v57 = vmax.f32 %v4989_v20, 0.0 }
 0x31d   :  { %v3692_v29 = vmax.f32 %v4990_v52, 0.0  ;;  %v5023_v30 = vadd.f32 %v3615_v27, %v7142_v43  ;;  %v3691_v33 = vmax.f32 %v5021_v25, 0.0 }
 0x31e   :  { %v3694_v31 = vmax.f32 %v5022_v48, 0.0  ;;  %v3693_v32 = vmax.f32 %v4991_v53, 0.0 }
 0x31f   :  { %v3752_v34 = vpack.c.bf16 %v3692_v29, %v3688_v28  ;;  %v3695_v35 = vmax.f32 %v5023_v30, 0.0 }
 0x320   :  { %v3754_v36 = vpack.c.bf16 %v3694_v31, %v3690_v56  ;;  %v3753_v37 = vpack.c.bf16 %v3693_v32, %v3689_v57  ;;  %v3393_v22 = vpop.f32.mrb[36].mxu0 }
 0x321   :  { %v3755_v39 = vpack.c.bf16 %v3695_v35, %v3691_v33  ;;  %v4992_v42 = vadd.f32 %v3393_v22, %v7130_v59  ;;  %v3619_v44 = vpop.f32.mrb[36].mxu1  ;;  %v3395_v45 = vpop.f32.mrb[37].mxu0 }
 0x322   :  { %v5024_v46 = vadd.f32 %v3619_v44, %v7134_v61  ;;  %v4993_v21 = vadd.f32 %v3395_v45, %v7138_v41  ;;  %v3621_v47 = vpop.f32.mrb[37].mxu1  ;;  %v3397_v51 = vpop.f32.mrb[38].mxu0  ;;  %4079 = vmatprep.mubr.bf16.mxu0 %v3753_v37 }
 0x323   :  { %v5025_v58 = vadd.f32 %v3621_v47, %v7142_v43  ;;  %v4994_v60 = vadd.f32 %v3397_v51, %v7130_v59  ;;  %v3623_v62 = vpop.f32.mrb[38].mxu1  ;;  %4176 = vmatprep.mubr.bf16.mxu1 %v3755_v39  ;;  %v3399_v63 = vpop.f32.mrb[39].mxu0  ;;  %4080 = vmatmul.mubr.bf16.vlgmr.msra.gmra.mrb[64].mxu0 %v3752_v34  ;;  %v3696_v3 = vmax.f32 %v4992_v42, 0.0 }
 0x324   :  { %v5026_v19 = vadd.f32 %v3623_v62, %v7134_v61  ;;  %v4995_v2 = vadd.f32 %v3399_v63, %v7138_v41  ;;  %v3625_v1 = vpop.f32.mrb[39].mxu1  ;;  %4177 = vmatmul.mubr.bf16.vlgmr.msra.gmra.mrb[64].mxu1 %v3754_v36  ;;  %v3698_v6 = vmax.f32 %v5024_v46, 0.0  ;;  %v3697_v7 = vmax.f32 %v4993_v21, 0.0 }
 0x325   :  { %v3700_v4 = vmax.f32 %v4994_v60, 0.0  ;;  %v5027_v5 = vadd.f32 %v3625_v1, %v7142_v43  ;;  %v3699_v9 = vmax.f32 %v5025_v58, 0.0 }
 0x326   :  { %v3702_v0 = vmax.f32 %v5026_v19, 0.0  ;;  %v3701_v40 = vmax.f32 %v4995_v2, 0.0 }
 0x327   :  { %v3756_v11 = vpack.c.bf16 %v3700_v4, %v3696_v3  ;;  %v3703_v12 = vmax.f32 %v5027_v5, 0.0 }
 0x328   :  { %v3758_v13 = vpack.c.bf16 %v3702_v0, %v3698_v6  ;;  %v3757_v14 = vpack.c.bf16 %v3701_v40, %v3697_v7  ;;  %v3403_v38 = vpop.f32.mrb[40].mxu0 }
 0x329   :  { %v3759_v24 = vpack.c.bf16 %v3703_v12, %v3699_v9  ;;  %v4996_v26 = vadd.f32 %v3403_v38, %v7130_v59  ;;  %v3629_v8 = vpop.f32.mrb[40].mxu1  ;;  %v3405_v10 = vpop.f32.mrb[41].mxu0 }
 0x32a   :  { %v5028_v15 = vadd.f32 %v3629_v8, %v7134_v61  ;;  %v4997_v16 = vadd.f32 %v3405_v10, %v7138_v41  ;;  %v3631_v17 = vpop.f32.mrb[41].mxu1  ;;  %v3407_v18 = vpop.f32.mrb[42].mxu0  ;;  %4087 = vmatprep.mubr.bf16.mxu0 %v3757_v14 }
 0x32b   :  { %v5029_v49 = vadd.f32 %v3631_v17, %v7142_v43  ;;  %v4998_v20 = vadd.f32 %v3407_v18, %v7130_v59  ;;  %v3633_v23 = vpop.f32.mrb[42].mxu1  ;;  %4184 = vmatprep.mubr.bf16.mxu1 %v3759_v24  ;;  %v3409_v50 = vpop.f32.mrb[43].mxu0  ;;  %4088 = vmatmul.mubr.bf16.gmra.mrb[68].mxu0 %v3756_v11  ;;  %v3704_v55 = vmax.f32 %v4996_v26, 0.0 }
 0x32c   :  { %v5030_v25 = vadd.f32 %v3633_v23, %v7134_v61  ;;  %v4999_v52 = vadd.f32 %v3409_v50, %v7138_v41  ;;  %v3635_v54 = vpop.f32.mrb[43].mxu1  ;;  %4185 = vmatmul.mubr.bf16.gmra.mrb[68].mxu1 %v3758_v13  ;;  %v3706_v27 = vmax.f32 %v5028_v15, 0.0  ;;  %v3705_v28 = vmax.f32 %v4997_v16, 0.0 }
 0x32d   :  { %v3708_v48 = vmax.f32 %v4998_v20, 0.0  ;;  %v5031_v53 = vadd.f32 %v3635_v54, %v7142_v43  ;;  %v3707_v56 = vmax.f32 %v5029_v49, 0.0 }
 0x32e   :  { %v3710_v29 = vmax.f32 %v5030_v25, 0.0  ;;  %v3709_v30 = vmax.f32 %v4999_v52, 0.0 }
 0x32f   :  { %v3760_v57 = vpack.c.bf16 %v3708_v48, %v3704_v55  ;;  %v3711_v31 = vmax.f32 %v5031_v53, 0.0 }
 0x330   :  { %v3762_v32 = vpack.c.bf16 %v3710_v29, %v3706_v27  ;;  %v3761_v33 = vpack.c.bf16 %v3709_v30, %v3705_v28  ;;  %v3413_v34 = vpop.f32.mrb[44].mxu0 }
 0x331   :  { %v3763_v35 = vpack.c.bf16 %v3711_v31, %v3707_v56  ;;  %v5000_v36 = vadd.f32 %v3413_v34, %v7130_v59  ;;  %v3639_v37 = vpop.f32.mrb[44].mxu1  ;;  %v3415_v22 = vpop.f32.mrb[45].mxu0 }
 0x332   :  { %v5032_v39 = vadd.f32 %v3639_v37, %v7134_v61  ;;  %v5001_v42 = vadd.f32 %v3415_v22, %v7138_v41  ;;  %v3641_v44 = vpop.f32.mrb[45].mxu1  ;;  %v3417_v45 = vpop.f32.mrb[46].mxu0  ;;  %4095 = vmatprep.mubr.bf16.mxu0 %v3761_v33 }
 0x333   :  { %v5033_v46 = vadd.f32 %v3641_v44, %v7142_v43  ;;  %v5002_v21 = vadd.f32 %v3417_v45, %v7130_v59  ;;  %v3643_v47 = vpop.f32.mrb[46].mxu1  ;;  %4192 = vmatprep.mubr.bf16.mxu1 %v3763_v35  ;;  %v3419_v51 = vpop.f32.mrb[47].mxu0  ;;  %4096 = vmatmul.mubr.bf16.gmra.mrb[72].mxu0 %v3760_v57  ;;  %v3712_v63 = vmax.f32 %v5000_v36, 0.0 }
 0x334   :  { %v5034_v58 = vadd.f32 %v3643_v47, %v7134_v61  ;;  %v5003_v60 = vadd.f32 %v3419_v51, %v7138_v41  ;;  %v3645_v62 = vpop.f32.mrb[47].mxu1  ;;  %4193 = vmatmul.mubr.bf16.gmra.mrb[72].mxu1 %v3762_v32  ;;  %v3714_v1 = vmax.f32 %v5032_v39, 0.0  ;;  %v3713_v3 = vmax.f32 %v5001_v42, 0.0 }
 0x335   :  { %v3716_v19 = vmax.f32 %v5002_v21, 0.0  ;;  %v5035_v2 = vadd.f32 %v3645_v62, %v7142_v43  ;;  %v3715_v6 = vmax.f32 %v5033_v46, 0.0 }
 0x336   :  { %v3718_v4 = vmax.f32 %v5034_v58, 0.0  ;;  %v3717_v5 = vmax.f32 %v5003_v60, 0.0 }
 0x337   :  { %v3764_v7 = vpack.c.bf16 %v3716_v19, %v3712_v63  ;;  %v3719_v0 = vmax.f32 %v5035_v2, 0.0 }
 0x338   :  { %v3766_v40 = vpack.c.bf16 %v3718_v4, %v3714_v1  ;;  %v3765_v9 = vpack.c.bf16 %v3717_v5, %v3713_v3  ;;  %v3423_v11 = vpop.f32.mrb[48].mxu0 }
 0x339   :  { %v3767_v12 = vpack.c.bf16 %v3719_v0, %v3715_v6  ;;  %v5004_v13 = vadd.f32 %v3423_v11, %v7130_v59  ;;  %v3649_v14 = vpop.f32.mrb[48].mxu1  ;;  %v3425_v38 = vpop.f32.mrb[49].mxu0 }
 0x33a   :  { %v5036_v24 = vadd.f32 %v3649_v14, %v7134_v61  ;;  %v5005_v26 = vadd.f32 %v3425_v38, %v7138_v41  ;;  %v3651_v8 = vpop.f32.mrb[49].mxu1  ;;  %v3427_v10 = vpop.f32.mrb[50].mxu0  ;;  %4103 = vmatprep.mubr.bf16.mxu0 %v3765_v9 }
 0x33b   :  { %v5037_v15 = vadd.f32 %v3651_v8, %v7142_v43  ;;  %v5006_v16 = vadd.f32 %v3427_v10, %v7130_v59  ;;  %v3653_v17 = vpop.f32.mrb[50].mxu1  ;;  %4200 = vmatprep.mubr.bf16.mxu1 %v3767_v12  ;;  %v3429_v18 = vpop.f32.mrb[51].mxu0  ;;  %4104 = vmatmul.mubr.bf16.gmra.mrb[76].mxu0 %v3764_v7  ;;  %v3720_v50 = vmax.f32 %v5004_v13, 0.0 }
 0x33c   :  { %v5038_v49 = vadd.f32 %v3653_v17, %v7134_v61  ;;  %v5007_v20 = vadd.f32 %v3429_v18, %v7138_v41  ;;  %v3655_v23 = vpop.f32.mrb[51].mxu1  ;;  %4201 = vmatmul.mubr.bf16.gmra.mrb[76].mxu1 %v3766_v40  ;;  %v3722_v54 = vmax.f32 %v5036_v24, 0.0  ;;  %v3721_v55 = vmax.f32 %v5005_v26, 0.0 }
 0x33d   :  { %v3724_v25 = vmax.f32 %v5006_v16, 0.0  ;;  %v5039_v52 = vadd.f32 %v3655_v23, %v7142_v43  ;;  %v3723_v27 = vmax.f32 %v5037_v15, 0.0 }
 0x33e   :  { %v3726_v48 = vmax.f32 %v5038_v49, 0.0  ;;  %v3725_v53 = vmax.f32 %v5007_v20, 0.0 }
 0x33f   :  { %v3768_v28 = vpack.c.bf16 %v3724_v25, %v3720_v50  ;;  %v3727_v29 = vmax.f32 %v5039_v52, 0.0 }
 0x340   :  { %v3770_v30 = vpack.c.bf16 %v3726_v48, %v3722_v54  ;;  %v3769_v56 = vpack.c.bf16 %v3725_v53, %v3721_v55  ;;  %v3433_v57 = vpop.f32.mrb[52].mxu0 }
 0x341   :  { %v3771_v31 = vpack.c.bf16 %v3727_v29, %v3723_v27  ;;  %v5008_v32 = vadd.f32 %v3433_v57, %v7130_v59  ;;  %v3659_v33 = vpop.f32.mrb[52].mxu1  ;;  %v3435_v34 = vpop.f32.mrb[53].mxu0 }
 0x342   :  { %v5040_v35 = vadd.f32 %v3659_v33, %v7134_v61  ;;  %v5009_v36 = vadd.f32 %v3435_v34, %v7138_v41  ;;  %v3661_v37 = vpop.f32.mrb[53].mxu1  ;;  %v3437_v22 = vpop.f32.mrb[54].mxu0  ;;  %4111 = vmatprep.mubr.bf16.mxu0 %v3769_v56 }
 0x343   :  { %v5041_v39 = vadd.f32 %v3661_v37, %v7142_v43  ;;  %v5010_v42 = vadd.f32 %v3437_v22, %v7130_v59  ;;  %v3663_v44 = vpop.f32.mrb[54].mxu1  ;;  %4208 = vmatprep.mubr.bf16.mxu1 %v3771_v31  ;;  %v3439_v45 = vpop.f32.mrb[55].mxu0  ;;  %4112 = vmatmul.mubr.bf16.gmra.mrb[80].mxu0 %v3768_v28  ;;  %v3728_v51 = vmax.f32 %v5008_v32, 0.0 }
 0x344   :  { %v5042_v46 = vadd.f32 %v3663_v44, %v7134_v61  ;;  %v5011_v21 = vadd.f32 %v3439_v45, %v7138_v41  ;;  %v3665_v47 = vpop.f32.mrb[55].mxu1  ;;  %4209 = vmatmul.mubr.bf16.gmra.mrb[80].mxu1 %v3770_v30  ;;  %v3730_v62 = vmax.f32 %v5040_v35, 0.0  ;;  %v3729_v63 = vmax.f32 %v5009_v36, 0.0 }
 0x345   :  { %v3732_v58 = vmax.f32 %v5010_v42, 0.0  ;;  %v5043_v60 = vadd.f32 %v3665_v47, %v7142_v43  ;;  %v3731_v1 = vmax.f32 %v5041_v39, 0.0 }
 0x346   :  { %v3734_v19 = vmax.f32 %v5042_v46, 0.0  ;;  %v3733_v2 = vmax.f32 %v5011_v21, 0.0 }
 0x347   :  { %v3772_v3 = vpack.c.bf16 %v3732_v58, %v3728_v51  ;;  %v3735_v4 = vmax.f32 %v5043_v60, 0.0 }
 0x348   :  { %v3774_v5 = vpack.c.bf16 %v3734_v19, %v3730_v62  ;;  %v3773_v6 = vpack.c.bf16 %v3733_v2, %v3729_v63  ;;  %v3443_v7 = vpop.f32.mrb[56].mxu0 }
 0x349   :  { %v3775_v0 = vpack.c.bf16 %v3735_v4, %v3731_v1  ;;  %v5012_v40 = vadd.f32 %v3443_v7, %v7130_v59  ;;  %v3669_v9 = vpop.f32.mrb[56].mxu1  ;;  %v3445_v11 = vpop.f32.mrb[57].mxu0 }
 0x34a   :  { %v5044_v12 = vadd.f32 %v3669_v9, %v7134_v61  ;;  %v5013_v13 = vadd.f32 %v3445_v11, %v7138_v41  ;;  %v3671_v14 = vpop.f32.mrb[57].mxu1  ;;  %v3447_v38 = vpop.f32.mrb[58].mxu0  ;;  %4119 = vmatprep.mubr.bf16.mxu0 %v3773_v6 }
 0x34b   :  { %v5045_v24 = vadd.f32 %v3671_v14, %v7142_v43  ;;  %v5014_v26 = vadd.f32 %v3447_v38, %v7130_v59  ;;  %v3673_v8 = vpop.f32.mrb[58].mxu1  ;;  %4216 = vmatprep.mubr.bf16.mxu1 %v3775_v0  ;;  %v3449_v10 = vpop.f32.mrb[59].mxu0  ;;  %4120 = vmatmul.mubr.bf16.gmra.mrb[84].mxu0 %v3772_v3  ;;  %v3736_v18 = vmax.f32 %v5012_v40, 0.0 }
 0x34c   :  { %v5046_v15 = vadd.f32 %v3673_v8, %v7134_v61  ;;  %v5015_v16 = vadd.f32 %v3449_v10, %v7138_v41  ;;  %v3675_v17 = vpop.f32.mrb[59].mxu1  ;;  %4217 = vmatmul.mubr.bf16.gmra.mrb[84].mxu1 %v3774_v5  ;;  %v3738_v23 = vmax.f32 %v5044_v12, 0.0  ;;  %v3737_v50 = vmax.f32 %v5013_v13, 0.0 }
 0x34d   :  { %v3740_v49 = vmax.f32 %v5014_v26, 0.0  ;;  %v5047_v20 = vadd.f32 %v3675_v17, %v7142_v43  ;;  %v3739_v54 = vmax.f32 %v5045_v24, 0.0 }
 0x34e   :  { %v3742_v25 = vmax.f32 %v5046_v15, 0.0  ;;  %v3741_v52 = vmax.f32 %v5015_v16, 0.0 }
 0x34f   :  { %v3776_v55 = vpack.c.bf16 %v3740_v49, %v3736_v18  ;;  %v3743_v48 = vmax.f32 %v5047_v20, 0.0 }
 0x350   :  { %v3778_v53 = vpack.c.bf16 %v3742_v25, %v3738_v23  ;;  %v3777_v27 = vpack.c.bf16 %v3741_v52, %v3737_v50  ;;  %v3453_v28 = vpop.f32.mrb[60].mxu0 }
 0x351   :  { %v3779_v29 = vpack.c.bf16 %v3743_v48, %v3739_v54  ;;  %v5016_v30 = vadd.f32 %v3453_v28, %v7130_v59  ;;  %v3679_v56 = vpop.f32.mrb[60].mxu1  ;;  %v3455_v57 = vpop.f32.mrb[61].mxu0 }
 0x352   :  { %v5048_v31 = vadd.f32 %v3679_v56, %v7134_v61  ;;  %v5017_v32 = vadd.f32 %v3455_v57, %v7138_v41  ;;  %v3681_v33 = vpop.f32.mrb[61].mxu1  ;;  %v3457_v34 = vpop.f32.mrb[62].mxu0  ;;  %4127 = vmatprep.mubr.bf16.mxu0 %v3777_v27 }
 0x353   :  { %v5049_v35 = vadd.f32 %v3681_v33, %v7142_v43  ;;  %v5018_v36 = vadd.f32 %v3457_v34, %v7130_v59  ;;  %v3683_v37 = vpop.f32.mrb[62].mxu1  ;;  %4224 = vmatprep.mubr.bf16.mxu1 %v3779_v29  ;;  %v3459_v22 = vpop.f32.mrb[63].mxu0  ;;  %4128 = vmatmul.mubr.bf16.gmra.mrb[88].mxu0 %v3776_v55  ;;  %v3744_v45 = vmax.f32 %v5016_v30, 0.0 }
 0x354   :  { %v5050_v39 = vadd.f32 %v3683_v37, %v7134_v61  ;;  %v5019_v42 = vadd.f32 %v3459_v22, %v7138_v41  ;;  %v3685_v44 = vpop.f32.mrb[63].mxu1  ;;  %4225 = vmatmul.mubr.bf16.gmra.mrb[88].mxu1 %v3778_v53  ;;  %v3746_v47 = vmax.f32 %v5048_v31, 0.0  ;;  %v3745_v51 = vmax.f32 %v5017_v32, 0.0 }
 0x355   :  { %v3748_v46 = vmax.f32 %v5018_v36, 0.0  ;;  %v5051_v21 = vadd.f32 %v3685_v44, %v7142_v43  ;;  %v3747_v62 = vmax.f32 %v5049_v35, 0.0  ;;  %v7211_v43 = vld [vmem:[%s7411_s6] ss:$0 sm:$0xff] }
 0x356   :  { %v3750_v58 = vmax.f32 %v5050_v39, 0.0  ;;  %v3749_v60 = vmax.f32 %v5019_v42, 0.0 }
 0x357   :  { %v3780_v59 = vpack.c.bf16 %v3748_v46, %v3744_v45  ;;  %v3751_v63 = vmax.f32 %v5051_v21, 0.0 }
 0x358   :  { %v3782_v19 = vpack.c.bf16 %v3750_v58, %v3746_v47  ;;  %v3781_v2 = vpack.c.bf16 %v3749_v60, %v3745_v51 }
 0x359   :  { %v3783_v1 = vpack.c.bf16 %v3751_v63, %v3747_v62 }
 0x35a   :  { %4135 = vmatprep.mubr.bf16.mxu0 %v3781_v2 }
 0x35b   :  { %4232 = vmatprep.mubr.bf16.mxu1 %v3783_v1  ;;  %4136 = vmatmul.mubr.bf16.gmra.mrb[92].mxu0 %v3780_v59 }
 0x35c   :  { %4233 = vmatmul.mubr.bf16.gmra.mrb[92].mxu1 %v3782_v19 }
 0x3f6   :  { %v4812_v61 = vpop.f32.mrb[64].mxu0 }
 0x3f7   :  { %v4876_v41 = vpop.f32.mrb[64].mxu1  ;;  %v4813_v3 = vpop.f32.mrb[65].mxu0 }
 0x3f8   :  { %v4814_v4 = vadd.f32 %v4813_v3, %v4812_v61  ;;  %v4877_v5 = vpop.f32.mrb[65].mxu1  ;;  %v4815_v6 = vpop.f32.mrb[66].mxu0 }
 0x3f9   :  { %v4878_v7 = vadd.f32 %v4877_v5, %v4876_v41  ;;  %v4879_v0 = vpop.f32.mrb[66].mxu1  ;;  %v4816_v40 = vpop.f32.mrb[67].mxu0 }
 0x3fa   :  { %v4082_v9 = vadd.f32 %v4814_v4, %v7211_v43  ;;  %v4817_v11 = vadd.f32 %v4816_v40, %v4815_v6  ;;  %v4880_v12 = vpop.f32.mrb[67].mxu1 }
 0x3fb   :  { %v4881_v13 = vadd.f32 %v4880_v12, %v4879_v0 }
 0x3fc   :  { %v4085_v14 = vadd.f32 %v4817_v11, %v7211_v43  ;;  %v7215_v38 = vadd.f32 %v4878_v7, %v4082_v9 }
 0x3fe   :  { %v4818_v24 = vpop.f32.mrb[68].mxu0  ;;  %4241 = vmax.xlane.f32.xlu0 %v7215_v38  ;;  %v7218_v26 = vadd.f32 %v4881_v13, %v4085_v14 }
 0x3ff   :  { %v4882_v8 = vpop.f32.mrb[68].mxu1  ;;  %v4819_v10 = vpop.f32.mrb[69].mxu0 }
 0x400   :  { %v4820_v15 = vadd.f32 %v4819_v10, %v4818_v24  ;;  %v4883_v16 = vpop.f32.mrb[69].mxu1  ;;  %v4821_v17 = vpop.f32.mrb[70].mxu0 }
 0x401   :  { %v4884_v18 = vadd.f32 %v4883_v16, %v4882_v8  ;;  %v4885_v49 = vpop.f32.mrb[70].mxu1  ;;  %v4822_v20 = vpop.f32.mrb[71].mxu0 }
 0x402   :  { %v4090_v23 = vadd.f32 %v4820_v15, %v7211_v43  ;;  %v4823_v50 = vadd.f32 %v4822_v20, %v4821_v17  ;;  %v4886_v25 = vpop.f32.mrb[71].mxu1  ;;  %4243 = vmax.xlane.f32.xlu0 %v7218_v26 }
 0x403   :  { %v4887_v52 = vadd.f32 %v4886_v25, %v4885_v49 }
 0x404   :  { %v4093_v54 = vadd.f32 %v4823_v50, %v7211_v43  ;;  %v7223_v55 = vadd.f32 %v4884_v18, %v4090_v23 }
 0x406   :  { %v4824_v48 = vpop.f32.mrb[72].mxu0  ;;  %4245 = vmax.xlane.f32.xlu1 %v7223_v55  ;;  %v7226_v53 = vadd.f32 %v4887_v52, %v4093_v54 }
 0x407   :  { %v4888_v27 = vpop.f32.mrb[72].mxu1  ;;  %v4825_v28 = vpop.f32.mrb[73].mxu0 }
 0x408   :  { %v4826_v29 = vadd.f32 %v4825_v28, %v4824_v48  ;;  %v4889_v30 = vpop.f32.mrb[73].mxu1  ;;  %v4827_v56 = vpop.f32.mrb[74].mxu0 }
 0x409   :  { %v4890_v57 = vadd.f32 %v4889_v30, %v4888_v27  ;;  %v4891_v31 = vpop.f32.mrb[74].mxu1  ;;  %v4828_v32 = vpop.f32.mrb[75].mxu0 }
 0x40a   :  { %v4098_v33 = vadd.f32 %v4826_v29, %v7211_v43  ;;  %v4829_v34 = vadd.f32 %v4828_v32, %v4827_v56  ;;  %v4892_v35 = vpop.f32.mrb[75].mxu1  ;;  %4247 = vmax.xlane.f32.xlu1 %v7226_v53 }
 0x40b   :  { %v4893_v36 = vadd.f32 %v4892_v35, %v4891_v31 }
 0x40c   :  { %v4101_v37 = vadd.f32 %v4829_v34, %v7211_v43  ;;  %v7231_v22 = vadd.f32 %v4890_v57, %v4098_v33 }
 0x40e   :  { %v4830_v39 = vpop.f32.mrb[76].mxu0  ;;  %4249 = vmax.xlane.f32.xlu0 %v7231_v22  ;;  %v7234_v42 = vadd.f32 %v4893_v36, %v4101_v37 }
 0x40f   :  { %v4894_v44 = vpop.f32.mrb[76].mxu1  ;;  %v4831_v45 = vpop.f32.mrb[77].mxu0 }
 0x410   :  { %v4832_v46 = vadd.f32 %v4831_v45, %v4830_v39  ;;  %v4895_v21 = vpop.f32.mrb[77].mxu1  ;;  %v4833_v47 = vpop.f32.mrb[78].mxu0  ;;  %4251 = vmax.xlane.f32.xlu1 %v7234_v42 }
 0x411   :  { %v4896_v51 = vadd.f32 %v4895_v21, %v4894_v44  ;;  %v4897_v58 = vpop.f32.mrb[78].mxu1  ;;  %v4834_v60 = vpop.f32.mrb[79].mxu0 }
 0x412   :  { %v4106_v62 = vadd.f32 %v4832_v46, %v7211_v43  ;;  %v4835_v59 = vadd.f32 %v4834_v60, %v4833_v47  ;;  %v4898_v63 = vpop.f32.mrb[79].mxu1 }
 0x413   :  { %v4899_v19 = vadd.f32 %v4898_v63, %v4897_v58 }
 0x414   :  { %v4109_v2 = vadd.f32 %v4835_v59, %v7211_v43  ;;  %v7239_v1 = vadd.f32 %v4896_v51, %v4106_v62 }
 0x416   :  { %v4836_v61 = vpop.f32.mrb[80].mxu0  ;;  %4253 = vmax.xlane.f32.xlu0 %v7239_v1  ;;  %v7242_v41 = vadd.f32 %v4899_v19, %v4109_v2 }
 0x417   :  { %v4900_v3 = vpop.f32.mrb[80].mxu1  ;;  %v4837_v4 = vpop.f32.mrb[81].mxu0 }
 0x418   :  { %v4838_v5 = vadd.f32 %v4837_v4, %v4836_v61  ;;  %v4901_v6 = vpop.f32.mrb[81].mxu1  ;;  %v4839_v7 = vpop.f32.mrb[82].mxu0  ;;  %4255 = vmax.xlane.f32.xlu1 %v7242_v41 }
 0x419   :  { %v4902_v0 = vadd.f32 %v4901_v6, %v4900_v3  ;;  %v4903_v40 = vpop.f32.mrb[82].mxu1  ;;  %v4840_v9 = vpop.f32.mrb[83].mxu0 }
 0x41a   :  { %v4114_v11 = vadd.f32 %v4838_v5, %v7211_v43  ;;  %v4841_v12 = vadd.f32 %v4840_v9, %v4839_v7  ;;  %v4904_v13 = vpop.f32.mrb[83].mxu1 }
 0x41b   :  { %v4905_v14 = vadd.f32 %v4904_v13, %v4903_v40 }
 0x41c   :  { %v4117_v24 = vadd.f32 %v4841_v12, %v7211_v43  ;;  %v7247_v8 = vadd.f32 %v4902_v0, %v4114_v11 }
 0x41e   :  { %v4842_v10 = vpop.f32.mrb[84].mxu0  ;;  %4257 = vmax.xlane.f32.xlu0 %v7247_v8  ;;  %v7250_v15 = vadd.f32 %v4905_v14, %v4117_v24 }
 0x41f   :  { %v4906_v16 = vpop.f32.mrb[84].mxu1  ;;  %v4843_v17 = vpop.f32.mrb[85].mxu0 }
 0x420   :  { %v4844_v18 = vadd.f32 %v4843_v17, %v4842_v10  ;;  %v4907_v49 = vpop.f32.mrb[85].mxu1  ;;  %v4845_v20 = vpop.f32.mrb[86].mxu0  ;;  %4259 = vmax.xlane.f32.xlu1 %v7250_v15 }
 0x421   :  { %v4908_v23 = vadd.f32 %v4907_v49, %v4906_v16  ;;  %v4909_v50 = vpop.f32.mrb[86].mxu1  ;;  %v4846_v25 = vpop.f32.mrb[87].mxu0 }
 0x422   :  { %v4122_v52 = vadd.f32 %v4844_v18, %v7211_v43  ;;  %v4847_v54 = vadd.f32 %v4846_v25, %v4845_v20  ;;  %v4910_v48 = vpop.f32.mrb[87].mxu1 }
 0x423   :  { %v4911_v27 = vadd.f32 %v4910_v48, %v4909_v50 }
 0x424   :  { %v4125_v28 = vadd.f32 %v4847_v54, %v7211_v43  ;;  %v7255_v29 = vadd.f32 %v4908_v23, %v4122_v52 }
 0x426   :  { %v4848_v30 = vpop.f32.mrb[88].mxu0  ;;  %4261 = vmax.xlane.f32.xlu0 %v7255_v29  ;;  %v7258_v56 = vadd.f32 %v4911_v27, %v4125_v28 }
 0x427   :  { %v4912_v57 = vpop.f32.mrb[88].mxu1  ;;  %v4849_v31 = vpop.f32.mrb[89].mxu0 }
 0x428   :  { %v4850_v32 = vadd.f32 %v4849_v31, %v4848_v30  ;;  %v4913_v33 = vpop.f32.mrb[89].mxu1  ;;  %v4851_v34 = vpop.f32.mrb[90].mxu0  ;;  %4263 = vmax.xlane.f32.xlu1 %v7258_v56 }
 0x429   :  { %v4914_v35 = vadd.f32 %v4913_v33, %v4912_v57  ;;  %v4915_v36 = vpop.f32.mrb[90].mxu1  ;;  %v4852_v37 = vpop.f32.mrb[91].mxu0 }
 0x42a   :  { %v4130_v39 = vadd.f32 %v4850_v32, %v7211_v43  ;;  %v4853_v44 = vadd.f32 %v4852_v37, %v4851_v34  ;;  %v4916_v45 = vpop.f32.mrb[91].mxu1 }
 0x42b   :  { %v4917_v46 = vadd.f32 %v4916_v45, %v4915_v36 }
 0x42c   :  { %v4133_v21 = vadd.f32 %v4853_v44, %v7211_v43  ;;  %v7263_v47 = vadd.f32 %v4914_v35, %v4130_v39 }
 0x42e   :  { %v4854_v51 = vpop.f32.mrb[92].mxu0  ;;  %4265 = vmax.xlane.f32.xlu0 %v7263_v47  ;;  %v7266_v58 = vadd.f32 %v4917_v46, %v4133_v21 }
 0x42f   :  { %v4918_v60 = vpop.f32.mrb[92].mxu1  ;;  %v4855_v62 = vpop.f32.mrb[93].mxu0 }
 0x430   :  { %v4856_v59 = vadd.f32 %v4855_v62, %v4854_v51  ;;  %v4919_v63 = vpop.f32.mrb[93].mxu1  ;;  %v4857_v19 = vpop.f32.mrb[94].mxu0  ;;  %4267 = vmax.xlane.f32.xlu1 %v7266_v58 }
 0x431   :  { %v4920_v2 = vadd.f32 %v4919_v63, %v4918_v60  ;;  %v4921_v61 = vpop.f32.mrb[94].mxu1  ;;  %v4858_v3 = vpop.f32.mrb[95].mxu0 }
 0x432   :  { %v4138_v4 = vadd.f32 %v4856_v59, %v7211_v43  ;;  %v4859_v5 = vadd.f32 %v4858_v3, %v4857_v19  ;;  %v4922_v6 = vpop.f32.mrb[95].mxu1 }
 0x433   :  { %v4923_v7 = vadd.f32 %v4922_v6, %v4921_v61 }
 0x434   :  { %v4141_v0 = vadd.f32 %v4859_v5, %v7211_v43  ;;  %v7271_v40 = vadd.f32 %v4920_v2, %v4138_v4 }
 0x436   :  { %4269 = vmax.xlane.f32.xlu0 %v7271_v40  ;;  %v7274_v9 = vadd.f32 %v4923_v7, %v4141_v0 }
 0x438   :  { %4271 = vmax.xlane.f32.xlu1 %v7274_v9 }
 0x48b   :  { %v4242_v11 = vpop.xlane.xlu0 %4241 }
 0x48c   :  { %v7278_v12 = vsub.f32 %v7215_v38, %v4242_v11 }
 0x48e   :  { %v4289_v13 = vmul.f32 1.442695, %v7278_v12 }
 0x48f   :  { %v4244_v14 = vpop.xlane.xlu0 %4243 }
 0x490   :  { %5833 = vpow2.f32 %v4289_v13  ;;  %v7282_v24 = vsub.f32 %v7218_v26, %v4244_v14 }
 0x492   :  { %v4291_v43 = vmul.f32 1.442695, %v7282_v24 }
 0x493   :  { %v4246_v10 = vpop.xlane.xlu1 %4245 }
 0x494   :  { %5835 = vpow2.f32 %v4291_v43  ;;  %v7286_v16 = vsub.f32 %v7223_v55, %v4246_v10 }
 0x496   :  { %v4293_v17 = vmul.f32 1.442695, %v7286_v16 }
 0x497   :  { %v4248_v18 = vpop.xlane.xlu1 %4247 }
 0x498   :  { %5837 = vpow2.f32 %v4293_v17  ;;  %v7290_v38 = vsub.f32 %v7226_v53, %v4248_v18 }
 0x49a   :  { %v5834_v49 = vpop.eup %5833  ;;  %v4295_v20 = vmul.f32 1.442695, %v7290_v38 }
 0x49b   :  { %4321 = vadd.xlane.f32.xlu0 %v5834_v49  ;;  %v4250_v26 = vpop.xlane.xlu0 %4249 }
 0x49c   :  { %5839 = vpow2.f32 %v4295_v20  ;;  %v7294_v23 = vsub.f32 %v7231_v22, %v4250_v26 }
 0x49d   :  { %v4252_v50 = vpop.xlane.xlu1 %4251 }
 0x49e   :  { %v5836_v25 = vpop.eup %5835  ;;  %v4297_v55 = vmul.f32 1.442695, %v7294_v23  ;;  %v7298_v52 = vsub.f32 %v7234_v42, %v4252_v50 }
 0x49f   :  { %4323 = vadd.xlane.f32.xlu1 %v5836_v25 }
 0x4a0   :  { %5841 = vpow2.f32 %v4297_v55  ;;  %v4299_v53 = vmul.f32 1.442695, %v7298_v52 }
 0x4a2   :  { %v5838_v54 = vpop.eup %5837  ;;  %5843 = vpow2.f32 %v4299_v53 }
 0x4a3   :  { %4325 = vadd.xlane.f32.xlu0 %v5838_v54  ;;  %v4254_v48 = vpop.xlane.xlu0 %4253 }
 0x4a4   :  { %v7302_v27 = vsub.f32 %v7239_v1, %v4254_v48 }
 0x4a5   :  { %v4256_v22 = vpop.xlane.xlu1 %4255 }
 0x4a6   :  { %v5840_v28 = vpop.eup %5839  ;;  %v4301_v30 = vmul.f32 1.442695, %v7302_v27  ;;  %v7306_v57 = vsub.f32 %v7242_v41, %v4256_v22 }
 0x4a7   :  { %4327 = vadd.xlane.f32.xlu1 %v5840_v28 }
 0x4a8   :  { %5845 = vpow2.f32 %v4301_v30  ;;  %v4303_v42 = vmul.f32 1.442695, %v7306_v57 }
 0x4aa   :  { %v5842_v31 = vpop.eup %5841  ;;  %5847 = vpow2.f32 %v4303_v42 }
 0x4ab   :  { %4329 = vadd.xlane.f32.xlu0 %v5842_v31  ;;  %v4258_v32 = vpop.xlane.xlu0 %4257 }
 0x4ac   :  { %v5844_v33 = vpop.eup %5843  ;;  %v7310_v34 = vsub.f32 %v7247_v8, %v4258_v32 }
 0x4ad   :  { %v4260_v1 = vpop.xlane.xlu1 %4259  ;;  %4331 = vadd.xlane.f32.xlu1 %v5844_v33 }
 0x4ae   :  { %v4305_v35 = vmul.f32 1.442695, %v7310_v34  ;;  %v7314_v36 = vsub.f32 %v7250_v15, %v4260_v1 }
 0x4b0   :  { %5849 = vpow2.f32 %v4305_v35  ;;  %v4307_v41 = vmul.f32 1.442695, %v7314_v36 }
 0x4b2   :  { %v5846_v37 = vpop.eup %5845  ;;  %5851 = vpow2.f32 %v4307_v41 }
 0x4b3   :  { %4333 = vadd.xlane.f32.xlu0 %v5846_v37  ;;  %v4262_v39 = vpop.xlane.xlu0 %4261 }
 0x4b4   :  { %v5848_v44 = vpop.eup %5847  ;;  %v7318_v45 = vsub.f32 %v7255_v29, %v4262_v39 }
 0x4b5   :  { %v4264_v8 = vpop.xlane.xlu1 %4263  ;;  %4335 = vadd.xlane.f32.xlu1 %v5848_v44 }
 0x4b6   :  { %v4309_v46 = vmul.f32 1.442695, %v7318_v45  ;;  %v7322_v21 = vsub.f32 %v7258_v56, %v4264_v8 }
 0x4b8   :  { %5853 = vpow2.f32 %v4309_v46  ;;  %v4311_v15 = vmul.f32 1.442695, %v7322_v21 }
 0x4ba   :  { %v5850_v51 = vpop.eup %5849  ;;  %5855 = vpow2.f32 %v4311_v15 }
 0x4bb   :  { %4337 = vadd.xlane.f32.xlu0 %v5850_v51  ;;  %v4266_v60 = vpop.xlane.xlu0 %4265 }
 0x4bc   :  { %v5852_v62 = vpop.eup %5851  ;;  %v7326_v59 = vsub.f32 %v7263_v47, %v4266_v60 }
 0x4bd   :  { %v4268_v29 = vpop.xlane.xlu1 %4267  ;;  %4339 = vadd.xlane.f32.xlu1 %v5852_v62 }
 0x4be   :  { %v4313_v63 = vmul.f32 1.442695, %v7326_v59  ;;  %v7330_v19 = vsub.f32 %v7266_v58, %v4268_v29 }
 0x4c0   :  { %5857 = vpow2.f32 %v4313_v63  ;;  %v4315_v56 = vmul.f32 1.442695, %v7330_v19 }
 0x4c2   :  { %v5854_v2 = vpop.eup %5853  ;;  %5859 = vpow2.f32 %v4315_v56 }
 0x4c3   :  { %4341 = vadd.xlane.f32.xlu0 %v5854_v2  ;;  %v4270_v61 = vpop.xlane.xlu0 %4269 }
 0x4c4   :  { %v5856_v3 = vpop.eup %5855  ;;  %v7334_v4 = vsub.f32 %v7271_v40, %v4270_v61 }
 0x4c5   :  { %v4272_v47 = vpop.xlane.xlu1 %4271  ;;  %4343 = vadd.xlane.f32.xlu1 %v5856_v3 }
 0x4c6   :  { %v4317_v5 = vmul.f32 1.442695, %v7334_v4  ;;  %v7338_v6 = vsub.f32 %v7274_v9, %v4272_v47 }
 0x4c8   :  { %5861 = vpow2.f32 %v4317_v5  ;;  %v4319_v58 = vmul.f32 1.442695, %v7338_v6 }
 0x4ca   :  { %v5858_v7 = vpop.eup %5857  ;;  %5863 = vpow2.f32 %v4319_v58 }
 0x4cb   :  { %4345 = vadd.xlane.f32.xlu0 %v5858_v7 }
 0x4cc   :  { %v5860_v0 = vpop.eup %5859 }
 0x4cd   :  { %4347 = vadd.xlane.f32.xlu1 %v5860_v0 }
 0x4d2   :  { %v5862_v11 = vpop.eup %5861 }
 0x4d3   :  { %4349 = vadd.xlane.f32.xlu0 %v5862_v11 }
 0x4d4   :  { %v5864_v13 = vpop.eup %5863 }
 0x4d5   :  { %4351 = vadd.xlane.f32.xlu1 %v5864_v13 }
 0x528   :  { %v4322_v40 = vpop.xlane.xlu0 %4321 }
 0x529   :  { %5865 = vlog2.f32 %v4322_v40 }
 0x52c   :  { %v4324_v14 = vpop.xlane.xlu1 %4323 }
 0x52d   :  { %5867 = vlog2.f32 %v4324_v14 }
 0x530   :  { %v4326_v43 = vpop.xlane.xlu0 %4325 }
 0x531   :  { %5869 = vlog2.f32 %v4326_v43 }
 0x533   :  { %v5866_v9 = vpop.eup %5865 }
 0x534   :  { %v4354_v10 = vmul.f32 0.6931472, %v5866_v9  ;;  %v4328_v17 = vpop.xlane.xlu1 %4327 }
 0x535   :  { %5871 = vlog2.f32 %v4328_v17 }
 0x536   :  { %v4385_v18 = vsub.f32 %v7278_v12, %v4354_v10 }
 0x537   :  { %v5868_v49 = vpop.eup %5867 }
 0x538   :  { %4401 = vst [vmem:[%s7412_s7] sm:$0xff] %v4385_v18  ;;  %v4356_v20 = vmul.f32 0.6931472, %v5868_v49  ;;  %v4330_v26 = vpop.xlane.xlu0 %4329 }
 0x539   :  { %5873 = vlog2.f32 %v4330_v26 }
 0x53a   :  { %v4386_v50 = vsub.f32 %v7282_v24, %v4356_v20  ;;  %v4332_v25 = vpop.xlane.xlu1 %4331 }
 0x53b   :  { %v5870_v55 = vpop.eup %5869  ;;  %5875 = vlog2.f32 %v4332_v25 }
 0x53c   :  { %4402 = vst [vmem:[%s7412_s7 + $0x8] sm:$0xff] %v4386_v50  ;;  %v4358_v53 = vmul.f32 0.6931472, %v5870_v55 }
 0x53e   :  { %v4387_v12 = vsub.f32 %v7286_v16, %v4358_v53 }
 0x53f   :  { %v5872_v54 = vpop.eup %5871 }
 0x540   :  { %4403 = vst [vmem:[%s7412_s7 + $0x10] sm:$0xff] %v4387_v12  ;;  %v4360_v48 = vmul.f32 0.6931472, %v5872_v54  ;;  %v4334_v22 = vpop.xlane.xlu0 %4333 }
 0x541   :  { %5877 = vlog2.f32 %v4334_v22 }
 0x542   :  { %v4388_v24 = vsub.f32 %v7290_v38, %v4360_v48  ;;  %v4336_v28 = vpop.xlane.xlu1 %4335 }
 0x543   :  { %v5874_v30 = vpop.eup %5873  ;;  %5879 = vlog2.f32 %v4336_v28 }
 0x544   :  { %4404 = vst [vmem:[%s7412_s7 + $0x18] sm:$0xff] %v4388_v24  ;;  %v4362_v42 = vmul.f32 0.6931472, %v5874_v30 }
 0x545   :  { %v5876_v31 = vpop.eup %5875 }
 0x546   :  { %v4389_v16 = vsub.f32 %v7294_v23, %v4362_v42  ;;  %v4364_v32 = vmul.f32 0.6931472, %v5876_v31 }
 0x548   :  { %4405 = vst [vmem:[%s7412_s7 + $0x20] sm:$0xff] %v4389_v16  ;;  %v4390_v33 = vsub.f32 %v7298_v52, %v4364_v32  ;;  %v4338_v1 = vpop.xlane.xlu0 %4337 }
 0x549   :  { %5881 = vlog2.f32 %v4338_v1 }
 0x54a   :  { %4406 = vst [vmem:[%s7412_s7 + $0x28] sm:$0xff] %v4390_v33  ;;  %v4340_v38 = vpop.xlane.xlu1 %4339 }
 0x54b   :  { %v5878_v35 = vpop.eup %5877  ;;  %5883 = vlog2.f32 %v4340_v38 }
 0x54c   :  { %v4366_v41 = vmul.f32 0.6931472, %v5878_v35 }
 0x54d   :  { %v5880_v37 = vpop.eup %5879 }
 0x54e   :  { %v4391_v23 = vsub.f32 %v7302_v27, %v4366_v41  ;;  %v4368_v39 = vmul.f32 0.6931472, %v5880_v37 }
 0x550   :  { %4407 = vst [vmem:[%s7412_s7 + $0x30] sm:$0xff] %v4391_v23  ;;  %v4392_v52 = vsub.f32 %v7306_v57, %v4368_v39  ;;  %v4342_v44 = vpop.xlane.xlu0 %4341 }
 0x551   :  { %5885 = vlog2.f32 %v4342_v44 }
 0x552   :  { %4408 = vst [vmem:[%s7412_s7 + $0x38] sm:$0xff] %v4392_v52  ;;  %v4344_v8 = vpop.xlane.xlu1 %4343 }
 0x553   :  { %v5882_v46 = vpop.eup %5881  ;;  %5887 = vlog2.f32 %v4344_v8 }
 0x554   :  { %v4370_v15 = vmul.f32 0.6931472, %v5882_v46 }
 0x555   :  { %v5884_v51 = vpop.eup %5883 }
 0x556   :  { %v4393_v27 = vsub.f32 %v7310_v34, %v4370_v15  ;;  %v4372_v60 = vmul.f32 0.6931472, %v5884_v51 }
 0x558   :  { %4409 = vst [vmem:[%s7412_s7 + $0x40] sm:$0xff] %v4393_v27  ;;  %v4394_v57 = vsub.f32 %v7314_v36, %v4372_v60  ;;  %v4346_v62 = vpop.xlane.xlu0 %4345 }
 0x559   :  { %5889 = vlog2.f32 %v4346_v62 }
 0x55a   :  { %4410 = vst [vmem:[%s7412_s7 + $0x48] sm:$0xff] %v4394_v57  ;;  %v4348_v29 = vpop.xlane.xlu1 %4347 }
 0x55b   :  { %v5886_v63 = vpop.eup %5885  ;;  %5891 = vlog2.f32 %v4348_v29 }
 0x55c   :  { %v4374_v56 = vmul.f32 0.6931472, %v5886_v63 }
 0x55d   :  { %v5888_v2 = vpop.eup %5887 }
 0x55e   :  { %v4395_v34 = vsub.f32 %v7318_v45, %v4374_v56  ;;  %v4376_v61 = vmul.f32 0.6931472, %v5888_v2 }
 0x560   :  { %4411 = vst [vmem:[%s7412_s7 + $0x50] sm:$0xff] %v4395_v34  ;;  %v4396_v36 = vsub.f32 %v7322_v21, %v4376_v61  ;;  %v4350_v3 = vpop.xlane.xlu0 %4349 }
 0x561   :  { %5893 = vlog2.f32 %v4350_v3 }
 0x562   :  { %4412 = vst [vmem:[%s7412_s7 + $0x58] sm:$0xff] %v4396_v36  ;;  %v4352_v47 = vpop.xlane.xlu1 %4351 }
 0x563   :  { %v5890_v5 = vpop.eup %5889  ;;  %5895 = vlog2.f32 %v4352_v47 }
 0x564   :  { %v4378_v58 = vmul.f32 0.6931472, %v5890_v5 }
 0x565   :  { %v5892_v7 = vpop.eup %5891 }
 0x566   :  { %v4397_v45 = vsub.f32 %v7326_v59, %v4378_v58  ;;  %v4380_v0 = vmul.f32 0.6931472, %v5892_v7 }
 0x568   :  { %4413 = vst [vmem:[%s7412_s7 + $0x60] sm:$0xff] %v4397_v45  ;;  %v4398_v21 = vsub.f32 %v7330_v19, %v4380_v0 }
 0x56a   :  { %4414 = vst [vmem:[%s7412_s7 + $0x68] sm:$0xff] %v4398_v21 }
 0x56b   :  { %v5894_v11 = vpop.eup %5893 }
 0x56c   :  { %v4382_v13 = vmul.f32 0.6931472, %v5894_v11 }
 0x56d   :  { %v5896_v40 = vpop.eup %5895 }
 0x56e   :  { %v4399_v14 = vsub.f32 %v7334_v4, %v4382_v13  ;;  %v4384_v43 = vmul.f32 0.6931472, %v5896_v40 }
 0x570   :  { %4415 = vst [vmem:[%s7412_s7 + $0x70] sm:$0xff] %v4399_v14  ;;  %v4400_v59 = vsub.f32 %v7338_v6, %v4384_v43 }
 0x572   :  { %4416 = vst [vmem:[%s7412_s7 + $0x78] sm:$0xff] %v4400_v59 }
 0x573   :  { %4421 = vsyncpa [#allocation3], 1 }
 0x574   :  { %4422 = vsyncpa [#allocation5], 1 }

</bundles_post_ra>
